<compile_context>
chip_gen: v7x
topology: tpu7x:2x2x1
jax: 0.10.0
libtpu: 0.0.40
codegen_flags: <defaults>
</compile_context>

<pallas_src>
import functools

import jax
import jax.numpy as jnp
from jax.experimental import pallas as pl
from jax.experimental.pallas import tpu as pltpu


def _round_up(x, m):
    return (x + m - 1) // m * m


# ---------------------------------------------------------------------------
# Pallas kernel: fused GEMM (bf16 x bf16 -> f32) + bias + activation
# ---------------------------------------------------------------------------
def _gemm_bias_act_kernel(x_ref, w_ref, b_ref, o_ref, *, act):
    acc = jnp.dot(x_ref[...], w_ref[...], preferred_element_type=jnp.float32)
    acc = acc + b_ref[...]  # (1, N) broadcasts over rows
    if act == "relu":
        acc = jnp.maximum(acc, 0.0)
    elif act == "sigmoid":
        acc = 1.0 / (1.0 + jnp.exp(-acc))
    o_ref[...] = acc.astype(o_ref.dtype)


def gemm_bias_act(patches, w_mat, bias, act):
    """patches: (M, Kp) bf16, w_mat: (Kp, Np) bf16, bias: (1, Np) f32 -> (M, Np) f32."""
    M, Kp = patches.shape
    Kp2, Np = w_mat.shape
    assert Kp == Kp2

    # Largest block that fits comfortably in VMEM; at this model's sizes
    # (M <= 128) every layer is a single grid step with no M padding.
    Mp = _round_up(M, 8)
    tm = min(Mp, 512)
    Mp = _round_up(Mp, tm)
    if Mp != M:
        patches = jnp.pad(patches, ((0, Mp - M), (0, 0)))
    grid = (Mp // tm,)

    out = pl.pallas_call(
        functools.partial(_gemm_bias_act_kernel, act=act),
        out_shape=jax.ShapeDtypeStruct((Mp, Np), jnp.float32),
        grid_spec=pltpu.PrefetchScalarGridSpec(
            num_scalar_prefetch=0,
            grid=grid,
            in_specs=[
                pl.BlockSpec((tm, Kp), lambda i: (i, 0)),   # row tile of patches
                pl.BlockSpec((Kp, Np), lambda i: (0, 0)),   # full weight matrix
                pl.BlockSpec((1, Np), lambda i: (0, 0)),    # bias row
            ],
            out_specs=pl.BlockSpec((tm, Np), lambda i: (i, 0)),
        ),
        compiler_params=pltpu.CompilerParams(dimension_semantics=("parallel",)),
    )(patches, w_mat, bias)
    if Mp != M:
        out = out[:M]
    return out


# ---------------------------------------------------------------------------
# Forward Conv2d: im2col (bf16) + fused GEMM
# ---------------------------------------------------------------------------
def _extract_patches(x, k, stride, padding, k_pad_to):
    """x: (N, H, W, C) -> patches (N*Ho*Wo, k_pad_to), tap order (kh, kw, c)."""
    x = jnp.pad(x, ((0, 0), (padding, padding), (padding, padding), (0, 0)))
    n, hp, wp, c = x.shape
    ho = (hp - k) // stride + 1
    wo = (wp - k) // stride + 1
    cols = []
    for i in range(k):
        for j in range(k):
            cols.append(x[:, i:i + ho * stride:stride, j:j + wo * stride:stride, :])
    pad_k = k_pad_to - k * k * c
    if pad_k > 0:  # fold K-padding into the concat (no second copy)
        cols.append(jnp.zeros((n, ho, wo, pad_k), x.dtype))
    patches = jnp.concatenate(cols, axis=-1)
    return patches.reshape(n * ho * wo, k_pad_to), (n, ho, wo)


def conv2d(x, w_mat, bias, cout, *, k=3, stride=2, padding=1, act="relu"):
    """x: NHWC f32.  w_mat: (Kp, Np) bf16 prepped at init.  -> NHWC f32."""
    Kp, Np = w_mat.shape
    xb = x.astype(jnp.bfloat16)
    patches, (n, ho, wo) = _extract_patches(xb, k, stride, padding, Kp)
    out = gemm_bias_act(patches, w_mat, bias, act)   # (M, Np) f32
    out = out[:, :cout]
    return out.reshape(n, ho, wo, cout)


# ---------------------------------------------------------------------------
# ConvTranspose2d(k=3, stride=2, pad=1, out_pad=1) as a sub-pixel GEMM
#   out[2m+py, 2n+px, co] = b[co] + sum_{dr,dc in {0,1}} x[m+dr, n+dc, :] @ Wblk
# so the packed GEMM has K = 4*Cin (shifted copies) and N = 4*Cout (parities);
# zero-dilation (75% zero MXU rows) is never materialized.
# ---------------------------------------------------------------------------
def conv_transpose2d(x, w_mat, bias, cout, *, act="relu"):
    n, h, wdim, c = x.shape
    Kp, Np = w_mat.shape
    xb = x.astype(jnp.bfloat16)
    xp = jnp.pad(xb, ((0, 0), (0, 1), (0, 1), (0, 0)))
    cols = [
        xp[:, :h, :wdim, :],      # (dr=0, dc=0)
        xp[:, :h, 1:, :],         # (dr=0, dc=1)
        xp[:, 1:, :wdim, :],      # (dr=1, dc=0)
        xp[:, 1:, 1:, :],         # (dr=1, dc=1)
    ]
    if Kp > 4 * c:
        cols.append(jnp.zeros((n, h, wdim, Kp - 4 * c), xb.dtype))
    patches = jnp.concatenate(cols, axis=-1).reshape(n * h * wdim, Kp)

    out = gemm_bias_act(patches, w_mat, bias, act)       # (N*H*W, Np) f32
    out = out[:, :4 * cout].reshape(n, h, wdim, 2, 2, cout)   # (.., py, px, co)
    out = jnp.transpose(out, (0, 1, 3, 2, 4, 5)).reshape(n, 2 * h, 2 * wdim, cout)
    return out


# ---------------------------------------------------------------------------
# One-time weight preparation (transpose / pack / pad / bf16 cast)
# ---------------------------------------------------------------------------
def _prep_conv(w, b):
    """w: PyTorch Conv2d layout (Cout, Cin, k, k) -> (Kp, Np) bf16, (1, Np) f32."""
    cout, cin, k, _ = w.shape
    K = k * k * cin
    Kp = _round_up(K, 128)
    Np = _round_up(cout, 128)
    w_mat = jnp.transpose(w, (2, 3, 1, 0)).reshape(K, cout)   # (kh, kw, cin) x cout
    w_mat = jnp.pad(w_mat, ((0, Kp - K), (0, Np - cout)))
    bias = jnp.pad(b, (0, Np - cout)).reshape(1, Np)
    return w_mat.astype(jnp.bfloat16), bias.astype(jnp.float32)


def _prep_deconv(w, b):
    """w: PyTorch ConvTranspose2d layout (Cin, Cout, 3, 3) -> parity-packed GEMM weights."""
    cin, cout, k, _ = w.shape
    assert k == 3
    K, N = 4 * cin, 4 * cout
    Kp, Np = _round_up(K, 128), _round_up(N, 128)

    def tap(parity, delta):
        # which kernel tap contributes for a given output parity / input shift
        if parity == 0:
            return 1 if delta == 0 else None
        return 2 if delta == 0 else 0

    w_packed = jnp.zeros((4, cin, 4, cout), jnp.float32)
    for dr in (0, 1):
        for dc in (0, 1):
            p = 2 * dr + dc
            for py in (0, 1):
                for px in (0, 1):
                    q = 2 * py + px
                    kh, kw = tap(py, dr), tap(px, dc)
                    if kh is None or kw is None:
                        continue
                    w_packed = w_packed.at[p, :, q, :].set(w[:, :, kh, kw])
    w_mat = w_packed.reshape(K, N)
    w_mat = jnp.pad(w_mat, ((0, Kp - K), (0, Np - N)))
    bias = jnp.pad(jnp.tile(b, 4), (0, Np - N)).reshape(1, Np)
    return w_mat.astype(jnp.bfloat16), bias.astype(jnp.float32)


# ---------------------------------------------------------------------------
# Parameters (deterministic, PyTorch-default-style uniform init, then prepped)
# ---------------------------------------------------------------------------
def init_params(key):
    def u(k_, shape, fan_in):
        bound = 1.0 / jnp.sqrt(fan_in)
        return jax.random.uniform(k_, shape, jnp.float32, -bound, bound)

    ks = jax.random.split(key, 12)
    raw = {
        "enc1": (u(ks[0], (64, 3, 3, 3), 3 * 9), u(ks[1], (64,), 3 * 9)),
        "enc2": (u(ks[2], (128, 64, 3, 3), 64 * 9), u(ks[3], (128,), 64 * 9)),
        "enc3": (u(ks[4], (256, 128, 3, 3), 128 * 9), u(ks[5], (256,), 128 * 9)),
        "dec1": (u(ks[6], (256, 128, 3, 3), 128 * 9), u(ks[7], (128,), 128 * 9)),
        "dec2": (u(ks[8], (128, 64, 3, 3), 64 * 9), u(ks[9], (64,), 64 * 9)),
        "dec3": (u(ks[10], (64, 3, 3, 3), 3 * 9), u(ks[11], (3,), 3 * 9)),
    }
    params = {}
    for name in ("enc1", "enc2", "enc3"):
        w, b = raw[name]
        params[name + "_w"], params[name + "_b"] = _prep_conv(w, b)
    for name in ("dec1", "dec2", "dec3"):
        w, b = raw[name]
        params[name + "_w"], params[name + "_b"] = _prep_deconv(w, b)
    return params


# ---------------------------------------------------------------------------
# Forward pass (matches PyTorch Autoencoder.forward, eval mode)
# ---------------------------------------------------------------------------
@jax.jit
def autoencoder_forward(x_nchw, params):
    x = jnp.transpose(x_nchw, (0, 2, 3, 1))  # NCHW -> NHWC
    # encoder
    x = conv2d(x, params["enc1_w"], params["enc1_b"], 64)
    x = conv2d(x, params["enc2_w"], params["enc2_b"], 128)
    # Dropout(0.2): identity at inference
    x = conv2d(x, params["enc3_w"], params["enc3_b"], 256)
    # decoder
    x = conv_transpose2d(x, params["dec1_w"], params["dec1_b"], 128)
    # Dropout(0.2): identity at inference
    x = conv_transpose2d(x, params["dec2_w"], params["dec2_b"], 64)
    x = conv_transpose2d(x, params["dec3_w"], params["dec3_b"], 3, act="sigmoid")
    return jnp.transpose(x, (0, 3, 1, 2))  # NHWC -> NCHW


if __name__ == "__main__":
    key = jax.random.PRNGKey(0)
    kx, kp = jax.random.split(key)
    x = jax.random.normal(kx, (2, 3, 16, 16), jnp.float32)  # NCHW, like PyTorch
    params = init_params(kp)

    y = autoencoder_forward(x, params)
    y = jax.block_until_ready(y)

    assert y.shape == (2, 3, 16, 16), y.shape
    assert y.dtype == jnp.float32
    assert bool(jnp.all((y >= 0.0) & (y <= 1.0)))  # sigmoid output range
    print("KERNEL_OK")
</pallas_src>

<mosaic_0001>
module attributes {stable_mosaic.version = 11 : i64} {
  func.func @_gemm_bias_act_kernel(%arg0: i32, %arg1: memref<128x128xbf16, #tpu.memory_space<vmem>>, %arg2: memref<128x128xbf16, #tpu.memory_space<vmem>>, %arg3: memref<1x128xf32, #tpu.memory_space<vmem>>, %arg4: memref<128x128xf32, #tpu.memory_space<vmem>>) attributes {dimension_semantics = [#tpu.dimension_semantics<parallel>], iteration_bounds = array<i64: 1>, scalar_prefetch = 0 : i64, scratch_operands = 0 : i64, tpu.core_type = #tpu.core_type<tc>, window_params = [{transform_indices = @transform_0, window_bounds = array<i64: 128, 128>}, {pipeline_mode = #tpu.pipeline_mode<synchronous>, transform_indices = @transform_1, window_bounds = array<i64: 128, 128>}, {pipeline_mode = #tpu.pipeline_mode<synchronous>, transform_indices = @transform_2, window_bounds = array<i64: 1, 128>}, {transform_indices = @transform_3, window_bounds = array<i64: 128, 128>}]} {
    %c0 = arith.constant 0 : index
    %c0_0 = arith.constant 0 : index
    %0 = vector.load %arg1[%c0, %c0_0] : memref<128x128xbf16, #tpu.memory_space<vmem>>, vector<128x128xbf16>
    %c0_1 = arith.constant 0 : index
    %c0_2 = arith.constant 0 : index
    %1 = vector.load %arg2[%c0_1, %c0_2] : memref<128x128xbf16, #tpu.memory_space<vmem>>, vector<128x128xbf16>
    %cst = arith.constant dense<0.000000e+00> : vector<128x128xf32>
    %2 = tpu.matmul %0, %1, %cst {dimension_numbers = #tpu.dot_dimension_numbers<[1], [0], [0], [1], [0, 0, 1, 1], [], []>} : vector<128x128xbf16>, vector<128x128xbf16>, vector<128x128xf32> -> vector<128x128xf32>
    %c0_3 = arith.constant 0 : index
    %c0_4 = arith.constant 0 : index
    %3 = vector.load %arg3[%c0_3, %c0_4] : memref<1x128xf32, #tpu.memory_space<vmem>>, vector<1x128xf32>
    %4 = vector.broadcast %3 : vector<1x128xf32> to vector<128x128xf32>
    %5 = arith.addf %2, %4 : vector<128x128xf32>
    %cst_5 = arith.constant 0.000000e+00 : f32
    %6 = vector.broadcast %cst_5 : f32 to vector<128x128xf32>
    %7 = arith.maximumf %5, %6 : vector<128x128xf32>
    %c0_6 = arith.constant 0 : index
    %c0_7 = arith.constant 0 : index
    %8 = vector.load %arg4[%c0_6, %c0_7] : memref<128x128xf32, #tpu.memory_space<vmem>>, vector<128x128xf32>
    tpu.vector_store %arg4[%c0_6, %c0_7], %7 {strides = array<i32>} : memref<128x128xf32, #tpu.memory_space<vmem>>, vector<128x128xf32>,
    return
  }
  func.func @transform_0(%arg0: i32) -> (i32, i32) {
    %c0_i32 = arith.constant 0 : i32
    %c0_i32_0 = arith.constant 0 : i32
    return %arg0, %c0_i32 : i32, i32
  }
  func.func @transform_1(%arg0: i32) -> (i32, i32) {
    %c0_i32 = arith.constant 0 : i32
    %c0_i32_0 = arith.constant 0 : i32
    %c0_i32_1 = arith.constant 0 : i32
    return %c0_i32, %c0_i32_0 : i32, i32
  }
  func.func @transform_2(%arg0: i32) -> (i32, i32) {
    %c0_i32 = arith.constant 0 : i32
    %c0_i32_0 = arith.constant 0 : i32
    %c0_i32_1 = arith.constant 0 : i32
    return %c0_i32, %c0_i32_0 : i32, i32
  }
  func.func @transform_3(%arg0: i32) -> (i32, i32) {
    %c0_i32 = arith.constant 0 : i32
    %c0_i32_0 = arith.constant 0 : i32
    return %arg0, %c0_i32 : i32, i32
  }
}

module attributes {stable_mosaic.version = 11 : i64} {
  func.func @_gemm_bias_act_kernel(%arg0: i32, %arg1: memref<32x640xbf16, #tpu.memory_space<vmem>>, %arg2: memref<640x128xbf16, #tpu.memory_space<vmem>>, %arg3: memref<1x128xf32, #tpu.memory_space<vmem>>, %arg4: memref<32x128xf32, #tpu.memory_space<vmem>>) attributes {dimension_semantics = [#tpu.dimension_semantics<parallel>], iteration_bounds = array<i64: 1>, scalar_prefetch = 0 : i64, scratch_operands = 0 : i64, tpu.core_type = #tpu.core_type<tc>, window_params = [{transform_indices = @transform_0, window_bounds = array<i64: 32, 640>}, {pipeline_mode = #tpu.pipeline_mode<synchronous>, transform_indices = @transform_1, window_bounds = array<i64: 640, 128>}, {pipeline_mode = #tpu.pipeline_mode<synchronous>, transform_indices = @transform_2, window_bounds = array<i64: 1, 128>}, {transform_indices = @transform_3, window_bounds = array<i64: 32, 128>}]} {
    %c0 = arith.constant 0 : index
    %c0_0 = arith.constant 0 : index
    %0 = vector.load %arg1[%c0, %c0_0] : memref<32x640xbf16, #tpu.memory_space<vmem>>, vector<32x640xbf16>
    %c0_1 = arith.constant 0 : index
    %c0_2 = arith.constant 0 : index
    %1 = vector.load %arg2[%c0_1, %c0_2] : memref<640x128xbf16, #tpu.memory_space<vmem>>, vector<640x128xbf16>
    %cst = arith.constant dense<0.000000e+00> : vector<32x128xf32>
    %2 = tpu.matmul %0, %1, %cst {dimension_numbers = #tpu.dot_dimension_numbers<[1], [0], [0], [1], [0, 0, 1, 1], [], []>} : vector<32x640xbf16>, vector<640x128xbf16>, vector<32x128xf32> -> vector<32x128xf32>
    %c0_3 = arith.constant 0 : index
    %c0_4 = arith.constant 0 : index
    %3 = vector.load %arg3[%c0_3, %c0_4] : memref<1x128xf32, #tpu.memory_space<vmem>>, vector<1x128xf32>
    %4 = vector.broadcast %3 : vector<1x128xf32> to vector<32x128xf32>
    %5 = arith.addf %2, %4 : vector<32x128xf32>
    %cst_5 = arith.constant 0.000000e+00 : f32
    %6 = vector.broadcast %cst_5 : f32 to vector<32x128xf32>
    %7 = arith.maximumf %5, %6 : vector<32x128xf32>
    %c0_6 = arith.constant 0 : index
    %c0_7 = arith.constant 0 : index
    %8 = vector.load %arg4[%c0_6, %c0_7] : memref<32x128xf32, #tpu.memory_space<vmem>>, vector<32x128xf32>
    tpu.vector_store %arg4[%c0_6, %c0_7], %7 {strides = array<i32>} : memref<32x128xf32, #tpu.memory_space<vmem>>, vector<32x128xf32>,
    return
  }
  func.func @transform_0(%arg0: i32) -> (i32, i32) {
    %c0_i32 = arith.constant 0 : i32
    %c0_i32_0 = arith.constant 0 : i32
    return %arg0, %c0_i32 : i32, i32
  }
  func.func @transform_1(%arg0: i32) -> (i32, i32) {
    %c0_i32 = arith.constant 0 : i32
    %c0_i32_0 = arith.constant 0 : i32
    %c0_i32_1 = arith.constant 0 : i32
    return %c0_i32, %c0_i32_0 : i32, i32
  }
  func.func @transform_2(%arg0: i32) -> (i32, i32) {
    %c0_i32 = arith.constant 0 : i32
    %c0_i32_0 = arith.constant 0 : i32
    %c0_i32_1 = arith.constant 0 : i32
    return %c0_i32, %c0_i32_0 : i32, i32
  }
  func.func @transform_3(%arg0: i32) -> (i32, i32) {
    %c0_i32 = arith.constant 0 : i32
    %c0_i32_0 = arith.constant 0 : i32
    return %arg0, %c0_i32 : i32, i32
  }
}

module attributes {stable_mosaic.version = 11 : i64} {
  func.func @_gemm_bias_act_kernel(%arg0: i32, %arg1: memref<8x1152xbf16, #tpu.memory_space<vmem>>, %arg2: memref<1152x256xbf16, #tpu.memory_space<vmem>>, %arg3: memref<1x256xf32, #tpu.memory_space<vmem>>, %arg4: memref<8x256xf32, #tpu.memory_space<vmem>>) attributes {dimension_semantics = [#tpu.dimension_semantics<parallel>], iteration_bounds = array<i64: 1>, scalar_prefetch = 0 : i64, scratch_operands = 0 : i64, tpu.core_type = #tpu.core_type<tc>, window_params = [{transform_indices = @transform_0, window_bounds = array<i64: 8, 1152>}, {pipeline_mode = #tpu.pipeline_mode<synchronous>, transform_indices = @transform_1, window_bounds = array<i64: 1152, 256>}, {pipeline_mode = #tpu.pipeline_mode<synchronous>, transform_indices = @transform_2, window_bounds = array<i64: 1, 256>}, {transform_indices = @transform_3, window_bounds = array<i64: 8, 256>}]} {
    %c0 = arith.constant 0 : index
    %c0_0 = arith.constant 0 : index
    %0 = vector.load %arg1[%c0, %c0_0] : memref<8x1152xbf16, #tpu.memory_space<vmem>>, vector<8x1152xbf16>
    %c0_1 = arith.constant 0 : index
    %c0_2 = arith.constant 0 : index
    %1 = vector.load %arg2[%c0_1, %c0_2] : memref<1152x256xbf16, #tpu.memory_space<vmem>>, vector<1152x256xbf16>
    %cst = arith.constant dense<0.000000e+00> : vector<8x256xf32>
    %2 = tpu.matmul %0, %1, %cst {dimension_numbers = #tpu.dot_dimension_numbers<[1], [0], [0], [1], [0, 0, 1, 1], [], []>} : vector<8x1152xbf16>, vector<1152x256xbf16>, vector<8x256xf32> -> vector<8x256xf32>
    %c0_3 = arith.constant 0 : index
    %c0_4 = arith.constant 0 : index
    %3 = vector.load %arg3[%c0_3, %c0_4] : memref<1x256xf32, #tpu.memory_space<vmem>>, vector<1x256xf32>
    %4 = vector.broadcast %3 : vector<1x256xf32> to vector<8x256xf32>
    %5 = arith.addf %2, %4 : vector<8x256xf32>
    %cst_5 = arith.constant 0.000000e+00 : f32
    %6 = vector.broadcast %cst_5 : f32 to vector<8x256xf32>
    %7 = arith.maximumf %5, %6 : vector<8x256xf32>
    %c0_6 = arith.constant 0 : index
    %c0_7 = arith.constant 0 : index
    %8 = vector.load %arg4[%c0_6, %c0_7] : memref<8x256xf32, #tpu.memory_space<vmem>>, vector<8x256xf32>
    tpu.vector_store %arg4[%c0_6, %c0_7], %7 {strides = array<i32>} : memref<8x256xf32, #tpu.memory_space<vmem>>, vector<8x256xf32>,
    return
  }
  func.func @transform_0(%arg0: i32) -> (i32, i32) {
    %c0_i32 = arith.constant 0 : i32
    %c0_i32_0 = arith.constant 0 : i32
    return %arg0, %c0_i32 : i32, i32
  }
  func.func @transform_1(%arg0: i32) -> (i32, i32) {
    %c0_i32 = arith.constant 0 : i32
    %c0_i32_0 = arith.constant 0 : i32
    %c0_i32_1 = arith.constant 0 : i32
    return %c0_i32, %c0_i32_0 : i32, i32
  }
  func.func @transform_2(%arg0: i32) -> (i32, i32) {
    %c0_i32 = arith.constant 0 : i32
    %c0_i32_0 = arith.constant 0 : i32
    %c0_i32_1 = arith.constant 0 : i32
    return %c0_i32, %c0_i32_0 : i32, i32
  }
  func.func @transform_3(%arg0: i32) -> (i32, i32) {
    %c0_i32 = arith.constant 0 : i32
    %c0_i32_0 = arith.constant 0 : i32
    return %arg0, %c0_i32 : i32, i32
  }
}

module attributes {stable_mosaic.version = 11 : i64} {
  func.func @_gemm_bias_act_kernel(%arg0: i32, %arg1: memref<8x1024xbf16, #tpu.memory_space<vmem>>, %arg2: memref<1024x512xbf16, #tpu.memory_space<vmem>>, %arg3: memref<1x512xf32, #tpu.memory_space<vmem>>, %arg4: memref<8x512xf32, #tpu.memory_space<vmem>>) attributes {dimension_semantics = [#tpu.dimension_semantics<parallel>], iteration_bounds = array<i64: 1>, scalar_prefetch = 0 : i64, scratch_operands = 0 : i64, tpu.core_type = #tpu.core_type<tc>, window_params = [{transform_indices = @transform_0, window_bounds = array<i64: 8, 1024>}, {pipeline_mode = #tpu.pipeline_mode<synchronous>, transform_indices = @transform_1, window_bounds = array<i64: 1024, 512>}, {pipeline_mode = #tpu.pipeline_mode<synchronous>, transform_indices = @transform_2, window_bounds = array<i64: 1, 512>}, {transform_indices = @transform_3, window_bounds = array<i64: 8, 512>}]} {
    %c0 = arith.constant 0 : index
    %c0_0 = arith.constant 0 : index
    %0 = vector.load %arg1[%c0, %c0_0] : memref<8x1024xbf16, #tpu.memory_space<vmem>>, vector<8x1024xbf16>
    %c0_1 = arith.constant 0 : index
    %c0_2 = arith.constant 0 : index
    %1 = vector.load %arg2[%c0_1, %c0_2] : memref<1024x512xbf16, #tpu.memory_space<vmem>>, vector<1024x512xbf16>
    %cst = arith.constant dense<0.000000e+00> : vector<8x512xf32>
    %2 = tpu.matmul %0, %1, %cst {dimension_numbers = #tpu.dot_dimension_numbers<[1], [0], [0], [1], [0, 0, 1, 1], [], []>} : vector<8x1024xbf16>, vector<1024x512xbf16>, vector<8x512xf32> -> vector<8x512xf32>
    %c0_3 = arith.constant 0 : index
    %c0_4 = arith.constant 0 : index
    %3 = vector.load %arg3[%c0_3, %c0_4] : memref<1x512xf32, #tpu.memory_space<vmem>>, vector<1x512xf32>
    %4 = vector.broadcast %3 : vector<1x512xf32> to vector<8x512xf32>
    %5 = arith.addf %2, %4 : vector<8x512xf32>
    %cst_5 = arith.constant 0.000000e+00 : f32
    %6 = vector.broadcast %cst_5 : f32 to vector<8x512xf32>
    %7 = arith.maximumf %5, %6 : vector<8x512xf32>
    %c0_6 = arith.constant 0 : index
    %c0_7 = arith.constant 0 : index
    %8 = vector.load %arg4[%c0_6, %c0_7] : memref<8x512xf32, #tpu.memory_space<vmem>>, vector<8x512xf32>
    tpu.vector_store %arg4[%c0_6, %c0_7], %7 {strides = array<i32>} : memref<8x512xf32, #tpu.memory_space<vmem>>, vector<8x512xf32>,
    return
  }
  func.func @transform_0(%arg0: i32) -> (i32, i32) {
    %c0_i32 = arith.constant 0 : i32
    %c0_i32_0 = arith.constant 0 : i32
    return %arg0, %c0_i32 : i32, i32
  }
  func.func @transform_1(%arg0: i32) -> (i32, i32) {
    %c0_i32 = arith.constant 0 : i32
    %c0_i32_0 = arith.constant 0 : i32
    %c0_i32_1 = arith.constant 0 : i32
    return %c0_i32, %c0_i32_0 : i32, i32
  }
  func.func @transform_2(%arg0: i32) -> (i32, i32) {
    %c0_i32 = arith.constant 0 : i32
    %c0_i32_0 = arith.constant 0 : i32
    %c0_i32_1 = arith.constant 0 : i32
    return %c0_i32, %c0_i32_0 : i32, i32
  }
  func.func @transform_3(%arg0: i32) -> (i32, i32) {
    %c0_i32 = arith.constant 0 : i32
    %c0_i32_0 = arith.constant 0 : i32
    return %arg0, %c0_i32 : i32, i32
  }
}

module attributes {stable_mosaic.version = 11 : i64} {
  func.func @_gemm_bias_act_kernel(%arg0: i32, %arg1: memref<32x512xbf16, #tpu.memory_space<vmem>>, %arg2: memref<512x256xbf16, #tpu.memory_space<vmem>>, %arg3: memref<1x256xf32, #tpu.memory_space<vmem>>, %arg4: memref<32x256xf32, #tpu.memory_space<vmem>>) attributes {dimension_semantics = [#tpu.dimension_semantics<parallel>], iteration_bounds = array<i64: 1>, scalar_prefetch = 0 : i64, scratch_operands = 0 : i64, tpu.core_type = #tpu.core_type<tc>, window_params = [{transform_indices = @transform_0, window_bounds = array<i64: 32, 512>}, {pipeline_mode = #tpu.pipeline_mode<synchronous>, transform_indices = @transform_1, window_bounds = array<i64: 512, 256>}, {pipeline_mode = #tpu.pipeline_mode<synchronous>, transform_indices = @transform_2, window_bounds = array<i64: 1, 256>}, {transform_indices = @transform_3, window_bounds = array<i64: 32, 256>}]} {
    %c0 = arith.constant 0 : index
    %c0_0 = arith.constant 0 : index
    %0 = vector.load %arg1[%c0, %c0_0] : memref<32x512xbf16, #tpu.memory_space<vmem>>, vector<32x512xbf16>
    %c0_1 = arith.constant 0 : index
    %c0_2 = arith.constant 0 : index
    %1 = vector.load %arg2[%c0_1, %c0_2] : memref<512x256xbf16, #tpu.memory_space<vmem>>, vector<512x256xbf16>
    %cst = arith.constant dense<0.000000e+00> : vector<32x256xf32>
    %2 = tpu.matmul %0, %1, %cst {dimension_numbers = #tpu.dot_dimension_numbers<[1], [0], [0], [1], [0, 0, 1, 1], [], []>} : vector<32x512xbf16>, vector<512x256xbf16>, vector<32x256xf32> -> vector<32x256xf32>
    %c0_3 = arith.constant 0 : index
    %c0_4 = arith.constant 0 : index
    %3 = vector.load %arg3[%c0_3, %c0_4] : memref<1x256xf32, #tpu.memory_space<vmem>>, vector<1x256xf32>
    %4 = vector.broadcast %3 : vector<1x256xf32> to vector<32x256xf32>
    %5 = arith.addf %2, %4 : vector<32x256xf32>
    %cst_5 = arith.constant 0.000000e+00 : f32
    %6 = vector.broadcast %cst_5 : f32 to vector<32x256xf32>
    %7 = arith.maximumf %5, %6 : vector<32x256xf32>
    %c0_6 = arith.constant 0 : index
    %c0_7 = arith.constant 0 : index
    %8 = vector.load %arg4[%c0_6, %c0_7] : memref<32x256xf32, #tpu.memory_space<vmem>>, vector<32x256xf32>
    tpu.vector_store %arg4[%c0_6, %c0_7], %7 {strides = array<i32>} : memref<32x256xf32, #tpu.memory_space<vmem>>, vector<32x256xf32>,
    return
  }
  func.func @transform_0(%arg0: i32) -> (i32, i32) {
    %c0_i32 = arith.constant 0 : i32
    %c0_i32_0 = arith.constant 0 : i32
    return %arg0, %c0_i32 : i32, i32
  }
  func.func @transform_1(%arg0: i32) -> (i32, i32) {
    %c0_i32 = arith.constant 0 : i32
    %c0_i32_0 = arith.constant 0 : i32
    %c0_i32_1 = arith.constant 0 : i32
    return %c0_i32, %c0_i32_0 : i32, i32
  }
  func.func @transform_2(%arg0: i32) -> (i32, i32) {
    %c0_i32 = arith.constant 0 : i32
    %c0_i32_0 = arith.constant 0 : i32
    %c0_i32_1 = arith.constant 0 : i32
    return %c0_i32, %c0_i32_0 : i32, i32
  }
  func.func @transform_3(%arg0: i32) -> (i32, i32) {
    %c0_i32 = arith.constant 0 : i32
    %c0_i32_0 = arith.constant 0 : i32
    return %arg0, %c0_i32 : i32, i32
  }
}

module attributes {stable_mosaic.version = 11 : i64} {
  func.func @_gemm_bias_act_kernel(%arg0: i32, %arg1: memref<128x256xbf16, #tpu.memory_space<vmem>>, %arg2: memref<256x128xbf16, #tpu.memory_space<vmem>>, %arg3: memref<1x128xf32, #tpu.memory_space<vmem>>, %arg4: memref<128x128xf32, #tpu.memory_space<vmem>>) attributes {dimension_semantics = [#tpu.dimension_semantics<parallel>], iteration_bounds = array<i64: 1>, scalar_prefetch = 0 : i64, scratch_operands = 0 : i64, tpu.core_type = #tpu.core_type<tc>, window_params = [{transform_indices = @transform_0, window_bounds = array<i64: 128, 256>}, {pipeline_mode = #tpu.pipeline_mode<synchronous>, transform_indices = @transform_1, window_bounds = array<i64: 256, 128>}, {pipeline_mode = #tpu.pipeline_mode<synchronous>, transform_indices = @transform_2, window_bounds = array<i64: 1, 128>}, {transform_indices = @transform_3, window_bounds = array<i64: 128, 128>}]} {
    %c0 = arith.constant 0 : index
    %c0_0 = arith.constant 0 : index
    %0 = vector.load %arg1[%c0, %c0_0] : memref<128x256xbf16, #tpu.memory_space<vmem>>, vector<128x256xbf16>
    %c0_1 = arith.constant 0 : index
    %c0_2 = arith.constant 0 : index
    %1 = vector.load %arg2[%c0_1, %c0_2] : memref<256x128xbf16, #tpu.memory_space<vmem>>, vector<256x128xbf16>
    %cst = arith.constant dense<0.000000e+00> : vector<128x128xf32>
    %2 = tpu.matmul %0, %1, %cst {dimension_numbers = #tpu.dot_dimension_numbers<[1], [0], [0], [1], [0, 0, 1, 1], [], []>} : vector<128x256xbf16>, vector<256x128xbf16>, vector<128x128xf32> -> vector<128x128xf32>
    %c0_3 = arith.constant 0 : index
    %c0_4 = arith.constant 0 : index
    %3 = vector.load %arg3[%c0_3, %c0_4] : memref<1x128xf32, #tpu.memory_space<vmem>>, vector<1x128xf32>
    %4 = vector.broadcast %3 : vector<1x128xf32> to vector<128x128xf32>
    %5 = arith.addf %2, %4 : vector<128x128xf32>
    %cst_5 = arith.constant 0.000000e+00 : f32
    %6 = vector.broadcast %cst_5 : f32 to vector<128x128xf32>
    %7 = arith.subf %6, %5 : vector<128x128xf32>
    %8 = math.exp %7 : vector<128x128xf32>
    %cst_6 = arith.constant 1.000000e+00 : f32
    %9 = vector.broadcast %cst_6 : f32 to vector<128x128xf32>
    %10 = arith.addf %9, %8 : vector<128x128xf32>
    %cst_7 = arith.constant 1.000000e+00 : f32
    %11 = vector.broadcast %cst_7 : f32 to vector<128x128xf32>
    %12 = arith.divf %11, %10 : vector<128x128xf32>
    %c0_8 = arith.constant 0 : index
    %c0_9 = arith.constant 0 : index
    %13 = vector.load %arg4[%c0_8, %c0_9] : memref<128x128xf32, #tpu.memory_space<vmem>>, vector<128x128xf32>
    tpu.vector_store %arg4[%c0_8, %c0_9], %12 {strides = array<i32>} : memref<128x128xf32, #tpu.memory_space<vmem>>, vector<128x128xf32>,
    return
  }
  func.func @transform_0(%arg0: i32) -> (i32, i32) {
    %c0_i32 = arith.constant 0 : i32
    %c0_i32_0 = arith.constant 0 : i32
    return %arg0, %c0_i32 : i32, i32
  }
  func.func @transform_1(%arg0: i32) -> (i32, i32) {
    %c0_i32 = arith.constant 0 : i32
    %c0_i32_0 = arith.constant 0 : i32
    %c0_i32_1 = arith.constant 0 : i32
    return %c0_i32, %c0_i32_0 : i32, i32
  }
  func.func @transform_2(%arg0: i32) -> (i32, i32) {
    %c0_i32 = arith.constant 0 : i32
    %c0_i32_0 = arith.constant 0 : i32
    %c0_i32_1 = arith.constant 0 : i32
    return %c0_i32, %c0_i32_0 : i32, i32
  }
  func.func @transform_3(%arg0: i32) -> (i32, i32) {
    %c0_i32 = arith.constant 0 : i32
    %c0_i32_0 = arith.constant 0 : i32
    return %arg0, %c0_i32 : i32, i32
  }
}

</mosaic_0001>

<bundles_post_ra>
// kernel: autoencoder_forward.6
= control target key start
LH: loop header
LB: loop body
LE: loop exit
PB: predicated region body
PF: predicated region fallthrough
CT: control target
= control target key end

     0   :  { %s499_s1 = inlined_call_operand.vmem [shape: bf16[128,128], index: 1, kind: input, shape index: {}]   ;;  %s500_s0 = inlined_call_operand.vmem [shape: bf16[128,128], index: 0, kind: input, shape index: {}]   ;;  %s501_s2 = inlined_call_operand.vmem [shape: f32[1,128], index: 2, kind: input, shape index: {}]   ;;  %s502_s3 = inlined_call_operand.vmem [shape: f32[128,128], index: 3, kind: output, shape index: {}]  }
   0x1   :  { %v364_v0 = vld [vmem:[%s499_s1] sm:$0xff]   ;;  %v365_v1 = vld [vmem:[%s499_s1 + $0x8] sm:$0xff]   ;;  %v366_v2 = vld [vmem:[%s499_s1 + $0x10] sm:$0xff]  }
   0x2   :  { %316 = vmatprep.subr.bf16.mxu0 %v364_v0  ;;  %348 = vmatprep.subr.bf16.mxu1 %v364_v0  ;;  %v367_v3 = vld [vmem:[%s499_s1 + $0x18] sm:$0xff]   ;;  %v372_v4 = vld [vmem:[%s500_s0] sm:$0xff]   ;;  %v369_v7 = vld [vmem:[%s499_s1 + $0x28] sm:$0xff]  }
   0x3   :  { %317 = vmatpush3.bf16.msra.mxu0 %v364_v0  ;;  %356 = vmatpush3.bf16.msra.mxu1 %v364_v0  ;;  %v373_v5 = vld [vmem:[%s500_s0 + $0x20] sm:$0xff]   ;;  %v370_v8 = vld [vmem:[%s499_s1 + $0x30] sm:$0xff]   ;;  %v371_v9 = vld [vmem:[%s499_s1 + $0x38] sm:$0xff]  }
   0x4   :  { %318 = vmatprep.subr.bf16.mxu0 %v365_v1  ;;  %349 = vmatprep.subr.bf16.mxu1 %v365_v1  ;;  %v368_v6 = vld [vmem:[%s499_s1 + $0x20] sm:$0xff]   ;;  %v374_v10 = vld [vmem:[%s500_s0 + $0x8] sm:$0xff]   ;;  %v376_v12 = vld [vmem:[%s500_s0 + $0x10] sm:$0xff]  }
   0x5   :  { %332 = vmatprep.mubr.bf16.mxu0 %v372_v4  ;;  %340 = vmatprep.mubr.bf16.mxu1 %v373_v5  ;;  %v375_v11 = vld [vmem:[%s500_s0 + $0x28] sm:$0xff]   ;;  %v377_v13 = vld [vmem:[%s500_s0 + $0x30] sm:$0xff]   ;;  %v378_v14 = vld [vmem:[%s500_s0 + $0x18] sm:$0xff]  }
   0x6   :  { %v379_v15 = vld [vmem:[%s500_s0 + $0x38] sm:$0xff]   ;;  %v283_v16 = vld [vmem:[%s501_s2] ss:$0 sm:$0xff] }
   0x7   :  { %319 = vmatpush3.bf16.msra.mxu0 %v365_v1  ;;  %357 = vmatpush3.bf16.msra.mxu1 %v365_v1 }
   0x8   :  { %320 = vmatprep.subr.bf16.mxu0 %v366_v2  ;;  %350 = vmatprep.subr.bf16.mxu1 %v366_v2 }
   0xb   :  { %321 = vmatpush3.bf16.msra.mxu0 %v366_v2  ;;  %358 = vmatpush3.bf16.msra.mxu1 %v366_v2 }
   0xc   :  { %322 = vmatprep.subr.bf16.mxu0 %v367_v3  ;;  %351 = vmatprep.subr.bf16.mxu1 %v367_v3 }
   0xf   :  { %323 = vmatpush3.bf16.msra.mxu0 %v367_v3  ;;  %359 = vmatpush3.bf16.msra.mxu1 %v367_v3 }
  0x10   :  { %324 = vmatprep.subr.bf16.mxu0 %v368_v6  ;;  %352 = vmatprep.subr.bf16.mxu1 %v368_v6 }
  0x13   :  { %325 = vmatpush3.bf16.msra.mxu0 %v368_v6  ;;  %360 = vmatpush3.bf16.msra.mxu1 %v368_v6 }
  0x14   :  { %326 = vmatprep.subr.bf16.mxu0 %v369_v7  ;;  %353 = vmatprep.subr.bf16.mxu1 %v369_v7 }
  0x17   :  { %327 = vmatpush3.bf16.msra.mxu0 %v369_v7  ;;  %361 = vmatpush3.bf16.msra.mxu1 %v369_v7 }
  0x18   :  { %328 = vmatprep.subr.bf16.mxu0 %v370_v8  ;;  %354 = vmatprep.subr.bf16.mxu1 %v370_v8 }
  0x1b   :  { %329 = vmatpush3.bf16.msra.mxu0 %v370_v8  ;;  %362 = vmatpush3.bf16.msra.mxu1 %v370_v8 }
  0x1c   :  { %330 = vmatprep.subr.bf16.mxu0 %v371_v9  ;;  %355 = vmatprep.subr.bf16.mxu1 %v371_v9 }
  0x1f   :  { %331 = vmatpush3.bf16.msra.mxu0 %v371_v9  ;;  %363 = vmatpush3.bf16.msra.mxu1 %v371_v9 }
  0x22   :  { %333 = vmatmul.mubr.bf16.vlgmr.msra.gmra.mrb[0].mxu0 %v374_v10  ;;  %341 = vmatmul.mubr.bf16.vlgmr.msra.gmra.mrb[0].mxu1 %v375_v11 }
  0x23   :  { %336 = vmatprep.mubr.bf16.mxu0 %v376_v12  ;;  %344 = vmatprep.mubr.bf16.mxu1 %v377_v13 }
  0x2a   :  { %337 = vmatmul.mubr.bf16.gmra.mrb[4].mxu0 %v378_v14  ;;  %345 = vmatmul.mubr.bf16.gmra.mrb[4].mxu1 %v379_v15 }
  0xf5   :  { %v334_v17 = vpop.f32.mrb[0].mxu0  ;;  %v342_v18 = vpop.f32.mrb[0].mxu1 }
  0xf6   :  { %v193_v19 = vadd.f32 %v334_v17, %v283_v16  ;;  %v225_v20 = vadd.f32 %v342_v18, %v283_v16  ;;  %v184_v21 = vpop.f32.mrb[1].mxu0  ;;  %v216_v22 = vpop.f32.mrb[1].mxu1 }
  0xf7   :  { %v185_v23 = vadd.f32 %v283_v16, %v184_v21  ;;  %v217_v24 = vadd.f32 %v283_v16, %v216_v22  ;;  %v335_v25 = vpop.f32.mrb[2].mxu0  ;;  %v343_v26 = vpop.f32.mrb[2].mxu1 }
  0xf8   :  { %v249_v27 = vmax.f32 %v193_v19, 0.0  ;;  %v257_v28 = vmax.f32 %v225_v20, 0.0  ;;  %v196_v29 = vadd.f32 %v335_v25, %v283_v16  ;;  %v228_v30 = vadd.f32 %v343_v26, %v283_v16  ;;  %v187_v31 = vpop.f32.mrb[3].mxu0  ;;  %v219_v32 = vpop.f32.mrb[3].mxu1 }
  0xf9   :  { %v247_v33 = vmax.f32 %v185_v23, 0.0  ;;  %v255_v34 = vmax.f32 %v217_v24, 0.0  ;;  %v188_v35 = vadd.f32 %v283_v16, %v187_v31  ;;  %v220_v36 = vadd.f32 %v283_v16, %v219_v32 }
  0xfa   :  { %265 = vst [vmem:[%s502_s3 + $0x10] sm:$0xff] %v249_v27  ;;  %273 = vst [vmem:[%s502_s3 + $0x50] sm:$0xff] %v257_v28  ;;  %v250_v37 = vmax.f32 %v196_v29, 0.0  ;;  %v258_v38 = vmax.f32 %v228_v30, 0.0 }
  0xfb   :  { %263 = vst [vmem:[%s502_s3] sm:$0xff] %v247_v33  ;;  %271 = vst [vmem:[%s502_s3 + $0x40] sm:$0xff] %v255_v34  ;;  %v248_v39 = vmax.f32 %v188_v35, 0.0  ;;  %v256_v40 = vmax.f32 %v220_v36, 0.0 }
  0xfc   :  { %266 = vst [vmem:[%s502_s3 + $0x18] sm:$0xff] %v250_v37  ;;  %274 = vst [vmem:[%s502_s3 + $0x58] sm:$0xff] %v258_v38 }
  0xfd   :  { %264 = vst [vmem:[%s502_s3 + $0x8] sm:$0xff] %v248_v39  ;;  %272 = vst [vmem:[%s502_s3 + $0x48] sm:$0xff] %v256_v40  ;;  %v338_v41 = vpop.f32.mrb[4].mxu0  ;;  %v346_v42 = vpop.f32.mrb[4].mxu1 }
  0xfe   :  { %v209_v43 = vadd.f32 %v338_v41, %v283_v16  ;;  %v241_v44 = vadd.f32 %v346_v42, %v283_v16  ;;  %v200_v45 = vpop.f32.mrb[5].mxu0  ;;  %v232_v46 = vpop.f32.mrb[5].mxu1 }
  0xff   :  { %v201_v47 = vadd.f32 %v283_v16, %v200_v45  ;;  %v233_v48 = vadd.f32 %v283_v16, %v232_v46  ;;  %v339_v49 = vpop.f32.mrb[6].mxu0  ;;  %v347_v50 = vpop.f32.mrb[6].mxu1 }
 0x100   :  { %v253_v51 = vmax.f32 %v209_v43, 0.0  ;;  %v261_v52 = vmax.f32 %v241_v44, 0.0  ;;  %v212_v53 = vadd.f32 %v339_v49, %v283_v16  ;;  %v244_v54 = vadd.f32 %v347_v50, %v283_v16  ;;  %v203_v55 = vpop.f32.mrb[7].mxu0  ;;  %v235_v56 = vpop.f32.mrb[7].mxu1 }
 0x101   :  { %v251_v57 = vmax.f32 %v201_v47, 0.0  ;;  %v259_v58 = vmax.f32 %v233_v48, 0.0  ;;  %v204_v59 = vadd.f32 %v283_v16, %v203_v55  ;;  %v236_v60 = vadd.f32 %v283_v16, %v235_v56 }
 0x102   :  { %269 = vst [vmem:[%s502_s3 + $0x30] sm:$0xff] %v253_v51  ;;  %277 = vst [vmem:[%s502_s3 + $0x70] sm:$0xff] %v261_v52  ;;  %v254_v61 = vmax.f32 %v212_v53, 0.0  ;;  %v262_v62 = vmax.f32 %v244_v54, 0.0 }
 0x103   :  { %267 = vst [vmem:[%s502_s3 + $0x20] sm:$0xff] %v251_v57  ;;  %275 = vst [vmem:[%s502_s3 + $0x60] sm:$0xff] %v259_v58  ;;  %v252_v63 = vmax.f32 %v204_v59, 0.0  ;;  %v260_v0 = vmax.f32 %v236_v60, 0.0 }
 0x104   :  { %270 = vst [vmem:[%s502_s3 + $0x38] sm:$0xff] %v254_v61  ;;  %278 = vst [vmem:[%s502_s3 + $0x78] sm:$0xff] %v262_v62 }
 0x105   :  { %268 = vst [vmem:[%s502_s3 + $0x28] sm:$0xff] %v252_v63  ;;  %276 = vst [vmem:[%s502_s3 + $0x68] sm:$0xff] %v260_v0 }

// kernel: autoencoder_forward.7
= control target key start
LH: loop header
LB: loop body
LE: loop exit
PB: predicated region body
PF: predicated region fallthrough
CT: control target
= control target key end

     0   :  { %s941_s1 = inlined_call_operand.vmem [shape: bf16[640,128], index: 1, kind: input, shape index: {}]   ;;  %s942_s0 = inlined_call_operand.vmem [shape: bf16[32,640], index: 0, kind: input, shape index: {}]   ;;  %s943_s2 = inlined_call_operand.vmem [shape: f32[1,128], index: 2, kind: input, shape index: {}]   ;;  %s944_s3 = inlined_call_operand.vmem [shape: f32[32,128], index: 3, kind: output, shape index: {}]  }
   0x1   :  { %v702_v0 = vld [vmem:[%s941_s1 + $0x40] sm:$0xff]   ;;  %v706_v4 = vld [vmem:[%s941_s1 + $0x48] sm:$0xff]   ;;  %v710_v8 = vld [vmem:[%s941_s1 + $0x50] sm:$0xff]  }
   0x2   :  { %v703_v1 = vld [vmem:[%s941_s1] sm:$0xff]   ;;  %616 = vmatprep.subr.bf16.mxu0 %v702_v0  ;;  %v707_v5 = vld [vmem:[%s941_s1 + $0x8] sm:$0xff]   ;;  %v711_v9 = vld [vmem:[%s941_s1 + $0x10] sm:$0xff]  }
   0x3   :  { %v704_v2 = vld [vmem:[%s941_s1 + $0xc0] sm:$0xff]   ;;  %617 = vmatpush3.bf16.msra.mxu0 %v703_v1  ;;  %v708_v6 = vld [vmem:[%s941_s1 + $0xc8] sm:$0xff]   ;;  %v712_v10 = vld [vmem:[%s941_s1 + $0xd0] sm:$0xff]  }
   0x4   :  { %v705_v3 = vld [vmem:[%s941_s1 + $0x80] sm:$0xff]   ;;  %644 = vmatprep.subr.bf16.mxu1 %v704_v2  ;;  %618 = vmatprep.subr.bf16.mxu0 %v706_v4  ;;  %v709_v7 = vld [vmem:[%s941_s1 + $0x88] sm:$0xff]   ;;  %v713_v11 = vld [vmem:[%s941_s1 + $0x90] sm:$0xff]  }
   0x5   :  { %645 = vmatpush3.bf16.msra.mxu1 %v705_v3  ;;  %v714_v12 = vld [vmem:[%s941_s1 + $0x58] sm:$0xff]   ;;  %v718_v16 = vld [vmem:[%s941_s1 + $0x60] sm:$0xff]   ;;  %v722_v20 = vld [vmem:[%s941_s1 + $0x68] sm:$0xff]  }
   0x6   :  { %646 = vmatprep.subr.bf16.mxu1 %v708_v6  ;;  %v715_v13 = vld [vmem:[%s941_s1 + $0x18] sm:$0xff]   ;;  %v719_v17 = vld [vmem:[%s941_s1 + $0x20] sm:$0xff]   ;;  %v723_v21 = vld [vmem:[%s941_s1 + $0x28] sm:$0xff]  }
   0x7   :  { %619 = vmatpush3.bf16.msra.mxu0 %v707_v5  ;;  %v716_v14 = vld [vmem:[%s941_s1 + $0xd8] sm:$0xff]   ;;  %v720_v18 = vld [vmem:[%s941_s1 + $0xe0] sm:$0xff]   ;;  %v724_v22 = vld [vmem:[%s941_s1 + $0xe8] sm:$0xff]  }
   0x8   :  { %620 = vmatprep.subr.bf16.mxu0 %v710_v8  ;;  %v717_v15 = vld [vmem:[%s941_s1 + $0x98] sm:$0xff]   ;;  %v721_v19 = vld [vmem:[%s941_s1 + $0xa0] sm:$0xff]   ;;  %v725_v23 = vld [vmem:[%s941_s1 + $0xa8] sm:$0xff]  }
   0x9   :  { %647 = vmatpush3.bf16.msra.mxu1 %v709_v7  ;;  %v726_v24 = vld [vmem:[%s941_s1 + $0x70] sm:$0xff]   ;;  %v730_v28 = vld [vmem:[%s941_s1 + $0x78] sm:$0xff]   ;;  %v737_v34 = vld [vmem:[%s941_s1 + $0x100] sm:$0xff]  }
   0xa   :  { %648 = vmatprep.subr.bf16.mxu1 %v712_v10  ;;  %v727_v25 = vld [vmem:[%s941_s1 + $0x30] sm:$0xff]   ;;  %v731_v29 = vld [vmem:[%s941_s1 + $0x38] sm:$0xff]   ;;  %v740_v36 = vld [vmem:[%s942_s0 + $0xc] ss:$20 sps:$4 sm:$0xff]  }
   0xb   :  { %621 = vmatpush3.bf16.msra.mxu0 %v711_v9  ;;  %v728_v26 = vld [vmem:[%s941_s1 + $0xf0] sm:$0xff]   ;;  %v732_v30 = vld [vmem:[%s941_s1 + $0xf8] sm:$0xff]   ;;  %v741_v37 = vld [vmem:[%s941_s1 + $0x108] sm:$0xff]   ;;  %487 = vmatprep.mubr.bf16.mxu1 %v740_v36 }
   0xc   :  { %622 = vmatprep.subr.bf16.mxu0 %v714_v12  ;;  %v729_v27 = vld [vmem:[%s941_s1 + $0xb0] sm:$0xff]   ;;  %v735_v32 = vld [vmem:[%s942_s0 + $0x4] ss:$20 sps:$4 sm:$0xff]   ;;  %v738_v35 = vld [vmem:[%s942_s0 + $0x8] ss:$20 sps:$4 sm:$0xff]  }
   0xd   :  { %649 = vmatpush3.bf16.msra.mxu1 %v713_v11  ;;  %v733_v31 = vld [vmem:[%s942_s0] ss:$20 sps:$4 sm:$0xff]   ;;  %v736_v33 = vld [vmem:[%s941_s1 + $0xb8] sm:$0xff]   ;;  %438 = vmatprep.mubr.bf16.mxu0 %v735_v32  ;;  %v751_v43 = vld [vmem:[%s942_s0 + $0x30] ss:$20 sps:$4 sm:$0xff]  }
   0xe   :  { %650 = vmatprep.subr.bf16.mxu1 %v716_v14  ;;  %v742_v38 = vld [vmem:[%s941_s1 + $0x110] sm:$0xff]   ;;  %v745_v39 = vld [vmem:[%s942_s0 + $0x2c] ss:$20 sps:$4 sm:$0xff]   ;;  %v743_v40 = vld [vmem:[%s941_s1 + $0x118] sm:$0xff]  }
   0xf   :  { %623 = vmatpush3.bf16.msra.mxu0 %v715_v13  ;;  %v748_v41 = vld [vmem:[%s942_s0 + $0x28] ss:$20 sps:$4 sm:$0xff]   ;;  %v744_v44 = vld [vmem:[%s941_s1 + $0x120] sm:$0xff]   ;;  %v752_v47 = vld [vmem:[%s941_s1 + $0x130] sm:$0xff]  }
  0x10   :  { %624 = vmatprep.subr.bf16.mxu0 %v718_v16  ;;  %v749_v42 = vld [vmem:[%s942_s0 + $0x34] ss:$20 sps:$4 sm:$0xff]   ;;  %v754_v45 = vld [vmem:[%s942_s0 + $0x10] ss:$20 sps:$4 sm:$0xff]   ;;  %v753_v48 = vld [vmem:[%s941_s1 + $0x138] sm:$0xff]  }
  0x11   :  { %651 = vmatpush3.bf16.msra.mxu1 %v717_v15  ;;  %v747_v46 = vld [vmem:[%s941_s1 + $0x128] sm:$0xff]   ;;  %v565_v51 = vld [vmem:[%s943_s2] ss:$0 sm:$0xff] }
  0x12   :  { %652 = vmatprep.subr.bf16.mxu1 %v720_v18  ;;  %v755_v49 = vld [vmem:[%s942_s0 + $0x38] ss:$20 sps:$4 sm:$0xff]  }
  0x13   :  { %625 = vmatpush3.bf16.msra.mxu0 %v719_v17 }
  0x14   :  { %626 = vmatprep.subr.bf16.mxu0 %v722_v20 }
  0x15   :  { %653 = vmatpush3.bf16.msra.mxu1 %v721_v19 }
  0x16   :  { %654 = vmatprep.subr.bf16.mxu1 %v724_v22 }
  0x17   :  { %627 = vmatpush3.bf16.msra.mxu0 %v723_v21 }
  0x18   :  { %628 = vmatprep.subr.bf16.mxu0 %v726_v24 }
  0x19   :  { %655 = vmatpush3.bf16.msra.mxu1 %v725_v23 }
  0x1a   :  { %656 = vmatprep.subr.bf16.mxu1 %v728_v26 }
  0x1b   :  { %629 = vmatpush3.bf16.msra.mxu0 %v727_v25 }
  0x1c   :  { %630 = vmatprep.subr.bf16.mxu0 %v730_v28 }
  0x1d   :  { %657 = vmatpush3.bf16.msra.mxu1 %v729_v27 }
  0x1e   :  { %658 = vmatprep.subr.bf16.mxu1 %v732_v30 }
  0x1f   :  { %631 = vmatpush3.bf16.msra.mxu0 %v731_v29 }
  0x20   :  { %682 = vmatprep.subr.bf16.mxu0 %v737_v34 }
  0x21   :  { %659 = vmatpush3.bf16.msra.mxu1 %v736_v33 }
  0x22   :  { %439 = vmatmul.mubr.bf16.vlgmr.msra.gmra.mrb[0].mxu0 %v733_v31 }
  0x23   :  { %683 = vmatpush3.bf16.msra.mxu0 %v737_v34  ;;  %446 = vmatprep.mubr.bf16.mxu0 %v745_v39 }
  0x24   :  { %488 = vmatmul.mubr.bf16.vlgmr.msra.gmra.mrb[0].mxu1 %v738_v35  ;;  %684 = vmatprep.subr.bf16.mxu0 %v741_v37 }
  0x25   :  { %495 = vmatprep.mubr.bf16.mxu1 %v749_v42 }
  0x27   :  { %685 = vmatpush3.bf16.msra.mxu0 %v741_v37 }
  0x28   :  { %686 = vmatprep.subr.bf16.mxu0 %v742_v38 }
  0x2a   :  { %447 = vmatmul.mubr.bf16.gmra.mrb[4].mxu0 %v748_v41 }
  0x2b   :  { %687 = vmatpush3.bf16.msra.mxu0 %v742_v38  ;;  %698 = vmatprep.mubr.bf16.mxu0 %v754_v45 }
  0x2c   :  { %688 = vmatprep.subr.bf16.mxu0 %v743_v40  ;;  %496 = vmatmul.mubr.bf16.gmra.mrb[4].mxu1 %v751_v43 }
  0x2f   :  { %689 = vmatpush3.bf16.msra.mxu0 %v743_v40 }
  0x30   :  { %690 = vmatprep.subr.bf16.mxu0 %v744_v44 }
  0x33   :  { %691 = vmatpush3.bf16.msra.mxu0 %v744_v44 }
  0x34   :  { %692 = vmatprep.subr.bf16.mxu0 %v747_v46 }
  0x37   :  { %693 = vmatpush3.bf16.msra.mxu0 %v747_v46 }
  0x38   :  { %694 = vmatprep.subr.bf16.mxu0 %v752_v47 }
  0x3b   :  { %695 = vmatpush3.bf16.msra.mxu0 %v752_v47 }
  0x3c   :  { %696 = vmatprep.subr.bf16.mxu0 %v753_v48 }
  0x3f   :  { %697 = vmatpush3.bf16.msra.mxu0 %v753_v48 }
  0x42   :  { %699 = vmatmul.mubr.bf16.vlgmr.msra.gmra.mrb[8].mxu0 %v755_v49 }
  0xf5   :  { %v632_v50 = vpop.f32.mrb[0].mxu0 }
  0xf6   :  { %v633_v52 = vpop.f32.mrb[1].mxu0 }
  0xf7   :  { %v634_v53 = vadd.f32 %v633_v52, %v632_v50  ;;  %v635_v54 = vpop.f32.mrb[2].mxu0  ;;  %v660_v55 = vpop.f32.mrb[0].mxu1 }
  0xf8   :  { %v636_v56 = vpop.f32.mrb[3].mxu0  ;;  %v661_v59 = vpop.f32.mrb[1].mxu1 }
  0xf9   :  { %v441_v57 = vadd.f32 %v634_v53, %v565_v51  ;;  %v637_v58 = vadd.f32 %v636_v56, %v635_v54  ;;  %v662_v60 = vadd.f32 %v661_v59, %v660_v55  ;;  %v663_v61 = vpop.f32.mrb[2].mxu1 }
  0xfa   :  { %v664_v63 = vpop.f32.mrb[3].mxu1 }
  0xfb   :  { %v444_v62 = vadd.f32 %v637_v58, %v565_v51  ;;  %v665_v0 = vadd.f32 %v664_v63, %v663_v61  ;;  %v490_v1 = vadd.f32 %v662_v60, %v441_v57 }
  0xfd   :  { %v638_v2 = vpop.f32.mrb[4].mxu0  ;;  %v493_v4 = vadd.f32 %v665_v0, %v444_v62 }
  0xfe   :  { %v639_v3 = vpop.f32.mrb[5].mxu0 }
  0xff   :  { %v640_v5 = vadd.f32 %v639_v3, %v638_v2  ;;  %v641_v6 = vpop.f32.mrb[6].mxu0  ;;  %v666_v7 = vpop.f32.mrb[4].mxu1 }
 0x100   :  { %v642_v8 = vpop.f32.mrb[7].mxu0  ;;  %v667_v11 = vpop.f32.mrb[5].mxu1 }
 0x101   :  { %v449_v9 = vadd.f32 %v640_v5, %v565_v51  ;;  %v643_v10 = vadd.f32 %v642_v8, %v641_v6  ;;  %v668_v12 = vadd.f32 %v667_v11, %v666_v7  ;;  %v669_v13 = vpop.f32.mrb[6].mxu1 }
 0x102   :  { %v670_v15 = vpop.f32.mrb[7].mxu1 }
 0x103   :  { %v452_v14 = vadd.f32 %v643_v10, %v565_v51  ;;  %v671_v16 = vadd.f32 %v670_v15, %v669_v13  ;;  %v498_v17 = vadd.f32 %v668_v12, %v449_v9 }
 0x105   :  { %v501_v18 = vadd.f32 %v671_v16, %v452_v14 }
 0x115   :  { %v700_v19 = vpop.f32.mrb[8].mxu0 }
 0x116   :  { %v547_v20 = vadd.f32 %v700_v19, %v498_v17  ;;  %v538_v21 = vpop.f32.mrb[9].mxu0 }
 0x117   :  { %v539_v22 = vadd.f32 %v538_v21, %v490_v1  ;;  %v701_v23 = vpop.f32.mrb[10].mxu0 }
 0x118   :  { %v555_v24 = vmax.f32 %v547_v20, 0.0  ;;  %v550_v25 = vadd.f32 %v701_v23, %v501_v18  ;;  %v541_v26 = vpop.f32.mrb[11].mxu0 }
 0x119   :  { %v553_v27 = vmax.f32 %v539_v22, 0.0  ;;  %v542_v28 = vadd.f32 %v541_v26, %v493_v4 }
 0x11a   :  { %559 = vst [vmem:[%s944_s3 + $0x10] sm:$0xff] %v555_v24  ;;  %v556_v29 = vmax.f32 %v550_v25, 0.0 }
 0x11b   :  { %557 = vst [vmem:[%s944_s3] sm:$0xff] %v553_v27  ;;  %v554_v30 = vmax.f32 %v542_v28, 0.0 }
 0x11c   :  { %560 = vst [vmem:[%s944_s3 + $0x18] sm:$0xff] %v556_v29 }
 0x11d   :  { %558 = vst [vmem:[%s944_s3 + $0x8] sm:$0xff] %v554_v30 }

// kernel: autoencoder_forward.8
= control target key start
LH: loop header
LB: loop body
LE: loop exit
PB: predicated region body
PF: predicated region fallthrough
CT: control target
= control target key end

     0   :  { %s2025_s1 = inlined_call_operand.vmem [shape: bf16[1152,256], index: 1, kind: input, shape index: {}]   ;;  %s2026_s0 = inlined_call_operand.vmem [shape: bf16[8,1152], index: 0, kind: input, shape index: {}]   ;;  %s2027_s2 = inlined_call_operand.vmem [shape: f32[1,256], index: 2, kind: input, shape index: {}]   ;;  %s2028_s3 = inlined_call_operand.vmem [shape: f32[8,256], index: 3, kind: output, shape index: {}]  }
   0x1   :  { %v1311_v0 = vld [vmem:[%s2025_s1 + $0x4] ss:$8 sps:$4 sm:$0xff]   ;;  %v1315_v2 = vld [vmem:[%s2025_s1] ss:$8 sps:$4 sm:$0xff]   ;;  %v1317_v4 = vld [vmem:[%s2025_s1 + $0x14] ss:$8 sps:$4 sm:$0xff]  }
   0x2   :  { %v1313_v1 = vld [vmem:[%s2025_s1 + $0x204] ss:$8 sps:$4 sm:$0xff]   ;;  %928 = vmatprep.subr.bf16.mxu1 %v1311_v0  ;;  %v1316_v3 = vld [vmem:[%s2025_s1 + $0x200] ss:$8 sps:$4 sm:$0xff]   ;;  %v1319_v5 = vld [vmem:[%s2025_s1 + $0x214] ss:$8 sps:$4 sm:$0xff]  }
   0x3   :  { %1010 = vmatprep.subr.bf16.mxu0 %v1313_v1  ;;  %929 = vmatpush1.bf16.msra.mxu1 %v1315_v2  ;;  %v1321_v6 = vld [vmem:[%s2025_s1 + $0x10] ss:$8 sps:$4 sm:$0xff]   ;;  %v1323_v8 = vld [vmem:[%s2025_s1 + $0x24] ss:$8 sps:$4 sm:$0xff]   ;;  %v1327_v10 = vld [vmem:[%s2025_s1 + $0x20] ss:$8 sps:$4 sm:$0xff]  }
   0x4   :  { %1011 = vmatpush1.bf16.msra.mxu0 %v1316_v3  ;;  %930 = vmatprep.subr.bf16.mxu1 %v1317_v4  ;;  %v1322_v7 = vld [vmem:[%s2025_s1 + $0x210] ss:$8 sps:$4 sm:$0xff]   ;;  %v1325_v9 = vld [vmem:[%s2025_s1 + $0x224] ss:$8 sps:$4 sm:$0xff]   ;;  %v1328_v11 = vld [vmem:[%s2025_s1 + $0x220] ss:$8 sps:$4 sm:$0xff]  }
   0x5   :  { %1012 = vmatprep.subr.bf16.mxu0 %v1319_v5  ;;  %v1329_v12 = vld [vmem:[%s2025_s1 + $0x34] ss:$8 sps:$4 sm:$0xff]   ;;  %v1333_v14 = vld [vmem:[%s2025_s1 + $0x30] ss:$8 sps:$4 sm:$0xff]   ;;  %v1335_v16 = vld [vmem:[%s2025_s1 + $0x44] ss:$8 sps:$4 sm:$0xff]  }
   0x6   :  { %v1331_v13 = vld [vmem:[%s2025_s1 + $0x234] ss:$8 sps:$4 sm:$0xff]   ;;  %v1334_v15 = vld [vmem:[%s2025_s1 + $0x230] ss:$8 sps:$4 sm:$0xff]   ;;  %v1337_v17 = vld [vmem:[%s2025_s1 + $0x244] ss:$8 sps:$4 sm:$0xff]  }
   0x7   :  { %931 = vmatpush1.bf16.msra.mxu1 %v1321_v6  ;;  %v1339_v18 = vld [vmem:[%s2025_s1 + $0x40] ss:$8 sps:$4 sm:$0xff]   ;;  %v1341_v20 = vld [vmem:[%s2025_s1 + $0x54] ss:$8 sps:$4 sm:$0xff]   ;;  %v1345_v22 = vld [vmem:[%s2025_s1 + $0x50] ss:$8 sps:$4 sm:$0xff]  }
   0x8   :  { %1013 = vmatpush1.bf16.msra.mxu0 %v1322_v7  ;;  %932 = vmatprep.subr.bf16.mxu1 %v1323_v8  ;;  %v1340_v19 = vld [vmem:[%s2025_s1 + $0x240] ss:$8 sps:$4 sm:$0xff]   ;;  %v1343_v21 = vld [vmem:[%s2025_s1 + $0x254] ss:$8 sps:$4 sm:$0xff]   ;;  %v1346_v23 = vld [vmem:[%s2025_s1 + $0x250] ss:$8 sps:$4 sm:$0xff]  }
   0x9   :  { %1014 = vmatprep.subr.bf16.mxu0 %v1325_v9  ;;  %v1347_v24 = vld [vmem:[%s2025_s1 + $0x64] ss:$8 sps:$4 sm:$0xff]   ;;  %v1351_v26 = vld [vmem:[%s2025_s1 + $0x60] ss:$8 sps:$4 sm:$0xff]   ;;  %v1353_v28 = vld [vmem:[%s2025_s1 + $0x74] ss:$8 sps:$4 sm:$0xff]  }
   0xa   :  { %v1349_v25 = vld [vmem:[%s2025_s1 + $0x264] ss:$8 sps:$4 sm:$0xff]   ;;  %v1352_v27 = vld [vmem:[%s2025_s1 + $0x260] ss:$8 sps:$4 sm:$0xff]   ;;  %v1355_v29 = vld [vmem:[%s2025_s1 + $0x274] ss:$8 sps:$4 sm:$0xff]  }
   0xb   :  { %933 = vmatpush1.bf16.msra.mxu1 %v1327_v10  ;;  %v1357_v30 = vld [vmem:[%s2025_s1 + $0x70] ss:$8 sps:$4 sm:$0xff]   ;;  %v1359_v32 = vld [vmem:[%s2025_s1 + $0x84] ss:$8 sps:$4 sm:$0xff]   ;;  %v1363_v34 = vld [vmem:[%s2025_s1 + $0x80] ss:$8 sps:$4 sm:$0xff]  }
   0xc   :  { %1015 = vmatpush1.bf16.msra.mxu0 %v1328_v11  ;;  %934 = vmatprep.subr.bf16.mxu1 %v1329_v12  ;;  %v1358_v31 = vld [vmem:[%s2025_s1 + $0x270] ss:$8 sps:$4 sm:$0xff]   ;;  %v1361_v33 = vld [vmem:[%s2025_s1 + $0x284] ss:$8 sps:$4 sm:$0xff]   ;;  %v1364_v35 = vld [vmem:[%s2025_s1 + $0x280] ss:$8 sps:$4 sm:$0xff]  }
   0xd   :  { %1016 = vmatprep.subr.bf16.mxu0 %v1331_v13  ;;  %v1365_v36 = vld [vmem:[%s2025_s1 + $0x94] ss:$8 sps:$4 sm:$0xff]   ;;  %v1369_v38 = vld [vmem:[%s2025_s1 + $0x90] ss:$8 sps:$4 sm:$0xff]   ;;  %v1371_v40 = vld [vmem:[%s2025_s1 + $0xa4] ss:$8 sps:$4 sm:$0xff]  }
   0xe   :  { %v1367_v37 = vld [vmem:[%s2025_s1 + $0x294] ss:$8 sps:$4 sm:$0xff]   ;;  %v1370_v39 = vld [vmem:[%s2025_s1 + $0x290] ss:$8 sps:$4 sm:$0xff]   ;;  %v1373_v41 = vld [vmem:[%s2025_s1 + $0x2a4] ss:$8 sps:$4 sm:$0xff]  }
   0xf   :  { %935 = vmatpush1.bf16.msra.mxu1 %v1333_v14  ;;  %v1375_v42 = vld [vmem:[%s2025_s1 + $0xa0] ss:$8 sps:$4 sm:$0xff]   ;;  %v1377_v44 = vld [vmem:[%s2025_s1 + $0xb4] ss:$8 sps:$4 sm:$0xff]   ;;  %v1381_v47 = vld [vmem:[%s2025_s1 + $0xb0] ss:$8 sps:$4 sm:$0xff]  }
  0x10   :  { %1017 = vmatpush1.bf16.msra.mxu0 %v1334_v15  ;;  %936 = vmatprep.subr.bf16.mxu1 %v1335_v16  ;;  %v1376_v43 = vld [vmem:[%s2025_s1 + $0x2a0] ss:$8 sps:$4 sm:$0xff]   ;;  %v1379_v45 = vld [vmem:[%s2025_s1 + $0x2b4] ss:$8 sps:$4 sm:$0xff]   ;;  %v1382_v49 = vld [vmem:[%s2025_s1 + $0x2b0] ss:$8 sps:$4 sm:$0xff]  }
  0x11   :  { %1018 = vmatprep.subr.bf16.mxu0 %v1337_v17  ;;  %v15_v46 = vld [vmem:[%s2026_s0] sm:$0xff]  ;;  %v17_v50 = vld [vmem:[%s2026_s0 + $0x10] sm:$0xff] }
  0x12   :  { %v1142_v48 = vcombine.high %v15_v46, %v15_v46  ;;  %v1383_v51 = vld [vmem:[%s2025_s1 + $0xc4] ss:$8 sps:$4 sm:$0xff]   ;;  %v1146_v53 = vcombine.high %v17_v50, %v17_v50  ;;  %v1387_v54 = vld [vmem:[%s2025_s1 + $0xc0] ss:$8 sps:$4 sm:$0xff]   ;;  %v1389_v56 = vld [vmem:[%s2025_s1 + $0xd4] ss:$8 sps:$4 sm:$0xff]   ;;  %v1141_v6 = vcombine.low %v15_v46, %v15_v46  ;;  %v1145_v7 = vcombine.low %v17_v50, %v17_v50 }
  0x13   :  { %937 = vmatpush1.bf16.msra.mxu1 %v1339_v18  ;;  %v1385_v52 = vld [vmem:[%s2025_s1 + $0x2c4] ss:$8 sps:$4 sm:$0xff]   ;;  %v1388_v55 = vld [vmem:[%s2025_s1 + $0x2c0] ss:$8 sps:$4 sm:$0xff]   ;;  %v1391_v57 = vld [vmem:[%s2025_s1 + $0x2d4] ss:$8 sps:$4 sm:$0xff]  }
  0x14   :  { %1019 = vmatpush1.bf16.msra.mxu0 %v1340_v19  ;;  %938 = vmatprep.subr.bf16.mxu1 %v1341_v20  ;;  %v1393_v58 = vld [vmem:[%s2025_s1 + $0xd0] ss:$8 sps:$4 sm:$0xff]   ;;  %v1395_v60 = vld [vmem:[%s2025_s1 + $0xe4] ss:$8 sps:$4 sm:$0xff]   ;;  %v1399_v62 = vld [vmem:[%s2025_s1 + $0xe0] ss:$8 sps:$4 sm:$0xff]  }
  0x15   :  { %1020 = vmatprep.subr.bf16.mxu0 %v1343_v21  ;;  %960 = vmatprep.mubr.bf16.mxu1 %v1142_v48  ;;  %v1394_v59 = vld [vmem:[%s2025_s1 + $0x2d0] ss:$8 sps:$4 sm:$0xff]   ;;  %v1397_v61 = vld [vmem:[%s2025_s1 + $0x2e4] ss:$8 sps:$4 sm:$0xff]   ;;  %v1400_v63 = vld [vmem:[%s2025_s1 + $0x2e0] ss:$8 sps:$4 sm:$0xff]  }
  0x16   :  { %1042 = vmatprep.mubr.bf16.mxu0 %v1146_v53  ;;  %v1401_v0 = vld [vmem:[%s2025_s1 + $0xf4] ss:$8 sps:$4 sm:$0xff]   ;;  %v1405_v2 = vld [vmem:[%s2025_s1 + $0xf0] ss:$8 sps:$4 sm:$0xff]   ;;  %v1411_v4 = vld [vmem:[%s2025_s1 + $0x104] ss:$8 sps:$4 sm:$0xff]  }
  0x17   :  { %939 = vmatpush1.bf16.msra.mxu1 %v1345_v22  ;;  %v1403_v1 = vld [vmem:[%s2025_s1 + $0x2f4] ss:$8 sps:$4 sm:$0xff]   ;;  %v1406_v3 = vld [vmem:[%s2025_s1 + $0x2f0] ss:$8 sps:$4 sm:$0xff]   ;;  %v1416_v5 = vld [vmem:[%s2025_s1 + $0x304] ss:$8 sps:$4 sm:$0xff]  }
  0x18   :  { %1021 = vmatpush1.bf16.msra.mxu0 %v1346_v23  ;;  %940 = vmatprep.subr.bf16.mxu1 %v1347_v24  ;;  %v1409_v8 = vld [vmem:[%s2025_s1 + $0x100] ss:$8 sps:$4 sm:$0xff]   ;;  %v1419_v10 = vld [vmem:[%s2025_s1 + $0x114] ss:$8 sps:$4 sm:$0xff]   ;;  %v1417_v12 = vld [vmem:[%s2025_s1 + $0x110] ss:$8 sps:$4 sm:$0xff]  }
  0x19   :  { %1022 = vmatprep.subr.bf16.mxu0 %v1349_v25  ;;  %v1414_v9 = vld [vmem:[%s2025_s1 + $0x300] ss:$8 sps:$4 sm:$0xff]   ;;  %v1422_v11 = vld [vmem:[%s2025_s1 + $0x314] ss:$8 sps:$4 sm:$0xff]   ;;  %v1420_v13 = vld [vmem:[%s2025_s1 + $0x310] ss:$8 sps:$4 sm:$0xff]  }
  0x1a   :  { %v1425_v14 = vld [vmem:[%s2025_s1 + $0x124] ss:$8 sps:$4 sm:$0xff]   ;;  %v1423_v16 = vld [vmem:[%s2025_s1 + $0x120] ss:$8 sps:$4 sm:$0xff]   ;;  %v1431_v18 = vld [vmem:[%s2025_s1 + $0x134] ss:$8 sps:$4 sm:$0xff]  }
  0x1b   :  { %941 = vmatpush1.bf16.msra.mxu1 %v1351_v26  ;;  %v1428_v15 = vld [vmem:[%s2025_s1 + $0x324] ss:$8 sps:$4 sm:$0xff]   ;;  %v1426_v17 = vld [vmem:[%s2025_s1 + $0x320] ss:$8 sps:$4 sm:$0xff]   ;;  %v1434_v19 = vld [vmem:[%s2025_s1 + $0x334] ss:$8 sps:$4 sm:$0xff]  }
  0x1c   :  { %1023 = vmatpush1.bf16.msra.mxu0 %v1352_v27  ;;  %942 = vmatprep.subr.bf16.mxu1 %v1353_v28  ;;  %v1429_v20 = vld [vmem:[%s2025_s1 + $0x130] ss:$8 sps:$4 sm:$0xff]   ;;  %v1437_v22 = vld [vmem:[%s2025_s1 + $0x144] ss:$8 sps:$4 sm:$0xff]   ;;  %v1435_v24 = vld [vmem:[%s2025_s1 + $0x140] ss:$8 sps:$4 sm:$0xff]  }
  0x1d   :  { %1024 = vmatprep.subr.bf16.mxu0 %v1355_v29  ;;  %v1432_v21 = vld [vmem:[%s2025_s1 + $0x330] ss:$8 sps:$4 sm:$0xff]   ;;  %v1440_v23 = vld [vmem:[%s2025_s1 + $0x344] ss:$8 sps:$4 sm:$0xff]   ;;  %v1438_v25 = vld [vmem:[%s2025_s1 + $0x340] ss:$8 sps:$4 sm:$0xff]  }
  0x1e   :  { %v1443_v26 = vld [vmem:[%s2025_s1 + $0x154] ss:$8 sps:$4 sm:$0xff]   ;;  %v1441_v28 = vld [vmem:[%s2025_s1 + $0x150] ss:$8 sps:$4 sm:$0xff]   ;;  %v1473_v50 = vld [vmem:[%s2025_s1 + $0x1a4] ss:$8 sps:$4 sm:$0xff]  }
  0x1f   :  { %943 = vmatpush1.bf16.msra.mxu1 %v1357_v30  ;;  %v1446_v27 = vld [vmem:[%s2025_s1 + $0x354] ss:$8 sps:$4 sm:$0xff]   ;;  %v1444_v29 = vld [vmem:[%s2025_s1 + $0x350] ss:$8 sps:$4 sm:$0xff]   ;;  %v1449_v30 = vld [vmem:[%s2025_s1 + $0x164] ss:$8 sps:$4 sm:$0xff]  }
  0x20   :  { %1025 = vmatpush1.bf16.msra.mxu0 %v1358_v31  ;;  %944 = vmatprep.subr.bf16.mxu1 %v1359_v32  ;;  %v1452_v31 = vld [vmem:[%s2025_s1 + $0x364] ss:$8 sps:$4 sm:$0xff]   ;;  %v1467_v46 = vld [vmem:[%s2025_s1 + $0x194] ss:$8 sps:$4 sm:$0xff]   ;;  %v1465_v48 = vld [vmem:[%s2025_s1 + $0x190] ss:$8 sps:$4 sm:$0xff]  }
  0x21   :  { %1026 = vmatprep.subr.bf16.mxu0 %v1361_v33  ;;  %v1836_v32 = vld [vmem:[%s2026_s0 + $0x8] sm:$0xff]  ;;  %v1841_v33 = vld [vmem:[%s2026_s0 + $0x18] sm:$0xff] }
  0x22   :  { %v1474_v53 = vld [vmem:[%s2025_s1 + $0x3a0] ss:$8 sps:$4 sm:$0xff]  }
  0x23   :  { %945 = vmatpush1.bf16.msra.mxu1 %v1363_v34  ;;  %v1447_v34 = vld [vmem:[%s2025_s1 + $0x160] ss:$8 sps:$4 sm:$0xff]  }
  0x24   :  { %1027 = vmatpush1.bf16.msra.mxu0 %v1364_v35  ;;  %946 = vmatprep.subr.bf16.mxu1 %v1365_v36  ;;  %v1450_v35 = vld [vmem:[%s2025_s1 + $0x360] ss:$8 sps:$4 sm:$0xff]   ;;  %v1144_v36 = vcombine.high %v1836_v32, %v1836_v32 }
  0x25   :  { %1028 = vmatprep.subr.bf16.mxu0 %v1367_v37  ;;  %v1148_v37 = vcombine.high %v1841_v33, %v1841_v33 }
  0x27   :  { %947 = vmatpush1.bf16.msra.mxu1 %v1369_v38  ;;  %v1455_v38 = vld [vmem:[%s2025_s1 + $0x174] ss:$8 sps:$4 sm:$0xff]  }
  0x28   :  { %1029 = vmatpush1.bf16.msra.mxu0 %v1370_v39  ;;  %948 = vmatprep.subr.bf16.mxu1 %v1371_v40  ;;  %v1458_v39 = vld [vmem:[%s2025_s1 + $0x374] ss:$8 sps:$4 sm:$0xff]   ;;  %v1453_v40 = vld [vmem:[%s2025_s1 + $0x170] ss:$8 sps:$4 sm:$0xff]  }
  0x29   :  { %1030 = vmatprep.subr.bf16.mxu0 %v1373_v41  ;;  %v1456_v41 = vld [vmem:[%s2025_s1 + $0x370] ss:$8 sps:$4 sm:$0xff]  }
  0x2b   :  { %949 = vmatpush1.bf16.msra.mxu1 %v1375_v42  ;;  %v1461_v42 = vld [vmem:[%s2025_s1 + $0x184] ss:$8 sps:$4 sm:$0xff]  }
  0x2c   :  { %1031 = vmatpush1.bf16.msra.mxu0 %v1376_v43  ;;  %950 = vmatprep.subr.bf16.mxu1 %v1377_v44  ;;  %v1464_v43 = vld [vmem:[%s2025_s1 + $0x384] ss:$8 sps:$4 sm:$0xff]   ;;  %v1459_v44 = vld [vmem:[%s2025_s1 + $0x180] ss:$8 sps:$4 sm:$0xff]  }
  0x2d   :  { %1032 = vmatprep.subr.bf16.mxu0 %v1379_v45  ;;  %v1462_v45 = vld [vmem:[%s2025_s1 + $0x380] ss:$8 sps:$4 sm:$0xff]  }
  0x2f   :  { %951 = vmatpush1.bf16.msra.mxu1 %v1381_v47  ;;  %v1470_v47 = vld [vmem:[%s2025_s1 + $0x394] ss:$8 sps:$4 sm:$0xff]  }
  0x30   :  { %1033 = vmatpush1.bf16.msra.mxu0 %v1382_v49  ;;  %952 = vmatprep.subr.bf16.mxu1 %v1383_v51  ;;  %v1468_v49 = vld [vmem:[%s2025_s1 + $0x390] ss:$8 sps:$4 sm:$0xff]   ;;  %v1476_v51 = vld [vmem:[%s2025_s1 + $0x3a4] ss:$8 sps:$4 sm:$0xff]  }
  0x31   :  { %1034 = vmatprep.subr.bf16.mxu0 %v1385_v52  ;;  %v1471_v52 = vld [vmem:[%s2025_s1 + $0x1a0] ss:$8 sps:$4 sm:$0xff]  }
  0x33   :  { %953 = vmatpush1.bf16.msra.mxu1 %v1387_v54  ;;  %v1479_v54 = vld [vmem:[%s2025_s1 + $0x1b4] ss:$8 sps:$4 sm:$0xff]  }
  0x34   :  { %1035 = vmatpush1.bf16.msra.mxu0 %v1388_v55  ;;  %954 = vmatprep.subr.bf16.mxu1 %v1389_v56  ;;  %v1482_v55 = vld [vmem:[%s2025_s1 + $0x3b4] ss:$8 sps:$4 sm:$0xff]   ;;  %v1477_v56 = vld [vmem:[%s2025_s1 + $0x1b0] ss:$8 sps:$4 sm:$0xff]  }
  0x35   :  { %1036 = vmatprep.subr.bf16.mxu0 %v1391_v57  ;;  %v1480_v57 = vld [vmem:[%s2025_s1 + $0x3b0] ss:$8 sps:$4 sm:$0xff]  }
  0x37   :  { %955 = vmatpush1.bf16.msra.mxu1 %v1393_v58  ;;  %v1485_v58 = vld [vmem:[%s2025_s1 + $0x1c4] ss:$8 sps:$4 sm:$0xff]  }
  0x38   :  { %1037 = vmatpush1.bf16.msra.mxu0 %v1394_v59  ;;  %956 = vmatprep.subr.bf16.mxu1 %v1395_v60  ;;  %v1488_v59 = vld [vmem:[%s2025_s1 + $0x3c4] ss:$8 sps:$4 sm:$0xff]   ;;  %v1483_v60 = vld [vmem:[%s2025_s1 + $0x1c0] ss:$8 sps:$4 sm:$0xff]  }
  0x39   :  { %1038 = vmatprep.subr.bf16.mxu0 %v1397_v61  ;;  %v1486_v61 = vld [vmem:[%s2025_s1 + $0x3c0] ss:$8 sps:$4 sm:$0xff]  }
  0x3b   :  { %957 = vmatpush1.bf16.msra.mxu1 %v1399_v62  ;;  %v1491_v62 = vld [vmem:[%s2025_s1 + $0x1d4] ss:$8 sps:$4 sm:$0xff]  }
  0x3c   :  { %1039 = vmatpush1.bf16.msra.mxu0 %v1400_v63  ;;  %958 = vmatprep.subr.bf16.mxu1 %v1401_v0  ;;  %v1494_v63 = vld [vmem:[%s2025_s1 + $0x3d4] ss:$8 sps:$4 sm:$0xff]   ;;  %v1489_v0 = vld [vmem:[%s2025_s1 + $0x1d0] ss:$8 sps:$4 sm:$0xff]  }
  0x3d   :  { %1040 = vmatprep.subr.bf16.mxu0 %v1403_v1  ;;  %v1492_v1 = vld [vmem:[%s2025_s1 + $0x3d0] ss:$8 sps:$4 sm:$0xff]  }
  0x3f   :  { %959 = vmatpush1.bf16.msra.mxu1 %v1405_v2  ;;  %v1497_v2 = vld [vmem:[%s2025_s1 + $0x1e4] ss:$8 sps:$4 sm:$0xff]  }
  0x40   :  { %1041 = vmatpush1.bf16.msra.mxu0 %v1406_v3  ;;  %969 = vmatprep.subr.bf16.mxu1 %v1411_v4  ;;  %v1500_v3 = vld [vmem:[%s2025_s1 + $0x3e4] ss:$8 sps:$4 sm:$0xff]   ;;  %v1495_v4 = vld [vmem:[%s2025_s1 + $0x1e0] ss:$8 sps:$4 sm:$0xff]  }
  0x41   :  { %1051 = vmatprep.subr.bf16.mxu0 %v1416_v5  ;;  %v1498_v5 = vld [vmem:[%s2025_s1 + $0x3e0] ss:$8 sps:$4 sm:$0xff]  }
  0x42   :  { %961 = vmatmul.mubr.bf16.vlgmr.msra.gmra.mrb[0].mxu1 %v1141_v6  ;;  %v1503_v6 = vld [vmem:[%s2025_s1 + $0x1f4] ss:$8 sps:$4 sm:$0xff]  }
  0x43   :  { %1043 = vmatmul.mubr.bf16.vlgmr.msra.gmra.mrb[0].mxu0 %v1145_v7  ;;  %970 = vmatpush1.bf16.msra.mxu1 %v1409_v8  ;;  %v1506_v7 = vld [vmem:[%s2025_s1 + $0x3f4] ss:$8 sps:$4 sm:$0xff]   ;;  %v1501_v8 = vld [vmem:[%s2025_s1 + $0x1f0] ss:$8 sps:$4 sm:$0xff]  }
  0x44   :  { %1052 = vmatpush1.bf16.msra.mxu0 %v1414_v9  ;;  %971 = vmatprep.subr.bf16.mxu1 %v1419_v10  ;;  %v1504_v9 = vld [vmem:[%s2025_s1 + $0x3f0] ss:$8 sps:$4 sm:$0xff]   ;;  %v1513_v10 = vld [vmem:[%s2025_s1 + $0x404] ss:$8 sps:$4 sm:$0xff]  }
  0x45   :  { %1053 = vmatprep.subr.bf16.mxu0 %v1422_v11  ;;  %1001 = vmatprep.mubr.bf16.mxu1 %v1144_v36  ;;  %v1143_v11 = vcombine.low %v1836_v32, %v1836_v32 }
  0x46   :  { %1083 = vmatprep.mubr.bf16.mxu0 %v1148_v37  ;;  %v164_v37 = vld [vmem:[%s2027_s2] sm:$0x3] }
  0x47   :  { %972 = vmatpush1.bf16.msra.mxu1 %v1417_v12  ;;  %v1147_v12 = vcombine.low %v1841_v33, %v1841_v33 }
  0x48   :  { %1054 = vmatpush1.bf16.msra.mxu0 %v1420_v13  ;;  %973 = vmatprep.subr.bf16.mxu1 %v1425_v14  ;;  %v1511_v13 = vld [vmem:[%s2025_s1 + $0x400] ss:$8 sps:$4 sm:$0xff]   ;;  %v1516_v14 = vld [vmem:[%s2025_s1 + $0x414] ss:$8 sps:$4 sm:$0xff]  }
  0x49   :  { %1055 = vmatprep.subr.bf16.mxu0 %v1428_v15  ;;  %v1514_v15 = vld [vmem:[%s2025_s1 + $0x410] ss:$8 sps:$4 sm:$0xff]  }
  0x4b   :  { %974 = vmatpush1.bf16.msra.mxu1 %v1423_v16  ;;  %v1536_v16 = vmov 0  }
  0x4c   :  { %1056 = vmatpush1.bf16.msra.mxu0 %v1426_v17  ;;  %975 = vmatprep.subr.bf16.mxu1 %v1431_v18  ;;  %v1519_v17 = vld [vmem:[%s2025_s1 + $0x424] ss:$8 sps:$4 sm:$0xff]   ;;  %v1517_v18 = vld [vmem:[%s2025_s1 + $0x420] ss:$8 sps:$4 sm:$0xff]  }
  0x4d   :  { %1057 = vmatprep.subr.bf16.mxu0 %v1434_v19  ;;  %v1522_v19 = vld [vmem:[%s2025_s1 + $0x434] ss:$8 sps:$4 sm:$0xff]  }
  0x4f   :  { %976 = vmatpush1.bf16.msra.mxu1 %v1429_v20  ;;  %v1520_v20 = vld [vmem:[%s2025_s1 + $0x430] ss:$8 sps:$4 sm:$0xff]  }
  0x50   :  { %1058 = vmatpush1.bf16.msra.mxu0 %v1432_v21  ;;  %977 = vmatprep.subr.bf16.mxu1 %v1437_v22  ;;  %v1525_v21 = vld [vmem:[%s2025_s1 + $0x444] ss:$8 sps:$4 sm:$0xff]   ;;  %v1523_v22 = vld [vmem:[%s2025_s1 + $0x440] ss:$8 sps:$4 sm:$0xff]  }
  0x51   :  { %1059 = vmatprep.subr.bf16.mxu0 %v1440_v23  ;;  %v1528_v23 = vld [vmem:[%s2025_s1 + $0x454] ss:$8 sps:$4 sm:$0xff]  }
  0x53   :  { %978 = vmatpush1.bf16.msra.mxu1 %v1435_v24  ;;  %v1526_v24 = vld [vmem:[%s2025_s1 + $0x450] ss:$8 sps:$4 sm:$0xff]  }
  0x54   :  { %1060 = vmatpush1.bf16.msra.mxu0 %v1438_v25  ;;  %979 = vmatprep.subr.bf16.mxu1 %v1443_v26  ;;  %v1531_v25 = vld [vmem:[%s2025_s1 + $0x464] ss:$8 sps:$4 sm:$0xff]   ;;  %v1529_v26 = vld [vmem:[%s2025_s1 + $0x460] ss:$8 sps:$4 sm:$0xff]  }
  0x55   :  { %1061 = vmatprep.subr.bf16.mxu0 %v1446_v27  ;;  %v1534_v27 = vld [vmem:[%s2025_s1 + $0x474] ss:$8 sps:$4 sm:$0xff]  }
  0x57   :  { %980 = vmatpush1.bf16.msra.mxu1 %v1441_v28  ;;  %v1532_v28 = vld [vmem:[%s2025_s1 + $0x470] ss:$8 sps:$4 sm:$0xff]  }
  0x58   :  { %1062 = vmatpush1.bf16.msra.mxu0 %v1444_v29  ;;  %981 = vmatprep.subr.bf16.mxu1 %v1449_v30  ;;  %v1535_v29 = vld [vmem:[%s2026_s0 + $0x20] ss:$0 sps:$4 sm:$0xff]  }
  0x59   :  { %1063 = vmatprep.subr.bf16.mxu0 %v1452_v31 }
  0x5b   :  { %982 = vmatpush1.bf16.msra.mxu1 %v1447_v34  ;;  %v166_v34 = vlaneseq }
  0x5c   :  { %1064 = vmatpush1.bf16.msra.mxu0 %v1450_v35  ;;  %983 = vmatprep.subr.bf16.mxu1 %v1455_v38 }
  0x5d   :  { %1065 = vmatprep.subr.bf16.mxu0 %v1458_v39  ;;  %v167_v35 = vshrl.u32 %v166_v34, 7 }
  0x5f   :  { %984 = vmatpush1.bf16.msra.mxu1 %v1453_v40  ;;  %v168_v36 = vsub.s32 0, %v167_v35  ;;  %v172_v38 = vsub.s32 1, %v167_v35 }
  0x60   :  { %1066 = vmatpush1.bf16.msra.mxu0 %v1456_v41  ;;  %985 = vmatprep.subr.bf16.mxu1 %v1461_v42 }
  0x61   :  { %1067 = vmatprep.subr.bf16.mxu0 %v1464_v43  ;;  %v169_v39 = vrot.slane %v164_v37, %v168_v36  ;;  %v173_v40 = vrot.slane %v164_v37, %v172_v38 }
  0x63   :  { %986 = vmatpush1.bf16.msra.mxu1 %v1459_v44 }
  0x64   :  { %1068 = vmatpush1.bf16.msra.mxu0 %v1462_v45  ;;  %987 = vmatprep.subr.bf16.mxu1 %v1467_v46 }
  0x65   :  { %1069 = vmatprep.subr.bf16.mxu0 %v1470_v47 }
  0x67   :  { %988 = vmatpush1.bf16.msra.mxu1 %v1465_v48 }
  0x68   :  { %1070 = vmatpush1.bf16.msra.mxu0 %v1468_v49  ;;  %989 = vmatprep.subr.bf16.mxu1 %v1473_v50 }
  0x69   :  { %1071 = vmatprep.subr.bf16.mxu0 %v1476_v51 }
  0x6b   :  { %990 = vmatpush1.bf16.msra.mxu1 %v1471_v52 }
  0x6c   :  { %1072 = vmatpush1.bf16.msra.mxu0 %v1474_v53  ;;  %991 = vmatprep.subr.bf16.mxu1 %v1479_v54 }
  0x6d   :  { %1073 = vmatprep.subr.bf16.mxu0 %v1482_v55 }
  0x6f   :  { %992 = vmatpush1.bf16.msra.mxu1 %v1477_v56 }
  0x70   :  { %1074 = vmatpush1.bf16.msra.mxu0 %v1480_v57  ;;  %993 = vmatprep.subr.bf16.mxu1 %v1485_v58 }
  0x71   :  { %1075 = vmatprep.subr.bf16.mxu0 %v1488_v59 }
  0x73   :  { %994 = vmatpush1.bf16.msra.mxu1 %v1483_v60 }
  0x74   :  { %1076 = vmatpush1.bf16.msra.mxu0 %v1486_v61  ;;  %995 = vmatprep.subr.bf16.mxu1 %v1491_v62 }
  0x75   :  { %1077 = vmatprep.subr.bf16.mxu0 %v1494_v63 }
  0x77   :  { %996 = vmatpush1.bf16.msra.mxu1 %v1489_v0 }
  0x78   :  { %1078 = vmatpush1.bf16.msra.mxu0 %v1492_v1  ;;  %997 = vmatprep.subr.bf16.mxu1 %v1497_v2 }
  0x79   :  { %1079 = vmatprep.subr.bf16.mxu0 %v1500_v3 }
  0x7b   :  { %998 = vmatpush1.bf16.msra.mxu1 %v1495_v4 }
  0x7c   :  { %1080 = vmatpush1.bf16.msra.mxu0 %v1498_v5  ;;  %999 = vmatprep.subr.bf16.mxu1 %v1503_v6 }
  0x7d   :  { %1081 = vmatprep.subr.bf16.mxu0 %v1506_v7 }
  0x7f   :  { %1000 = vmatpush1.bf16.msra.mxu1 %v1501_v8 }
  0x80   :  { %1082 = vmatpush1.bf16.msra.mxu0 %v1504_v9 }
  0x81   :  { %1092 = vmatprep.subr.bf16.mxu0 %v1513_v10 }
  0x82   :  { %1002 = vmatmul.mubr.bf16.vlgmr.msra.gmra.mrb[0].mxu1 %v1143_v11 }
  0x83   :  { %1084 = vmatmul.mubr.bf16.vlgmr.msra.gmra.mrb[0].mxu0 %v1147_v12 }
  0x84   :  { %1093 = vmatpush1.bf16.msra.mxu0 %v1511_v13  ;;  %1124 = vmatprep.mubr.bf16.mxu0 %v1536_v16 }
  0x85   :  { %1094 = vmatprep.subr.bf16.mxu0 %v1516_v14 }
  0x88   :  { %1095 = vmatpush1.bf16.msra.mxu0 %v1514_v15 }
  0x89   :  { %1096 = vmatprep.subr.bf16.mxu0 %v1519_v17 }
  0x8c   :  { %1097 = vmatpush1.bf16.msra.mxu0 %v1517_v18 }
  0x8d   :  { %1098 = vmatprep.subr.bf16.mxu0 %v1522_v19 }
  0x90   :  { %1099 = vmatpush1.bf16.msra.mxu0 %v1520_v20 }
  0x91   :  { %1100 = vmatprep.subr.bf16.mxu0 %v1525_v21 }
  0x94   :  { %1101 = vmatpush1.bf16.msra.mxu0 %v1523_v22 }
  0x95   :  { %1102 = vmatprep.subr.bf16.mxu0 %v1528_v23 }
  0x98   :  { %1103 = vmatpush1.bf16.msra.mxu0 %v1526_v24 }
  0x99   :  { %1104 = vmatprep.subr.bf16.mxu0 %v1531_v25 }
  0x9c   :  { %1105 = vmatpush1.bf16.msra.mxu0 %v1529_v26 }
  0x9d   :  { %1106 = vmatprep.subr.bf16.mxu0 %v1534_v27 }
  0xa0   :  { %1107 = vmatpush1.bf16.msra.mxu0 %v1532_v28 }
  0xa3   :  { %1125 = vmatmul.mubr.bf16.vlgmr.msra.gmra.mrb[0].mxu0 %v1535_v29 }
 0x155   :  { %v1003_v30 = vpop.f32.mrb[0].mxu1 }
 0x156   :  { %v1005_v31 = vpop.f32.mrb[1].mxu1  ;;  %v1294_v41 = vadd.f32 %v1003_v30, %v169_v39 }
 0x157   :  { %v1007_v32 = vpop.f32.mrb[2].mxu1  ;;  %v1296_v42 = vadd.f32 %v1005_v31, %v173_v40 }
 0x158   :  { %v1008_v33 = vpop.f32.mrb[3].mxu1 }
 0x176   :  { %v1126_v43 = vpop.f32.mrb[0].mxu0 }
 0x177   :  { %v1295_v44 = vadd.f32 %v1294_v41, %v1126_v43  ;;  %v1128_v45 = vpop.f32.mrb[1].mxu0 }
 0x178   :  { %v1297_v46 = vadd.f32 %v1296_v42, %v1128_v45  ;;  %v1130_v47 = vpop.f32.mrb[2].mxu0 }
 0x179   :  { %v1133_v48 = vmax.f32 %v1295_v44, 0.0  ;;  %v1131_v49 = vpop.f32.mrb[3].mxu0 }
 0x17a   :  { %v1134_v50 = vmax.f32 %v1297_v46, 0.0 }
 0x17b   :  { %1135 = vst [vmem:[%s2028_s3] sm:$0xff] %v1133_v48 }
 0x17c   :  { %1136 = vst [vmem:[%s2028_s3 + $0x8] sm:$0xff] %v1134_v50 }

// kernel: autoencoder_forward.10
= control target key start
LH: loop header
LB: loop body
LE: loop exit
PB: predicated region body
PF: predicated region fallthrough
CT: control target
= control target key end

     0   :  { %s1043_s1 = inlined_call_operand.vmem [shape: bf16[512,256], index: 1, kind: input, shape index: {}]   ;;  %s1044_s0 = inlined_call_operand.vmem [shape: bf16[32,512], index: 0, kind: input, shape index: {}]   ;;  %s1045_s2 = inlined_call_operand.vmem [shape: f32[1,256], index: 2, kind: input, shape index: {}]   ;;  %s1046_s3 = inlined_call_operand.vmem [shape: f32[32,256], index: 3, kind: output, shape index: {}]  }
   0x1   :  { %v672_v0 = vld [vmem:[%s1043_s1 + $0x4] ss:$8 sps:$4 sm:$0xff]   ;;  %v676_v2 = vld [vmem:[%s1043_s1] ss:$8 sps:$4 sm:$0xff]   ;;  %v678_v4 = vld [vmem:[%s1043_s1 + $0x14] ss:$8 sps:$4 sm:$0xff]  }
   0x2   :  { %v674_v1 = vld [vmem:[%s1043_s1 + $0x104] ss:$8 sps:$4 sm:$0xff]   ;;  %458 = vmatprep.subr.bf16.mxu1 %v672_v0  ;;  %v677_v3 = vld [vmem:[%s1043_s1 + $0x100] ss:$8 sps:$4 sm:$0xff]   ;;  %v680_v5 = vld [vmem:[%s1043_s1 + $0x114] ss:$8 sps:$4 sm:$0xff]  }
   0x3   :  { %511 = vmatprep.subr.bf16.mxu0 %v674_v1  ;;  %459 = vmatpush1.bf16.msra.mxu1 %v676_v2  ;;  %v682_v6 = vld [vmem:[%s1043_s1 + $0x10] ss:$8 sps:$4 sm:$0xff]   ;;  %v684_v8 = vld [vmem:[%s1043_s1 + $0x24] ss:$8 sps:$4 sm:$0xff]   ;;  %v688_v10 = vld [vmem:[%s1043_s1 + $0x20] ss:$8 sps:$4 sm:$0xff]  }
   0x4   :  { %512 = vmatpush1.bf16.msra.mxu0 %v677_v3  ;;  %460 = vmatprep.subr.bf16.mxu1 %v678_v4  ;;  %v683_v7 = vld [vmem:[%s1043_s1 + $0x110] ss:$8 sps:$4 sm:$0xff]   ;;  %v686_v9 = vld [vmem:[%s1043_s1 + $0x124] ss:$8 sps:$4 sm:$0xff]   ;;  %v689_v11 = vld [vmem:[%s1043_s1 + $0x120] ss:$8 sps:$4 sm:$0xff]  }
   0x5   :  { %513 = vmatprep.subr.bf16.mxu0 %v680_v5  ;;  %v690_v12 = vld [vmem:[%s1043_s1 + $0x34] ss:$8 sps:$4 sm:$0xff]   ;;  %v694_v14 = vld [vmem:[%s1043_s1 + $0x30] ss:$8 sps:$4 sm:$0xff]   ;;  %v696_v16 = vld [vmem:[%s1043_s1 + $0x44] ss:$8 sps:$4 sm:$0xff]  }
   0x6   :  { %v692_v13 = vld [vmem:[%s1043_s1 + $0x134] ss:$8 sps:$4 sm:$0xff]   ;;  %v695_v15 = vld [vmem:[%s1043_s1 + $0x130] ss:$8 sps:$4 sm:$0xff]   ;;  %v698_v17 = vld [vmem:[%s1043_s1 + $0x144] ss:$8 sps:$4 sm:$0xff]  }
   0x7   :  { %461 = vmatpush1.bf16.msra.mxu1 %v682_v6  ;;  %v700_v18 = vld [vmem:[%s1043_s1 + $0x40] ss:$8 sps:$4 sm:$0xff]   ;;  %v702_v20 = vld [vmem:[%s1043_s1 + $0x54] ss:$8 sps:$4 sm:$0xff]   ;;  %v706_v22 = vld [vmem:[%s1043_s1 + $0x50] ss:$8 sps:$4 sm:$0xff]  }
   0x8   :  { %514 = vmatpush1.bf16.msra.mxu0 %v683_v7  ;;  %462 = vmatprep.subr.bf16.mxu1 %v684_v8  ;;  %v701_v19 = vld [vmem:[%s1043_s1 + $0x140] ss:$8 sps:$4 sm:$0xff]   ;;  %v704_v21 = vld [vmem:[%s1043_s1 + $0x154] ss:$8 sps:$4 sm:$0xff]   ;;  %v707_v23 = vld [vmem:[%s1043_s1 + $0x150] ss:$8 sps:$4 sm:$0xff]   ;;  %v88_v8 = vlaneseq }
   0x9   :  { %515 = vmatprep.subr.bf16.mxu0 %v686_v9  ;;  %v708_v24 = vld [vmem:[%s1043_s1 + $0x64] ss:$8 sps:$4 sm:$0xff]   ;;  %v712_v26 = vld [vmem:[%s1043_s1 + $0x60] ss:$8 sps:$4 sm:$0xff]   ;;  %v714_v28 = vld [vmem:[%s1043_s1 + $0x74] ss:$8 sps:$4 sm:$0xff]  }
   0xa   :  { %v710_v25 = vld [vmem:[%s1043_s1 + $0x164] ss:$8 sps:$4 sm:$0xff]   ;;  %v713_v27 = vld [vmem:[%s1043_s1 + $0x160] ss:$8 sps:$4 sm:$0xff]   ;;  %v716_v29 = vld [vmem:[%s1043_s1 + $0x174] ss:$8 sps:$4 sm:$0xff]  }
   0xb   :  { %463 = vmatpush1.bf16.msra.mxu1 %v688_v10  ;;  %v718_v30 = vld [vmem:[%s1043_s1 + $0x70] ss:$8 sps:$4 sm:$0xff]   ;;  %v720_v32 = vld [vmem:[%s1043_s1 + $0x84] ss:$8 sps:$4 sm:$0xff]   ;;  %v724_v34 = vld [vmem:[%s1043_s1 + $0x80] ss:$8 sps:$4 sm:$0xff]  }
   0xc   :  { %516 = vmatpush1.bf16.msra.mxu0 %v689_v11  ;;  %464 = vmatprep.subr.bf16.mxu1 %v690_v12  ;;  %v719_v31 = vld [vmem:[%s1043_s1 + $0x170] ss:$8 sps:$4 sm:$0xff]   ;;  %v722_v33 = vld [vmem:[%s1043_s1 + $0x184] ss:$8 sps:$4 sm:$0xff]   ;;  %v725_v35 = vld [vmem:[%s1043_s1 + $0x180] ss:$8 sps:$4 sm:$0xff]  }
   0xd   :  { %517 = vmatprep.subr.bf16.mxu0 %v692_v13  ;;  %v726_v36 = vld [vmem:[%s1043_s1 + $0x94] ss:$8 sps:$4 sm:$0xff]   ;;  %v730_v38 = vld [vmem:[%s1043_s1 + $0x90] ss:$8 sps:$4 sm:$0xff]   ;;  %v732_v40 = vld [vmem:[%s1043_s1 + $0xa4] ss:$8 sps:$4 sm:$0xff]  }
   0xe   :  { %v728_v37 = vld [vmem:[%s1043_s1 + $0x194] ss:$8 sps:$4 sm:$0xff]   ;;  %v731_v39 = vld [vmem:[%s1043_s1 + $0x190] ss:$8 sps:$4 sm:$0xff]   ;;  %v734_v41 = vld [vmem:[%s1043_s1 + $0x1a4] ss:$8 sps:$4 sm:$0xff]  }
   0xf   :  { %465 = vmatpush1.bf16.msra.mxu1 %v694_v14  ;;  %v736_v42 = vld [vmem:[%s1043_s1 + $0xa0] ss:$8 sps:$4 sm:$0xff]   ;;  %v738_v44 = vld [vmem:[%s1043_s1 + $0xb4] ss:$8 sps:$4 sm:$0xff]   ;;  %v742_v46 = vld [vmem:[%s1043_s1 + $0xb0] ss:$8 sps:$4 sm:$0xff]  }
  0x10   :  { %518 = vmatpush1.bf16.msra.mxu0 %v695_v15  ;;  %466 = vmatprep.subr.bf16.mxu1 %v696_v16  ;;  %v737_v43 = vld [vmem:[%s1043_s1 + $0x1a0] ss:$8 sps:$4 sm:$0xff]   ;;  %v740_v45 = vld [vmem:[%s1043_s1 + $0x1b4] ss:$8 sps:$4 sm:$0xff]   ;;  %v743_v47 = vld [vmem:[%s1043_s1 + $0x1b0] ss:$8 sps:$4 sm:$0xff]  }
  0x11   :  { %519 = vmatprep.subr.bf16.mxu0 %v698_v17  ;;  %v744_v48 = vld [vmem:[%s1043_s1 + $0xc4] ss:$8 sps:$4 sm:$0xff]   ;;  %v748_v52 = vld [vmem:[%s1043_s1 + $0xc0] ss:$8 sps:$4 sm:$0xff]   ;;  %v750_v54 = vld [vmem:[%s1043_s1 + $0xd4] ss:$8 sps:$4 sm:$0xff]  }
  0x12   :  { %v770_v49 = vld [vmem:[%s1044_s0 + $0x4] ss:$16 sps:$4 sm:$0xff]   ;;  %v773_v51 = vld [vmem:[%s1044_s0 + $0xc] ss:$16 sps:$4 sm:$0xff]   ;;  %v749_v53 = vld [vmem:[%s1043_s1 + $0x1c0] ss:$8 sps:$4 sm:$0xff]  }
  0x13   :  { %467 = vmatpush1.bf16.msra.mxu1 %v700_v18  ;;  %v746_v50 = vld [vmem:[%s1043_s1 + $0x1c4] ss:$8 sps:$4 sm:$0xff]   ;;  %490 = vmatprep.mubr.bf16.mxu1 %v770_v49  ;;  %v752_v55 = vld [vmem:[%s1043_s1 + $0x1d4] ss:$8 sps:$4 sm:$0xff]   ;;  %v754_v56 = vld [vmem:[%s1043_s1 + $0xd0] ss:$8 sps:$4 sm:$0xff]  }
  0x14   :  { %520 = vmatpush1.bf16.msra.mxu0 %v701_v19  ;;  %468 = vmatprep.subr.bf16.mxu1 %v702_v20  ;;  %v755_v57 = vld [vmem:[%s1043_s1 + $0x1d0] ss:$8 sps:$4 sm:$0xff]   ;;  %v756_v58 = vld [vmem:[%s1043_s1 + $0xe4] ss:$8 sps:$4 sm:$0xff]   ;;  %v760_v60 = vld [vmem:[%s1043_s1 + $0xe0] ss:$8 sps:$4 sm:$0xff]  }
  0x15   :  { %521 = vmatprep.subr.bf16.mxu0 %v704_v21  ;;  %543 = vmatprep.mubr.bf16.mxu0 %v773_v51  ;;  %v758_v59 = vld [vmem:[%s1043_s1 + $0x1e4] ss:$8 sps:$4 sm:$0xff]   ;;  %v761_v61 = vld [vmem:[%s1043_s1 + $0x1e0] ss:$8 sps:$4 sm:$0xff]   ;;  %v762_v62 = vld [vmem:[%s1043_s1 + $0xf4] ss:$8 sps:$4 sm:$0xff]  }
  0x16   :  { %v764_v63 = vld [vmem:[%s1043_s1 + $0x1f4] ss:$8 sps:$4 sm:$0xff]   ;;  %v766_v0 = vld [vmem:[%s1043_s1 + $0xf0] ss:$8 sps:$4 sm:$0xff]   ;;  %v89_v9 = vshrl.u32 %v88_v8, 7 }
  0x17   :  { %469 = vmatpush1.bf16.msra.mxu1 %v706_v22  ;;  %v767_v1 = vld [vmem:[%s1043_s1 + $0x1f0] ss:$8 sps:$4 sm:$0xff]   ;;  %v774_v4 = vld [vmem:[%s1044_s0 + $0x24] ss:$16 sps:$4 sm:$0xff]   ;;  %v776_v5 = vld [vmem:[%s1044_s0 + $0x2c] ss:$16 sps:$4 sm:$0xff]  }
  0x18   :  { %522 = vmatpush1.bf16.msra.mxu0 %v707_v23  ;;  %470 = vmatprep.subr.bf16.mxu1 %v708_v24  ;;  %v768_v2 = vld [vmem:[%s1044_s0] ss:$16 sps:$4 sm:$0xff]   ;;  %v771_v3 = vld [vmem:[%s1044_s0 + $0x8] ss:$16 sps:$4 sm:$0xff]   ;;  %v90_v10 = vsub.s32 0, %v89_v9  ;;  %v94_v12 = vsub.s32 1, %v89_v9 }
  0x19   :  { %523 = vmatprep.subr.bf16.mxu0 %v710_v25  ;;  %v778_v6 = vld [vmem:[%s1044_s0 + $0x20] ss:$16 sps:$4 sm:$0xff]   ;;  %v779_v7 = vld [vmem:[%s1044_s0 + $0x28] ss:$16 sps:$4 sm:$0xff]  }
  0x1a   :  { %v86_v11 = vld [vmem:[%s1045_s2] sm:$0x3] }
  0x1b   :  { %471 = vmatpush1.bf16.msra.mxu1 %v712_v26  ;;  %v91_v13 = vrot.slane %v86_v11, %v90_v10  ;;  %v95_v14 = vrot.slane %v86_v11, %v94_v12 }
  0x1c   :  { %524 = vmatpush1.bf16.msra.mxu0 %v713_v27  ;;  %472 = vmatprep.subr.bf16.mxu1 %v714_v28 }
  0x1d   :  { %525 = vmatprep.subr.bf16.mxu0 %v716_v29 }
  0x1f   :  { %473 = vmatpush1.bf16.msra.mxu1 %v718_v30 }
  0x20   :  { %526 = vmatpush1.bf16.msra.mxu0 %v719_v31  ;;  %474 = vmatprep.subr.bf16.mxu1 %v720_v32 }
  0x21   :  { %527 = vmatprep.subr.bf16.mxu0 %v722_v33 }
  0x23   :  { %475 = vmatpush1.bf16.msra.mxu1 %v724_v34 }
  0x24   :  { %528 = vmatpush1.bf16.msra.mxu0 %v725_v35  ;;  %476 = vmatprep.subr.bf16.mxu1 %v726_v36 }
  0x25   :  { %529 = vmatprep.subr.bf16.mxu0 %v728_v37 }
  0x27   :  { %477 = vmatpush1.bf16.msra.mxu1 %v730_v38 }
  0x28   :  { %530 = vmatpush1.bf16.msra.mxu0 %v731_v39  ;;  %478 = vmatprep.subr.bf16.mxu1 %v732_v40 }
  0x29   :  { %531 = vmatprep.subr.bf16.mxu0 %v734_v41 }
  0x2b   :  { %479 = vmatpush1.bf16.msra.mxu1 %v736_v42 }
  0x2c   :  { %532 = vmatpush1.bf16.msra.mxu0 %v737_v43  ;;  %480 = vmatprep.subr.bf16.mxu1 %v738_v44 }
  0x2d   :  { %533 = vmatprep.subr.bf16.mxu0 %v740_v45 }
  0x2f   :  { %481 = vmatpush1.bf16.msra.mxu1 %v742_v46 }
  0x30   :  { %534 = vmatpush1.bf16.msra.mxu0 %v743_v47  ;;  %482 = vmatprep.subr.bf16.mxu1 %v744_v48 }
  0x31   :  { %535 = vmatprep.subr.bf16.mxu0 %v746_v50 }
  0x33   :  { %483 = vmatpush1.bf16.msra.mxu1 %v748_v52 }
  0x34   :  { %536 = vmatpush1.bf16.msra.mxu0 %v749_v53  ;;  %484 = vmatprep.subr.bf16.mxu1 %v750_v54 }
  0x35   :  { %537 = vmatprep.subr.bf16.mxu0 %v752_v55 }
  0x37   :  { %485 = vmatpush1.bf16.msra.mxu1 %v754_v56 }
  0x38   :  { %538 = vmatpush1.bf16.msra.mxu0 %v755_v57  ;;  %486 = vmatprep.subr.bf16.mxu1 %v756_v58 }
  0x39   :  { %539 = vmatprep.subr.bf16.mxu0 %v758_v59 }
  0x3b   :  { %487 = vmatpush1.bf16.msra.mxu1 %v760_v60 }
  0x3c   :  { %540 = vmatpush1.bf16.msra.mxu0 %v761_v61  ;;  %488 = vmatprep.subr.bf16.mxu1 %v762_v62 }
  0x3d   :  { %541 = vmatprep.subr.bf16.mxu0 %v764_v63 }
  0x3f   :  { %489 = vmatpush1.bf16.msra.mxu1 %v766_v0 }
  0x40   :  { %542 = vmatpush1.bf16.msra.mxu0 %v767_v1 }
  0x42   :  { %491 = vmatmul.mubr.bf16.vlgmr.msra.gmra.mrb[0].mxu1 %v768_v2 }
  0x43   :  { %544 = vmatmul.mubr.bf16.vlgmr.msra.gmra.mrb[0].mxu0 %v771_v3  ;;  %500 = vmatprep.mubr.bf16.mxu1 %v774_v4 }
  0x44   :  { %553 = vmatprep.mubr.bf16.mxu0 %v776_v5 }
  0x4a   :  { %501 = vmatmul.mubr.bf16.gmra.mrb[4].mxu1 %v778_v6 }
  0x4b   :  { %554 = vmatmul.mubr.bf16.gmra.mrb[4].mxu0 %v779_v7 }
 0x115   :  { %v492_v15 = vpop.f32.mrb[0].mxu1 }
 0x116   :  { %v545_v16 = vpop.f32.mrb[0].mxu0  ;;  %v493_v17 = vadd.f32 %v492_v15, %v91_v13  ;;  %v494_v18 = vpop.f32.mrb[1].mxu1 }
 0x117   :  { %v547_v19 = vpop.f32.mrb[1].mxu0  ;;  %v495_v20 = vadd.f32 %v494_v18, %v95_v14  ;;  %v496_v21 = vpop.f32.mrb[2].mxu1 }
 0x118   :  { %v549_v22 = vpop.f32.mrb[2].mxu0  ;;  %v546_v23 = vadd.f32 %v545_v16, %v493_v17  ;;  %v497_v24 = vadd.f32 %v496_v21, %v91_v13  ;;  %v498_v25 = vpop.f32.mrb[3].mxu1 }
 0x119   :  { %v551_v26 = vpop.f32.mrb[3].mxu0  ;;  %v548_v27 = vadd.f32 %v547_v19, %v495_v20  ;;  %v499_v28 = vadd.f32 %v498_v25, %v95_v14 }
 0x11a   :  { %v564_v29 = vmax.f32 %v546_v23, 0.0  ;;  %v550_v30 = vadd.f32 %v549_v22, %v497_v24 }
 0x11b   :  { %v565_v31 = vmax.f32 %v548_v27, 0.0  ;;  %v552_v32 = vadd.f32 %v551_v26, %v499_v28 }
 0x11c   :  { %572 = vst [vmem:[%s1046_s3] sm:$0xff] %v564_v29  ;;  %v566_v33 = vmax.f32 %v550_v30, 0.0 }
 0x11d   :  { %573 = vst [vmem:[%s1046_s3 + $0x8] sm:$0xff] %v565_v31  ;;  %v567_v34 = vmax.f32 %v552_v32, 0.0  ;;  %v502_v35 = vpop.f32.mrb[4].mxu1 }
 0x11e   :  { %v555_v36 = vpop.f32.mrb[4].mxu0  ;;  %574 = vst [vmem:[%s1046_s3 + $0x10] sm:$0xff] %v566_v33  ;;  %v503_v37 = vadd.f32 %v502_v35, %v91_v13  ;;  %v504_v38 = vpop.f32.mrb[5].mxu1 }
 0x11f   :  { %v557_v39 = vpop.f32.mrb[5].mxu0  ;;  %575 = vst [vmem:[%s1046_s3 + $0x18] sm:$0xff] %v567_v34  ;;  %v505_v40 = vadd.f32 %v504_v38, %v95_v14  ;;  %v506_v41 = vpop.f32.mrb[6].mxu1 }
 0x120   :  { %v559_v42 = vpop.f32.mrb[6].mxu0  ;;  %v556_v43 = vadd.f32 %v555_v36, %v503_v37  ;;  %v507_v44 = vadd.f32 %v506_v41, %v91_v13  ;;  %v508_v45 = vpop.f32.mrb[7].mxu1 }
 0x121   :  { %v561_v46 = vpop.f32.mrb[7].mxu0  ;;  %v558_v47 = vadd.f32 %v557_v39, %v505_v40  ;;  %v509_v48 = vadd.f32 %v508_v45, %v95_v14 }
 0x122   :  { %v568_v49 = vmax.f32 %v556_v43, 0.0  ;;  %v560_v50 = vadd.f32 %v559_v42, %v507_v44 }
 0x123   :  { %v569_v51 = vmax.f32 %v558_v47, 0.0  ;;  %v562_v52 = vadd.f32 %v561_v46, %v509_v48 }
 0x124   :  { %576 = vst [vmem:[%s1046_s3 + $0x20] sm:$0xff] %v568_v49  ;;  %v570_v53 = vmax.f32 %v560_v50, 0.0 }
 0x125   :  { %577 = vst [vmem:[%s1046_s3 + $0x28] sm:$0xff] %v569_v51  ;;  %v571_v54 = vmax.f32 %v562_v52, 0.0 }
 0x126   :  { %578 = vst [vmem:[%s1046_s3 + $0x30] sm:$0xff] %v570_v53 }
 0x127   :  { %579 = vst [vmem:[%s1046_s3 + $0x38] sm:$0xff] %v571_v54 }

// kernel: autoencoder_forward.9
= control target key start
LH: loop header
LB: loop body
LE: loop exit
PB: predicated region body
PF: predicated region fallthrough
CT: control target
= control target key end

     0   :  { %s3461_s1 = inlined_call_operand.vmem [shape: bf16[1024,512], index: 1, kind: input, shape index: {}]   ;;  %s3462_s0 = inlined_call_operand.vmem [shape: bf16[8,1024], index: 0, kind: input, shape index: {}]   ;;  %s3463_s2 = inlined_call_operand.vmem [shape: f32[1,512], index: 2, kind: input, shape index: {}]   ;;  %s3464_s3 = inlined_call_operand.vmem [shape: f32[8,512], index: 3, kind: output, shape index: {}]  }
   0x1   :  { %v2236_v0 = vld [vmem:[%s3461_s1 + $0x4] ss:$16 sps:$4 sm:$0xff]   ;;  %v2238_v1 = vld [vmem:[%s3461_s1 + $0xc] ss:$16 sps:$4 sm:$0xff]   ;;  %v2240_v2 = vld [vmem:[%s3461_s1] ss:$16 sps:$4 sm:$0xff]  }
   0x2   :  { %1604 = vmatprep.subr.bf16.mxu0 %v2236_v0  ;;  %v2241_v3 = vld [vmem:[%s3461_s1 + $0x8] ss:$16 sps:$4 sm:$0xff]   ;;  %1768 = vmatprep.subr.bf16.mxu1 %v2238_v1  ;;  %v2242_v4 = vld [vmem:[%s3461_s1 + $0x24] ss:$16 sps:$4 sm:$0xff]   ;;  %v2244_v5 = vld [vmem:[%s3461_s1 + $0x2c] ss:$16 sps:$4 sm:$0xff]  }
   0x3   :  { %1605 = vmatpush1.bf16.msra.mxu0 %v2240_v2  ;;  %1769 = vmatpush1.bf16.msra.mxu1 %v2241_v3  ;;  %v2246_v6 = vld [vmem:[%s3461_s1 + $0x20] ss:$16 sps:$4 sm:$0xff]   ;;  %v2247_v7 = vld [vmem:[%s3461_s1 + $0x28] ss:$16 sps:$4 sm:$0xff]   ;;  %v2248_v8 = vld [vmem:[%s3461_s1 + $0x44] ss:$16 sps:$4 sm:$0xff]  }
   0x4   :  { %1606 = vmatprep.subr.bf16.mxu0 %v2242_v4  ;;  %1770 = vmatprep.subr.bf16.mxu1 %v2244_v5  ;;  %v2250_v9 = vld [vmem:[%s3461_s1 + $0x4c] ss:$16 sps:$4 sm:$0xff]   ;;  %v2252_v10 = vld [vmem:[%s3461_s1 + $0x40] ss:$16 sps:$4 sm:$0xff]   ;;  %v2253_v11 = vld [vmem:[%s3461_s1 + $0x48] ss:$16 sps:$4 sm:$0xff]  }
   0x5   :  { %v2254_v12 = vld [vmem:[%s3461_s1 + $0x64] ss:$16 sps:$4 sm:$0xff]   ;;  %v2256_v13 = vld [vmem:[%s3461_s1 + $0x6c] ss:$16 sps:$4 sm:$0xff]   ;;  %v2258_v14 = vld [vmem:[%s3461_s1 + $0x60] ss:$16 sps:$4 sm:$0xff]  }
   0x6   :  { %v2259_v15 = vld [vmem:[%s3461_s1 + $0x68] ss:$16 sps:$4 sm:$0xff]   ;;  %v2260_v16 = vld [vmem:[%s3461_s1 + $0x84] ss:$16 sps:$4 sm:$0xff]   ;;  %v2262_v17 = vld [vmem:[%s3461_s1 + $0x8c] ss:$16 sps:$4 sm:$0xff]  }
   0x7   :  { %1607 = vmatpush1.bf16.msra.mxu0 %v2246_v6  ;;  %1771 = vmatpush1.bf16.msra.mxu1 %v2247_v7  ;;  %v2264_v18 = vld [vmem:[%s3461_s1 + $0x80] ss:$16 sps:$4 sm:$0xff]   ;;  %v2265_v19 = vld [vmem:[%s3461_s1 + $0x88] ss:$16 sps:$4 sm:$0xff]   ;;  %v2266_v20 = vld [vmem:[%s3461_s1 + $0xa4] ss:$16 sps:$4 sm:$0xff]  }
   0x8   :  { %1608 = vmatprep.subr.bf16.mxu0 %v2248_v8  ;;  %1772 = vmatprep.subr.bf16.mxu1 %v2250_v9  ;;  %v2268_v21 = vld [vmem:[%s3461_s1 + $0xac] ss:$16 sps:$4 sm:$0xff]   ;;  %v2270_v22 = vld [vmem:[%s3461_s1 + $0xa0] ss:$16 sps:$4 sm:$0xff]   ;;  %v2271_v23 = vld [vmem:[%s3461_s1 + $0xa8] ss:$16 sps:$4 sm:$0xff]  }
   0x9   :  { %v2272_v24 = vld [vmem:[%s3461_s1 + $0xc4] ss:$16 sps:$4 sm:$0xff]   ;;  %v2274_v25 = vld [vmem:[%s3461_s1 + $0xcc] ss:$16 sps:$4 sm:$0xff]   ;;  %v2276_v26 = vld [vmem:[%s3461_s1 + $0xc0] ss:$16 sps:$4 sm:$0xff]  }
   0xa   :  { %v2277_v27 = vld [vmem:[%s3461_s1 + $0xc8] ss:$16 sps:$4 sm:$0xff]   ;;  %v2278_v28 = vld [vmem:[%s3461_s1 + $0xe4] ss:$16 sps:$4 sm:$0xff]   ;;  %v2280_v29 = vld [vmem:[%s3461_s1 + $0xec] ss:$16 sps:$4 sm:$0xff]  }
   0xb   :  { %1609 = vmatpush1.bf16.msra.mxu0 %v2252_v10  ;;  %1773 = vmatpush1.bf16.msra.mxu1 %v2253_v11  ;;  %v2282_v30 = vld [vmem:[%s3461_s1 + $0xe0] ss:$16 sps:$4 sm:$0xff]   ;;  %v2283_v31 = vld [vmem:[%s3461_s1 + $0xe8] ss:$16 sps:$4 sm:$0xff]   ;;  %v2284_v32 = vld [vmem:[%s3461_s1 + $0x104] ss:$16 sps:$4 sm:$0xff]  }
   0xc   :  { %1610 = vmatprep.subr.bf16.mxu0 %v2254_v12  ;;  %1774 = vmatprep.subr.bf16.mxu1 %v2256_v13  ;;  %v2286_v33 = vld [vmem:[%s3461_s1 + $0x10c] ss:$16 sps:$4 sm:$0xff]   ;;  %v2288_v34 = vld [vmem:[%s3461_s1 + $0x100] ss:$16 sps:$4 sm:$0xff]   ;;  %v2289_v35 = vld [vmem:[%s3461_s1 + $0x108] ss:$16 sps:$4 sm:$0xff]  }
   0xd   :  { %v2290_v36 = vld [vmem:[%s3461_s1 + $0x124] ss:$16 sps:$4 sm:$0xff]   ;;  %v2292_v37 = vld [vmem:[%s3461_s1 + $0x12c] ss:$16 sps:$4 sm:$0xff]   ;;  %v2294_v38 = vld [vmem:[%s3461_s1 + $0x120] ss:$16 sps:$4 sm:$0xff]  }
   0xe   :  { %v2295_v39 = vld [vmem:[%s3461_s1 + $0x128] ss:$16 sps:$4 sm:$0xff]   ;;  %v2296_v40 = vld [vmem:[%s3461_s1 + $0x144] ss:$16 sps:$4 sm:$0xff]   ;;  %v2298_v41 = vld [vmem:[%s3461_s1 + $0x14c] ss:$16 sps:$4 sm:$0xff]  }
   0xf   :  { %1611 = vmatpush1.bf16.msra.mxu0 %v2258_v14  ;;  %1775 = vmatpush1.bf16.msra.mxu1 %v2259_v15  ;;  %v2300_v42 = vld [vmem:[%s3461_s1 + $0x140] ss:$16 sps:$4 sm:$0xff]   ;;  %v2301_v43 = vld [vmem:[%s3461_s1 + $0x148] ss:$16 sps:$4 sm:$0xff]   ;;  %v2302_v44 = vld [vmem:[%s3461_s1 + $0x164] ss:$16 sps:$4 sm:$0xff]  }
  0x10   :  { %1612 = vmatprep.subr.bf16.mxu0 %v2260_v16  ;;  %1776 = vmatprep.subr.bf16.mxu1 %v2262_v17  ;;  %v2304_v45 = vld [vmem:[%s3461_s1 + $0x16c] ss:$16 sps:$4 sm:$0xff]   ;;  %v14_v46 = vld [vmem:[%s3462_s0] sm:$0xff]  ;;  %v2307_v49 = vld [vmem:[%s3461_s1 + $0x168] ss:$16 sps:$4 sm:$0xff]  }
  0x11   :  { %v2306_v47 = vld [vmem:[%s3461_s1 + $0x160] ss:$16 sps:$4 sm:$0xff]   ;;  %v1945_v48 = vcombine.high %v14_v46, %v14_v46  ;;  %v2308_v50 = vld [vmem:[%s3461_s1 + $0x184] ss:$16 sps:$4 sm:$0xff]   ;;  %v2310_v51 = vld [vmem:[%s3461_s1 + $0x18c] ss:$16 sps:$4 sm:$0xff]   ;;  %v1944_v4 = vcombine.low %v14_v46, %v14_v46 }
  0x12   :  { %v2312_v52 = vld [vmem:[%s3461_s1 + $0x180] ss:$16 sps:$4 sm:$0xff]   ;;  %v2313_v53 = vld [vmem:[%s3461_s1 + $0x188] ss:$16 sps:$4 sm:$0xff]   ;;  %v2314_v54 = vld [vmem:[%s3461_s1 + $0x1a4] ss:$16 sps:$4 sm:$0xff]  }
  0x13   :  { %1613 = vmatpush1.bf16.msra.mxu0 %v2264_v18  ;;  %1777 = vmatpush1.bf16.msra.mxu1 %v2265_v19  ;;  %v2316_v55 = vld [vmem:[%s3461_s1 + $0x1ac] ss:$16 sps:$4 sm:$0xff]   ;;  %v2318_v56 = vld [vmem:[%s3461_s1 + $0x1a0] ss:$16 sps:$4 sm:$0xff]   ;;  %v2319_v57 = vld [vmem:[%s3461_s1 + $0x1a8] ss:$16 sps:$4 sm:$0xff]  }
  0x14   :  { %1614 = vmatprep.subr.bf16.mxu0 %v2266_v20  ;;  %1778 = vmatprep.subr.bf16.mxu1 %v2268_v21  ;;  %v2320_v58 = vld [vmem:[%s3461_s1 + $0x1c4] ss:$16 sps:$4 sm:$0xff]   ;;  %v2322_v59 = vld [vmem:[%s3461_s1 + $0x1cc] ss:$16 sps:$4 sm:$0xff]   ;;  %v2324_v60 = vld [vmem:[%s3461_s1 + $0x1c0] ss:$16 sps:$4 sm:$0xff]  }
  0x15   :  { %1636 = vmatprep.mubr.bf16.mxu0 %v1945_v48  ;;  %1800 = vmatprep.mubr.bf16.mxu1 %v1945_v48  ;;  %v2325_v61 = vld [vmem:[%s3461_s1 + $0x1c8] ss:$16 sps:$4 sm:$0xff]   ;;  %v2326_v62 = vld [vmem:[%s3461_s1 + $0x1e4] ss:$16 sps:$4 sm:$0xff]   ;;  %v2328_v63 = vld [vmem:[%s3461_s1 + $0x1ec] ss:$16 sps:$4 sm:$0xff]  }
  0x16   :  { %v2330_v0 = vld [vmem:[%s3461_s1 + $0x1e0] ss:$16 sps:$4 sm:$0xff]   ;;  %v2331_v1 = vld [vmem:[%s3461_s1 + $0x1e8] ss:$16 sps:$4 sm:$0xff]   ;;  %v2336_v2 = vld [vmem:[%s3461_s1 + $0x204] ss:$16 sps:$4 sm:$0xff]  }
  0x17   :  { %1615 = vmatpush1.bf16.msra.mxu0 %v2270_v22  ;;  %1779 = vmatpush1.bf16.msra.mxu1 %v2271_v23  ;;  %v2339_v3 = vld [vmem:[%s3461_s1 + $0x20c] ss:$16 sps:$4 sm:$0xff]   ;;  %v2334_v5 = vld [vmem:[%s3461_s1 + $0x200] ss:$16 sps:$4 sm:$0xff]   ;;  %v2337_v6 = vld [vmem:[%s3461_s1 + $0x208] ss:$16 sps:$4 sm:$0xff]  }
  0x18   :  { %1616 = vmatprep.subr.bf16.mxu0 %v2272_v24  ;;  %1780 = vmatprep.subr.bf16.mxu1 %v2274_v25  ;;  %v2342_v7 = vld [vmem:[%s3461_s1 + $0x224] ss:$16 sps:$4 sm:$0xff]   ;;  %v2345_v8 = vld [vmem:[%s3461_s1 + $0x22c] ss:$16 sps:$4 sm:$0xff]   ;;  %v2340_v9 = vld [vmem:[%s3461_s1 + $0x220] ss:$16 sps:$4 sm:$0xff]  }
  0x19   :  { %v2343_v10 = vld [vmem:[%s3461_s1 + $0x228] ss:$16 sps:$4 sm:$0xff]   ;;  %v2348_v11 = vld [vmem:[%s3461_s1 + $0x244] ss:$16 sps:$4 sm:$0xff]   ;;  %v2351_v12 = vld [vmem:[%s3461_s1 + $0x24c] ss:$16 sps:$4 sm:$0xff]  }
  0x1a   :  { %v2346_v13 = vld [vmem:[%s3461_s1 + $0x240] ss:$16 sps:$4 sm:$0xff]   ;;  %v2349_v14 = vld [vmem:[%s3461_s1 + $0x248] ss:$16 sps:$4 sm:$0xff]   ;;  %v2354_v15 = vld [vmem:[%s3461_s1 + $0x264] ss:$16 sps:$4 sm:$0xff]  }
  0x1b   :  { %1617 = vmatpush1.bf16.msra.mxu0 %v2276_v26  ;;  %1781 = vmatpush1.bf16.msra.mxu1 %v2277_v27  ;;  %v2357_v16 = vld [vmem:[%s3461_s1 + $0x26c] ss:$16 sps:$4 sm:$0xff]   ;;  %v2352_v17 = vld [vmem:[%s3461_s1 + $0x260] ss:$16 sps:$4 sm:$0xff]   ;;  %v2355_v18 = vld [vmem:[%s3461_s1 + $0x268] ss:$16 sps:$4 sm:$0xff]  }
  0x1c   :  { %1618 = vmatprep.subr.bf16.mxu0 %v2278_v28  ;;  %1782 = vmatprep.subr.bf16.mxu1 %v2280_v29  ;;  %v2360_v19 = vld [vmem:[%s3461_s1 + $0x284] ss:$16 sps:$4 sm:$0xff]   ;;  %v2363_v20 = vld [vmem:[%s3461_s1 + $0x28c] ss:$16 sps:$4 sm:$0xff]   ;;  %v2358_v21 = vld [vmem:[%s3461_s1 + $0x280] ss:$16 sps:$4 sm:$0xff]  }
  0x1d   :  { %v2361_v22 = vld [vmem:[%s3461_s1 + $0x288] ss:$16 sps:$4 sm:$0xff]   ;;  %v2366_v23 = vld [vmem:[%s3461_s1 + $0x2a4] ss:$16 sps:$4 sm:$0xff]   ;;  %v2369_v24 = vld [vmem:[%s3461_s1 + $0x2ac] ss:$16 sps:$4 sm:$0xff]  }
  0x1e   :  { %v2364_v25 = vld [vmem:[%s3461_s1 + $0x2a0] ss:$16 sps:$4 sm:$0xff]   ;;  %v2367_v26 = vld [vmem:[%s3461_s1 + $0x2a8] ss:$16 sps:$4 sm:$0xff]   ;;  %v2372_v27 = vld [vmem:[%s3461_s1 + $0x2c4] ss:$16 sps:$4 sm:$0xff]  }
  0x1f   :  { %1619 = vmatpush1.bf16.msra.mxu0 %v2282_v30  ;;  %1783 = vmatpush1.bf16.msra.mxu1 %v2283_v31  ;;  %v2375_v28 = vld [vmem:[%s3461_s1 + $0x2cc] ss:$16 sps:$4 sm:$0xff]   ;;  %v2370_v31 = vld [vmem:[%s3461_s1 + $0x2c0] ss:$16 sps:$4 sm:$0xff]   ;;  %v2397_v48 = vld [vmem:[%s3461_s1 + $0x348] ss:$16 sps:$4 sm:$0xff]  }
  0x20   :  { %1620 = vmatprep.subr.bf16.mxu0 %v2284_v32  ;;  %1784 = vmatprep.subr.bf16.mxu1 %v2286_v33  ;;  %v2924_v29 = vld [vmem:[%s3462_s0 + $0x8] sm:$0xff]  ;;  %v2378_v33 = vld [vmem:[%s3461_s1 + $0x2e4] ss:$16 sps:$4 sm:$0xff]  }
  0x21   :  { %v1947_v30 = vcombine.high %v2924_v29, %v2924_v29  ;;  %v2373_v32 = vld [vmem:[%s3461_s1 + $0x2c8] ss:$16 sps:$4 sm:$0xff]   ;;  %v2399_v46 = vld [vmem:[%s3461_s1 + $0x34c] ss:$16 sps:$4 sm:$0xff]  }
  0x23   :  { %1621 = vmatpush1.bf16.msra.mxu0 %v2288_v34  ;;  %1785 = vmatpush1.bf16.msra.mxu1 %v2289_v35  ;;  %v2381_v34 = vld [vmem:[%s3461_s1 + $0x2ec] ss:$16 sps:$4 sm:$0xff]   ;;  %v2376_v35 = vld [vmem:[%s3461_s1 + $0x2e0] ss:$16 sps:$4 sm:$0xff]  }
  0x24   :  { %1622 = vmatprep.subr.bf16.mxu0 %v2290_v36  ;;  %1786 = vmatprep.subr.bf16.mxu1 %v2292_v37  ;;  %v2379_v36 = vld [vmem:[%s3461_s1 + $0x2e8] ss:$16 sps:$4 sm:$0xff]   ;;  %v2384_v37 = vld [vmem:[%s3461_s1 + $0x304] ss:$16 sps:$4 sm:$0xff]  }
  0x27   :  { %1623 = vmatpush1.bf16.msra.mxu0 %v2294_v38  ;;  %1787 = vmatpush1.bf16.msra.mxu1 %v2295_v39  ;;  %v2387_v38 = vld [vmem:[%s3461_s1 + $0x30c] ss:$16 sps:$4 sm:$0xff]   ;;  %v2382_v39 = vld [vmem:[%s3461_s1 + $0x300] ss:$16 sps:$4 sm:$0xff]  }
  0x28   :  { %1624 = vmatprep.subr.bf16.mxu0 %v2296_v40  ;;  %1788 = vmatprep.subr.bf16.mxu1 %v2298_v41  ;;  %v2385_v40 = vld [vmem:[%s3461_s1 + $0x308] ss:$16 sps:$4 sm:$0xff]   ;;  %v2390_v41 = vld [vmem:[%s3461_s1 + $0x324] ss:$16 sps:$4 sm:$0xff]  }
  0x2b   :  { %1625 = vmatpush1.bf16.msra.mxu0 %v2300_v42  ;;  %1789 = vmatpush1.bf16.msra.mxu1 %v2301_v43  ;;  %v2393_v42 = vld [vmem:[%s3461_s1 + $0x32c] ss:$16 sps:$4 sm:$0xff]   ;;  %v2388_v43 = vld [vmem:[%s3461_s1 + $0x320] ss:$16 sps:$4 sm:$0xff]  }
  0x2c   :  { %1626 = vmatprep.subr.bf16.mxu0 %v2302_v44  ;;  %1790 = vmatprep.subr.bf16.mxu1 %v2304_v45  ;;  %v2391_v44 = vld [vmem:[%s3461_s1 + $0x328] ss:$16 sps:$4 sm:$0xff]   ;;  %v2396_v45 = vld [vmem:[%s3461_s1 + $0x344] ss:$16 sps:$4 sm:$0xff]  }
  0x2f   :  { %1627 = vmatpush1.bf16.msra.mxu0 %v2306_v47  ;;  %1791 = vmatpush1.bf16.msra.mxu1 %v2307_v49  ;;  %v2394_v47 = vld [vmem:[%s3461_s1 + $0x340] ss:$16 sps:$4 sm:$0xff]   ;;  %v2402_v49 = vld [vmem:[%s3461_s1 + $0x364] ss:$16 sps:$4 sm:$0xff]  }
  0x30   :  { %1628 = vmatprep.subr.bf16.mxu0 %v2308_v50  ;;  %1792 = vmatprep.subr.bf16.mxu1 %v2310_v51  ;;  %v2405_v50 = vld [vmem:[%s3461_s1 + $0x36c] ss:$16 sps:$4 sm:$0xff]   ;;  %v2400_v51 = vld [vmem:[%s3461_s1 + $0x360] ss:$16 sps:$4 sm:$0xff]  }
  0x33   :  { %1629 = vmatpush1.bf16.msra.mxu0 %v2312_v52  ;;  %1793 = vmatpush1.bf16.msra.mxu1 %v2313_v53  ;;  %v2403_v52 = vld [vmem:[%s3461_s1 + $0x368] ss:$16 sps:$4 sm:$0xff]   ;;  %v2408_v53 = vld [vmem:[%s3461_s1 + $0x384] ss:$16 sps:$4 sm:$0xff]  }
  0x34   :  { %1630 = vmatprep.subr.bf16.mxu0 %v2314_v54  ;;  %1794 = vmatprep.subr.bf16.mxu1 %v2316_v55  ;;  %v2411_v54 = vld [vmem:[%s3461_s1 + $0x38c] ss:$16 sps:$4 sm:$0xff]   ;;  %v2406_v55 = vld [vmem:[%s3461_s1 + $0x380] ss:$16 sps:$4 sm:$0xff]  }
  0x37   :  { %1631 = vmatpush1.bf16.msra.mxu0 %v2318_v56  ;;  %1795 = vmatpush1.bf16.msra.mxu1 %v2319_v57  ;;  %v2409_v56 = vld [vmem:[%s3461_s1 + $0x388] ss:$16 sps:$4 sm:$0xff]   ;;  %v2414_v57 = vld [vmem:[%s3461_s1 + $0x3a4] ss:$16 sps:$4 sm:$0xff]  }
  0x38   :  { %1632 = vmatprep.subr.bf16.mxu0 %v2320_v58  ;;  %1796 = vmatprep.subr.bf16.mxu1 %v2322_v59  ;;  %v2417_v58 = vld [vmem:[%s3461_s1 + $0x3ac] ss:$16 sps:$4 sm:$0xff]   ;;  %v2412_v59 = vld [vmem:[%s3461_s1 + $0x3a0] ss:$16 sps:$4 sm:$0xff]  }
  0x3b   :  { %1633 = vmatpush1.bf16.msra.mxu0 %v2324_v60  ;;  %1797 = vmatpush1.bf16.msra.mxu1 %v2325_v61  ;;  %v2415_v60 = vld [vmem:[%s3461_s1 + $0x3a8] ss:$16 sps:$4 sm:$0xff]   ;;  %v2420_v61 = vld [vmem:[%s3461_s1 + $0x3c4] ss:$16 sps:$4 sm:$0xff]  }
  0x3c   :  { %1634 = vmatprep.subr.bf16.mxu0 %v2326_v62  ;;  %1798 = vmatprep.subr.bf16.mxu1 %v2328_v63  ;;  %v2423_v62 = vld [vmem:[%s3461_s1 + $0x3cc] ss:$16 sps:$4 sm:$0xff]   ;;  %v2418_v63 = vld [vmem:[%s3461_s1 + $0x3c0] ss:$16 sps:$4 sm:$0xff]  }
  0x3f   :  { %1635 = vmatpush1.bf16.msra.mxu0 %v2330_v0  ;;  %1799 = vmatpush1.bf16.msra.mxu1 %v2331_v1  ;;  %v2421_v0 = vld [vmem:[%s3461_s1 + $0x3c8] ss:$16 sps:$4 sm:$0xff]   ;;  %v2426_v1 = vld [vmem:[%s3461_s1 + $0x3e4] ss:$16 sps:$4 sm:$0xff]  }
  0x40   :  { %1645 = vmatprep.subr.bf16.mxu0 %v2336_v2  ;;  %1809 = vmatprep.subr.bf16.mxu1 %v2339_v3  ;;  %v2429_v2 = vld [vmem:[%s3461_s1 + $0x3ec] ss:$16 sps:$4 sm:$0xff]   ;;  %v2424_v3 = vld [vmem:[%s3461_s1 + $0x3e0] ss:$16 sps:$4 sm:$0xff]  }
  0x42   :  { %1637 = vmatmul.mubr.bf16.vlgmr.msra.gmra.mrb[0].mxu0 %v1944_v4  ;;  %1801 = vmatmul.mubr.bf16.vlgmr.msra.gmra.mrb[0].mxu1 %v1944_v4  ;;  %v2427_v4 = vld [vmem:[%s3461_s1 + $0x3e8] ss:$16 sps:$4 sm:$0xff]  }
  0x43   :  { %1646 = vmatpush1.bf16.msra.mxu0 %v2334_v5  ;;  %1810 = vmatpush1.bf16.msra.mxu1 %v2337_v6  ;;  %v2434_v5 = vld [vmem:[%s3461_s1 + $0x404] ss:$16 sps:$4 sm:$0xff]   ;;  %v2437_v6 = vld [vmem:[%s3461_s1 + $0x40c] ss:$16 sps:$4 sm:$0xff]  }
  0x44   :  { %1647 = vmatprep.subr.bf16.mxu0 %v2342_v7  ;;  %1811 = vmatprep.subr.bf16.mxu1 %v2345_v8  ;;  %v1946_v7 = vcombine.low %v2924_v29, %v2924_v29  ;;  %v2432_v8 = vld [vmem:[%s3461_s1 + $0x400] ss:$16 sps:$4 sm:$0xff]   ;;  %v2467_v29 = vld [vmem:[%s3461_s1 + $0x4ac] ss:$16 sps:$4 sm:$0xff]  }
  0x45   :  { %1677 = vmatprep.mubr.bf16.mxu0 %v1947_v30  ;;  %1841 = vmatprep.mubr.bf16.mxu1 %v1947_v30  ;;  %v2462_v30 = vld [vmem:[%s3461_s1 + $0x4a0] ss:$16 sps:$4 sm:$0xff]  }
  0x47   :  { %1648 = vmatpush1.bf16.msra.mxu0 %v2340_v9  ;;  %1812 = vmatpush1.bf16.msra.mxu1 %v2343_v10  ;;  %v2435_v9 = vld [vmem:[%s3461_s1 + $0x408] ss:$16 sps:$4 sm:$0xff]   ;;  %v2440_v10 = vld [vmem:[%s3461_s1 + $0x424] ss:$16 sps:$4 sm:$0xff]  }
  0x48   :  { %1649 = vmatprep.subr.bf16.mxu0 %v2348_v11  ;;  %1813 = vmatprep.subr.bf16.mxu1 %v2351_v12  ;;  %v3062_v11 = vld [vmem:[%s3462_s0 + $0x10] sm:$0xff]  ;;  %v2443_v12 = vld [vmem:[%s3461_s1 + $0x42c] ss:$16 sps:$4 sm:$0xff]  }
  0x4b   :  { %1650 = vmatpush1.bf16.msra.mxu0 %v2346_v13  ;;  %1814 = vmatpush1.bf16.msra.mxu1 %v2349_v14  ;;  %v1949_v13 = vcombine.high %v3062_v11, %v3062_v11  ;;  %v2438_v14 = vld [vmem:[%s3461_s1 + $0x420] ss:$16 sps:$4 sm:$0xff]  }
  0x4c   :  { %1651 = vmatprep.subr.bf16.mxu0 %v2354_v15  ;;  %1815 = vmatprep.subr.bf16.mxu1 %v2357_v16  ;;  %v2441_v15 = vld [vmem:[%s3461_s1 + $0x428] ss:$16 sps:$4 sm:$0xff]   ;;  %v2446_v16 = vld [vmem:[%s3461_s1 + $0x444] ss:$16 sps:$4 sm:$0xff]  }
  0x4f   :  { %1652 = vmatpush1.bf16.msra.mxu0 %v2352_v17  ;;  %1816 = vmatpush1.bf16.msra.mxu1 %v2355_v18  ;;  %v2449_v17 = vld [vmem:[%s3461_s1 + $0x44c] ss:$16 sps:$4 sm:$0xff]   ;;  %v2444_v18 = vld [vmem:[%s3461_s1 + $0x440] ss:$16 sps:$4 sm:$0xff]  }
  0x50   :  { %1653 = vmatprep.subr.bf16.mxu0 %v2360_v19  ;;  %1817 = vmatprep.subr.bf16.mxu1 %v2363_v20  ;;  %v2447_v19 = vld [vmem:[%s3461_s1 + $0x448] ss:$16 sps:$4 sm:$0xff]   ;;  %v2452_v20 = vld [vmem:[%s3461_s1 + $0x464] ss:$16 sps:$4 sm:$0xff]  }
  0x53   :  { %1654 = vmatpush1.bf16.msra.mxu0 %v2358_v21  ;;  %1818 = vmatpush1.bf16.msra.mxu1 %v2361_v22  ;;  %v2455_v21 = vld [vmem:[%s3461_s1 + $0x46c] ss:$16 sps:$4 sm:$0xff]   ;;  %v2450_v22 = vld [vmem:[%s3461_s1 + $0x460] ss:$16 sps:$4 sm:$0xff]  }
  0x54   :  { %1655 = vmatprep.subr.bf16.mxu0 %v2366_v23  ;;  %1819 = vmatprep.subr.bf16.mxu1 %v2369_v24  ;;  %v2453_v23 = vld [vmem:[%s3461_s1 + $0x468] ss:$16 sps:$4 sm:$0xff]   ;;  %v2458_v24 = vld [vmem:[%s3461_s1 + $0x484] ss:$16 sps:$4 sm:$0xff]  }
  0x57   :  { %1656 = vmatpush1.bf16.msra.mxu0 %v2364_v25  ;;  %1820 = vmatpush1.bf16.msra.mxu1 %v2367_v26  ;;  %v2461_v25 = vld [vmem:[%s3461_s1 + $0x48c] ss:$16 sps:$4 sm:$0xff]   ;;  %v2456_v26 = vld [vmem:[%s3461_s1 + $0x480] ss:$16 sps:$4 sm:$0xff]  }
  0x58   :  { %1657 = vmatprep.subr.bf16.mxu0 %v2372_v27  ;;  %1821 = vmatprep.subr.bf16.mxu1 %v2375_v28  ;;  %v2459_v27 = vld [vmem:[%s3461_s1 + $0x488] ss:$16 sps:$4 sm:$0xff]   ;;  %v2464_v28 = vld [vmem:[%s3461_s1 + $0x4a4] ss:$16 sps:$4 sm:$0xff]  }
  0x5b   :  { %1658 = vmatpush1.bf16.msra.mxu0 %v2370_v31  ;;  %1822 = vmatpush1.bf16.msra.mxu1 %v2373_v32  ;;  %v2465_v31 = vld [vmem:[%s3461_s1 + $0x4a8] ss:$16 sps:$4 sm:$0xff]   ;;  %v2470_v32 = vld [vmem:[%s3461_s1 + $0x4c4] ss:$16 sps:$4 sm:$0xff]  }
  0x5c   :  { %1659 = vmatprep.subr.bf16.mxu0 %v2378_v33  ;;  %1823 = vmatprep.subr.bf16.mxu1 %v2381_v34  ;;  %v2473_v33 = vld [vmem:[%s3461_s1 + $0x4cc] ss:$16 sps:$4 sm:$0xff]   ;;  %v2468_v34 = vld [vmem:[%s3461_s1 + $0x4c0] ss:$16 sps:$4 sm:$0xff]  }
  0x5f   :  { %1660 = vmatpush1.bf16.msra.mxu0 %v2376_v35  ;;  %1824 = vmatpush1.bf16.msra.mxu1 %v2379_v36  ;;  %v2471_v35 = vld [vmem:[%s3461_s1 + $0x4c8] ss:$16 sps:$4 sm:$0xff]   ;;  %v2476_v36 = vld [vmem:[%s3461_s1 + $0x4e4] ss:$16 sps:$4 sm:$0xff]  }
  0x60   :  { %1661 = vmatprep.subr.bf16.mxu0 %v2384_v37  ;;  %1825 = vmatprep.subr.bf16.mxu1 %v2387_v38  ;;  %v2479_v37 = vld [vmem:[%s3461_s1 + $0x4ec] ss:$16 sps:$4 sm:$0xff]   ;;  %v2474_v38 = vld [vmem:[%s3461_s1 + $0x4e0] ss:$16 sps:$4 sm:$0xff]  }
  0x63   :  { %1662 = vmatpush1.bf16.msra.mxu0 %v2382_v39  ;;  %1826 = vmatpush1.bf16.msra.mxu1 %v2385_v40  ;;  %v2477_v39 = vld [vmem:[%s3461_s1 + $0x4e8] ss:$16 sps:$4 sm:$0xff]   ;;  %v2482_v40 = vld [vmem:[%s3461_s1 + $0x504] ss:$16 sps:$4 sm:$0xff]  }
  0x64   :  { %1663 = vmatprep.subr.bf16.mxu0 %v2390_v41  ;;  %1827 = vmatprep.subr.bf16.mxu1 %v2393_v42  ;;  %v2485_v41 = vld [vmem:[%s3461_s1 + $0x50c] ss:$16 sps:$4 sm:$0xff]   ;;  %v2480_v42 = vld [vmem:[%s3461_s1 + $0x500] ss:$16 sps:$4 sm:$0xff]  }
  0x67   :  { %1664 = vmatpush1.bf16.msra.mxu0 %v2388_v43  ;;  %1828 = vmatpush1.bf16.msra.mxu1 %v2391_v44  ;;  %v2483_v43 = vld [vmem:[%s3461_s1 + $0x508] ss:$16 sps:$4 sm:$0xff]   ;;  %v2488_v44 = vld [vmem:[%s3461_s1 + $0x524] ss:$16 sps:$4 sm:$0xff]  }
  0x68   :  { %1665 = vmatprep.subr.bf16.mxu0 %v2396_v45  ;;  %1829 = vmatprep.subr.bf16.mxu1 %v2399_v46  ;;  %v2491_v45 = vld [vmem:[%s3461_s1 + $0x52c] ss:$16 sps:$4 sm:$0xff]   ;;  %v2486_v46 = vld [vmem:[%s3461_s1 + $0x520] ss:$16 sps:$4 sm:$0xff]  }
  0x6b   :  { %1666 = vmatpush1.bf16.msra.mxu0 %v2394_v47  ;;  %1830 = vmatpush1.bf16.msra.mxu1 %v2397_v48  ;;  %v2489_v47 = vld [vmem:[%s3461_s1 + $0x528] ss:$16 sps:$4 sm:$0xff]   ;;  %v2494_v48 = vld [vmem:[%s3461_s1 + $0x544] ss:$16 sps:$4 sm:$0xff]  }
  0x6c   :  { %1667 = vmatprep.subr.bf16.mxu0 %v2402_v49  ;;  %1831 = vmatprep.subr.bf16.mxu1 %v2405_v50  ;;  %v2497_v49 = vld [vmem:[%s3461_s1 + $0x54c] ss:$16 sps:$4 sm:$0xff]   ;;  %v2492_v50 = vld [vmem:[%s3461_s1 + $0x540] ss:$16 sps:$4 sm:$0xff]  }
  0x6f   :  { %1668 = vmatpush1.bf16.msra.mxu0 %v2400_v51  ;;  %1832 = vmatpush1.bf16.msra.mxu1 %v2403_v52  ;;  %v2495_v51 = vld [vmem:[%s3461_s1 + $0x548] ss:$16 sps:$4 sm:$0xff]   ;;  %v2500_v52 = vld [vmem:[%s3461_s1 + $0x564] ss:$16 sps:$4 sm:$0xff]  }
  0x70   :  { %1669 = vmatprep.subr.bf16.mxu0 %v2408_v53  ;;  %1833 = vmatprep.subr.bf16.mxu1 %v2411_v54  ;;  %v2503_v53 = vld [vmem:[%s3461_s1 + $0x56c] ss:$16 sps:$4 sm:$0xff]   ;;  %v2498_v54 = vld [vmem:[%s3461_s1 + $0x560] ss:$16 sps:$4 sm:$0xff]  }
  0x73   :  { %1670 = vmatpush1.bf16.msra.mxu0 %v2406_v55  ;;  %1834 = vmatpush1.bf16.msra.mxu1 %v2409_v56  ;;  %v2501_v55 = vld [vmem:[%s3461_s1 + $0x568] ss:$16 sps:$4 sm:$0xff]   ;;  %v2506_v56 = vld [vmem:[%s3461_s1 + $0x584] ss:$16 sps:$4 sm:$0xff]  }
  0x74   :  { %1671 = vmatprep.subr.bf16.mxu0 %v2414_v57  ;;  %1835 = vmatprep.subr.bf16.mxu1 %v2417_v58  ;;  %v2509_v57 = vld [vmem:[%s3461_s1 + $0x58c] ss:$16 sps:$4 sm:$0xff]   ;;  %v2504_v58 = vld [vmem:[%s3461_s1 + $0x580] ss:$16 sps:$4 sm:$0xff]  }
  0x77   :  { %1672 = vmatpush1.bf16.msra.mxu0 %v2412_v59  ;;  %1836 = vmatpush1.bf16.msra.mxu1 %v2415_v60  ;;  %v2507_v59 = vld [vmem:[%s3461_s1 + $0x588] ss:$16 sps:$4 sm:$0xff]   ;;  %v2512_v60 = vld [vmem:[%s3461_s1 + $0x5a4] ss:$16 sps:$4 sm:$0xff]  }
  0x78   :  { %1673 = vmatprep.subr.bf16.mxu0 %v2420_v61  ;;  %1837 = vmatprep.subr.bf16.mxu1 %v2423_v62  ;;  %v2515_v61 = vld [vmem:[%s3461_s1 + $0x5ac] ss:$16 sps:$4 sm:$0xff]   ;;  %v2510_v62 = vld [vmem:[%s3461_s1 + $0x5a0] ss:$16 sps:$4 sm:$0xff]  }
  0x7b   :  { %1674 = vmatpush1.bf16.msra.mxu0 %v2418_v63  ;;  %1838 = vmatpush1.bf16.msra.mxu1 %v2421_v0  ;;  %v2513_v63 = vld [vmem:[%s3461_s1 + $0x5a8] ss:$16 sps:$4 sm:$0xff]   ;;  %v2518_v0 = vld [vmem:[%s3461_s1 + $0x5c4] ss:$16 sps:$4 sm:$0xff]  }
  0x7c   :  { %1675 = vmatprep.subr.bf16.mxu0 %v2426_v1  ;;  %1839 = vmatprep.subr.bf16.mxu1 %v2429_v2  ;;  %v2521_v1 = vld [vmem:[%s3461_s1 + $0x5cc] ss:$16 sps:$4 sm:$0xff]   ;;  %v2516_v2 = vld [vmem:[%s3461_s1 + $0x5c0] ss:$16 sps:$4 sm:$0xff]  }
  0x7f   :  { %1676 = vmatpush1.bf16.msra.mxu0 %v2424_v3  ;;  %1840 = vmatpush1.bf16.msra.mxu1 %v2427_v4  ;;  %v2519_v3 = vld [vmem:[%s3461_s1 + $0x5c8] ss:$16 sps:$4 sm:$0xff]   ;;  %v2524_v4 = vld [vmem:[%s3461_s1 + $0x5e4] ss:$16 sps:$4 sm:$0xff]  }
  0x80   :  { %1686 = vmatprep.subr.bf16.mxu0 %v2434_v5  ;;  %1850 = vmatprep.subr.bf16.mxu1 %v2437_v6  ;;  %v2527_v5 = vld [vmem:[%s3461_s1 + $0x5ec] ss:$16 sps:$4 sm:$0xff]   ;;  %v2522_v6 = vld [vmem:[%s3461_s1 + $0x5e0] ss:$16 sps:$4 sm:$0xff]  }
  0x82   :  { %1678 = vmatmul.mubr.bf16.vlgmr.msra.gmra.mrb[0].mxu0 %v1946_v7  ;;  %1842 = vmatmul.mubr.bf16.vlgmr.msra.gmra.mrb[0].mxu1 %v1946_v7  ;;  %v2525_v7 = vld [vmem:[%s3461_s1 + $0x5e8] ss:$16 sps:$4 sm:$0xff]  }
  0x83   :  { %1687 = vmatpush1.bf16.msra.mxu0 %v2432_v8  ;;  %1851 = vmatpush1.bf16.msra.mxu1 %v2435_v9  ;;  %v2532_v8 = vld [vmem:[%s3461_s1 + $0x604] ss:$16 sps:$4 sm:$0xff]   ;;  %v2535_v9 = vld [vmem:[%s3461_s1 + $0x60c] ss:$16 sps:$4 sm:$0xff]  }
  0x84   :  { %1688 = vmatprep.subr.bf16.mxu0 %v2440_v10  ;;  %1852 = vmatprep.subr.bf16.mxu1 %v2443_v12  ;;  %v1948_v10 = vcombine.low %v3062_v11, %v3062_v11  ;;  %v3254_v12 = vld [vmem:[%s3462_s0 + $0x18] sm:$0xff]  ;;  %v2538_v11 = vld [vmem:[%s3461_s1 + $0x624] ss:$16 sps:$4 sm:$0xff]  }
  0x85   :  { %1718 = vmatprep.mubr.bf16.mxu0 %v1949_v13  ;;  %1882 = vmatprep.mubr.bf16.mxu1 %v1949_v13  ;;  %v2530_v13 = vld [vmem:[%s3461_s1 + $0x600] ss:$16 sps:$4 sm:$0xff]  }
  0x87   :  { %1689 = vmatpush1.bf16.msra.mxu0 %v2438_v14  ;;  %1853 = vmatpush1.bf16.msra.mxu1 %v2441_v15  ;;  %v2533_v14 = vld [vmem:[%s3461_s1 + $0x608] ss:$16 sps:$4 sm:$0xff]   ;;  %v2541_v15 = vld [vmem:[%s3461_s1 + $0x62c] ss:$16 sps:$4 sm:$0xff]  }
  0x88   :  { %1690 = vmatprep.subr.bf16.mxu0 %v2446_v16  ;;  %1854 = vmatprep.subr.bf16.mxu1 %v2449_v17  ;;  %v1951_v16 = vcombine.high %v3254_v12, %v3254_v12  ;;  %v2536_v17 = vld [vmem:[%s3461_s1 + $0x620] ss:$16 sps:$4 sm:$0xff]  }
  0x8b   :  { %1691 = vmatpush1.bf16.msra.mxu0 %v2444_v18  ;;  %1855 = vmatpush1.bf16.msra.mxu1 %v2447_v19  ;;  %v2539_v18 = vld [vmem:[%s3461_s1 + $0x628] ss:$16 sps:$4 sm:$0xff]   ;;  %v2544_v19 = vld [vmem:[%s3461_s1 + $0x644] ss:$16 sps:$4 sm:$0xff]  }
  0x8c   :  { %1692 = vmatprep.subr.bf16.mxu0 %v2452_v20  ;;  %1856 = vmatprep.subr.bf16.mxu1 %v2455_v21  ;;  %v2547_v20 = vld [vmem:[%s3461_s1 + $0x64c] ss:$16 sps:$4 sm:$0xff]   ;;  %v2542_v21 = vld [vmem:[%s3461_s1 + $0x640] ss:$16 sps:$4 sm:$0xff]  }
  0x8f   :  { %1693 = vmatpush1.bf16.msra.mxu0 %v2450_v22  ;;  %1857 = vmatpush1.bf16.msra.mxu1 %v2453_v23  ;;  %v2545_v22 = vld [vmem:[%s3461_s1 + $0x648] ss:$16 sps:$4 sm:$0xff]   ;;  %v2550_v23 = vld [vmem:[%s3461_s1 + $0x664] ss:$16 sps:$4 sm:$0xff]  }
  0x90   :  { %1694 = vmatprep.subr.bf16.mxu0 %v2458_v24  ;;  %1858 = vmatprep.subr.bf16.mxu1 %v2461_v25  ;;  %v2553_v24 = vld [vmem:[%s3461_s1 + $0x66c] ss:$16 sps:$4 sm:$0xff]   ;;  %v2548_v25 = vld [vmem:[%s3461_s1 + $0x660] ss:$16 sps:$4 sm:$0xff]  }
  0x93   :  { %1695 = vmatpush1.bf16.msra.mxu0 %v2456_v26  ;;  %1859 = vmatpush1.bf16.msra.mxu1 %v2459_v27  ;;  %v2551_v26 = vld [vmem:[%s3461_s1 + $0x668] ss:$16 sps:$4 sm:$0xff]   ;;  %v2556_v27 = vld [vmem:[%s3461_s1 + $0x684] ss:$16 sps:$4 sm:$0xff]  }
  0x94   :  { %1696 = vmatprep.subr.bf16.mxu0 %v2464_v28  ;;  %1860 = vmatprep.subr.bf16.mxu1 %v2467_v29  ;;  %v2559_v28 = vld [vmem:[%s3461_s1 + $0x68c] ss:$16 sps:$4 sm:$0xff]   ;;  %v2554_v29 = vld [vmem:[%s3461_s1 + $0x680] ss:$16 sps:$4 sm:$0xff]  }
  0x97   :  { %1697 = vmatpush1.bf16.msra.mxu0 %v2462_v30  ;;  %1861 = vmatpush1.bf16.msra.mxu1 %v2465_v31  ;;  %v2557_v30 = vld [vmem:[%s3461_s1 + $0x688] ss:$16 sps:$4 sm:$0xff]   ;;  %v2562_v31 = vld [vmem:[%s3461_s1 + $0x6a4] ss:$16 sps:$4 sm:$0xff]  }
  0x98   :  { %1698 = vmatprep.subr.bf16.mxu0 %v2470_v32  ;;  %1862 = vmatprep.subr.bf16.mxu1 %v2473_v33  ;;  %v2565_v32 = vld [vmem:[%s3461_s1 + $0x6ac] ss:$16 sps:$4 sm:$0xff]   ;;  %v2560_v33 = vld [vmem:[%s3461_s1 + $0x6a0] ss:$16 sps:$4 sm:$0xff]  }
  0x9b   :  { %1699 = vmatpush1.bf16.msra.mxu0 %v2468_v34  ;;  %1863 = vmatpush1.bf16.msra.mxu1 %v2471_v35  ;;  %v2563_v34 = vld [vmem:[%s3461_s1 + $0x6a8] ss:$16 sps:$4 sm:$0xff]   ;;  %v2568_v35 = vld [vmem:[%s3461_s1 + $0x6c4] ss:$16 sps:$4 sm:$0xff]  }
  0x9c   :  { %1700 = vmatprep.subr.bf16.mxu0 %v2476_v36  ;;  %1864 = vmatprep.subr.bf16.mxu1 %v2479_v37  ;;  %v2571_v36 = vld [vmem:[%s3461_s1 + $0x6cc] ss:$16 sps:$4 sm:$0xff]   ;;  %v2566_v37 = vld [vmem:[%s3461_s1 + $0x6c0] ss:$16 sps:$4 sm:$0xff]  }
  0x9f   :  { %1701 = vmatpush1.bf16.msra.mxu0 %v2474_v38  ;;  %1865 = vmatpush1.bf16.msra.mxu1 %v2477_v39  ;;  %v2569_v38 = vld [vmem:[%s3461_s1 + $0x6c8] ss:$16 sps:$4 sm:$0xff]   ;;  %v2574_v39 = vld [vmem:[%s3461_s1 + $0x6e4] ss:$16 sps:$4 sm:$0xff]  }
  0xa0   :  { %1702 = vmatprep.subr.bf16.mxu0 %v2482_v40  ;;  %1866 = vmatprep.subr.bf16.mxu1 %v2485_v41  ;;  %v2577_v40 = vld [vmem:[%s3461_s1 + $0x6ec] ss:$16 sps:$4 sm:$0xff]   ;;  %v2572_v41 = vld [vmem:[%s3461_s1 + $0x6e0] ss:$16 sps:$4 sm:$0xff]  }
  0xa3   :  { %1703 = vmatpush1.bf16.msra.mxu0 %v2480_v42  ;;  %1867 = vmatpush1.bf16.msra.mxu1 %v2483_v43  ;;  %v2575_v42 = vld [vmem:[%s3461_s1 + $0x6e8] ss:$16 sps:$4 sm:$0xff]   ;;  %v2580_v43 = vld [vmem:[%s3461_s1 + $0x704] ss:$16 sps:$4 sm:$0xff]  }
  0xa4   :  { %1704 = vmatprep.subr.bf16.mxu0 %v2488_v44  ;;  %1868 = vmatprep.subr.bf16.mxu1 %v2491_v45  ;;  %v2583_v44 = vld [vmem:[%s3461_s1 + $0x70c] ss:$16 sps:$4 sm:$0xff]   ;;  %v2578_v45 = vld [vmem:[%s3461_s1 + $0x700] ss:$16 sps:$4 sm:$0xff]  }
  0xa7   :  { %1705 = vmatpush1.bf16.msra.mxu0 %v2486_v46  ;;  %1869 = vmatpush1.bf16.msra.mxu1 %v2489_v47  ;;  %v2581_v46 = vld [vmem:[%s3461_s1 + $0x708] ss:$16 sps:$4 sm:$0xff]   ;;  %v2586_v47 = vld [vmem:[%s3461_s1 + $0x724] ss:$16 sps:$4 sm:$0xff]  }
  0xa8   :  { %1706 = vmatprep.subr.bf16.mxu0 %v2494_v48  ;;  %1870 = vmatprep.subr.bf16.mxu1 %v2497_v49  ;;  %v2589_v48 = vld [vmem:[%s3461_s1 + $0x72c] ss:$16 sps:$4 sm:$0xff]   ;;  %v2584_v49 = vld [vmem:[%s3461_s1 + $0x720] ss:$16 sps:$4 sm:$0xff]  }
  0xab   :  { %1707 = vmatpush1.bf16.msra.mxu0 %v2492_v50  ;;  %1871 = vmatpush1.bf16.msra.mxu1 %v2495_v51  ;;  %v2587_v50 = vld [vmem:[%s3461_s1 + $0x728] ss:$16 sps:$4 sm:$0xff]   ;;  %v2592_v51 = vld [vmem:[%s3461_s1 + $0x744] ss:$16 sps:$4 sm:$0xff]  }
  0xac   :  { %1708 = vmatprep.subr.bf16.mxu0 %v2500_v52  ;;  %1872 = vmatprep.subr.bf16.mxu1 %v2503_v53  ;;  %v2595_v52 = vld [vmem:[%s3461_s1 + $0x74c] ss:$16 sps:$4 sm:$0xff]   ;;  %v2590_v53 = vld [vmem:[%s3461_s1 + $0x740] ss:$16 sps:$4 sm:$0xff]  }
  0xaf   :  { %1709 = vmatpush1.bf16.msra.mxu0 %v2498_v54  ;;  %1873 = vmatpush1.bf16.msra.mxu1 %v2501_v55  ;;  %v2593_v54 = vld [vmem:[%s3461_s1 + $0x748] ss:$16 sps:$4 sm:$0xff]   ;;  %v2598_v55 = vld [vmem:[%s3461_s1 + $0x764] ss:$16 sps:$4 sm:$0xff]  }
  0xb0   :  { %1710 = vmatprep.subr.bf16.mxu0 %v2506_v56  ;;  %1874 = vmatprep.subr.bf16.mxu1 %v2509_v57  ;;  %v2601_v56 = vld [vmem:[%s3461_s1 + $0x76c] ss:$16 sps:$4 sm:$0xff]   ;;  %v2596_v57 = vld [vmem:[%s3461_s1 + $0x760] ss:$16 sps:$4 sm:$0xff]  }
  0xb3   :  { %1711 = vmatpush1.bf16.msra.mxu0 %v2504_v58  ;;  %1875 = vmatpush1.bf16.msra.mxu1 %v2507_v59  ;;  %v2599_v58 = vld [vmem:[%s3461_s1 + $0x768] ss:$16 sps:$4 sm:$0xff]   ;;  %v2604_v59 = vld [vmem:[%s3461_s1 + $0x784] ss:$16 sps:$4 sm:$0xff]  }
  0xb4   :  { %1712 = vmatprep.subr.bf16.mxu0 %v2512_v60  ;;  %1876 = vmatprep.subr.bf16.mxu1 %v2515_v61  ;;  %v2607_v60 = vld [vmem:[%s3461_s1 + $0x78c] ss:$16 sps:$4 sm:$0xff]   ;;  %v2602_v61 = vld [vmem:[%s3461_s1 + $0x780] ss:$16 sps:$4 sm:$0xff]  }
  0xb7   :  { %1713 = vmatpush1.bf16.msra.mxu0 %v2510_v62  ;;  %1877 = vmatpush1.bf16.msra.mxu1 %v2513_v63  ;;  %v2605_v62 = vld [vmem:[%s3461_s1 + $0x788] ss:$16 sps:$4 sm:$0xff]   ;;  %v2610_v63 = vld [vmem:[%s3461_s1 + $0x7a4] ss:$16 sps:$4 sm:$0xff]  }
  0xb8   :  { %1714 = vmatprep.subr.bf16.mxu0 %v2518_v0  ;;  %1878 = vmatprep.subr.bf16.mxu1 %v2521_v1  ;;  %v2613_v0 = vld [vmem:[%s3461_s1 + $0x7ac] ss:$16 sps:$4 sm:$0xff]   ;;  %v2608_v1 = vld [vmem:[%s3461_s1 + $0x7a0] ss:$16 sps:$4 sm:$0xff]  }
  0xbb   :  { %1715 = vmatpush1.bf16.msra.mxu0 %v2516_v2  ;;  %1879 = vmatpush1.bf16.msra.mxu1 %v2519_v3  ;;  %v2611_v2 = vld [vmem:[%s3461_s1 + $0x7a8] ss:$16 sps:$4 sm:$0xff]   ;;  %v2616_v3 = vld [vmem:[%s3461_s1 + $0x7c4] ss:$16 sps:$4 sm:$0xff]  }
  0xbc   :  { %1716 = vmatprep.subr.bf16.mxu0 %v2524_v4  ;;  %1880 = vmatprep.subr.bf16.mxu1 %v2527_v5  ;;  %v2619_v4 = vld [vmem:[%s3461_s1 + $0x7cc] ss:$16 sps:$4 sm:$0xff]   ;;  %v2614_v5 = vld [vmem:[%s3461_s1 + $0x7c0] ss:$16 sps:$4 sm:$0xff]  }
  0xbf   :  { %1717 = vmatpush1.bf16.msra.mxu0 %v2522_v6  ;;  %1881 = vmatpush1.bf16.msra.mxu1 %v2525_v7  ;;  %v2617_v6 = vld [vmem:[%s3461_s1 + $0x7c8] ss:$16 sps:$4 sm:$0xff]   ;;  %v2622_v7 = vld [vmem:[%s3461_s1 + $0x7e4] ss:$16 sps:$4 sm:$0xff]  }
  0xc0   :  { %1727 = vmatprep.subr.bf16.mxu0 %v2532_v8  ;;  %1891 = vmatprep.subr.bf16.mxu1 %v2535_v9  ;;  %v2625_v8 = vld [vmem:[%s3461_s1 + $0x7ec] ss:$16 sps:$4 sm:$0xff]   ;;  %v2620_v9 = vld [vmem:[%s3461_s1 + $0x7e0] ss:$16 sps:$4 sm:$0xff]  }
  0xc2   :  { %1719 = vmatmul.mubr.bf16.vlgmr.msra.gmra.mrb[0].mxu0 %v1948_v10  ;;  %1883 = vmatmul.mubr.bf16.vlgmr.msra.gmra.mrb[0].mxu1 %v1948_v10  ;;  %v2623_v10 = vld [vmem:[%s3461_s1 + $0x7e8] ss:$16 sps:$4 sm:$0xff]  }
  0xc3   :  { %1728 = vmatpush1.bf16.msra.mxu0 %v2530_v13  ;;  %1892 = vmatpush1.bf16.msra.mxu1 %v2533_v14  ;;  %v1950_v13 = vcombine.low %v3254_v12, %v3254_v12  ;;  %v276_v14 = vlaneseq }
  0xc4   :  { %1729 = vmatprep.subr.bf16.mxu0 %v2538_v11  ;;  %1893 = vmatprep.subr.bf16.mxu1 %v2541_v15 }
  0xc5   :  { %1759 = vmatprep.mubr.bf16.mxu0 %v1951_v16  ;;  %1923 = vmatprep.mubr.bf16.mxu1 %v1951_v16  ;;  %v277_v11 = vshrl.u32 %v276_v14, 7 }
  0xc7   :  { %1730 = vmatpush1.bf16.msra.mxu0 %v2536_v17  ;;  %1894 = vmatpush1.bf16.msra.mxu1 %v2539_v18  ;;  %v278_v15 = vsub.s32 0, %v277_v11  ;;  %v286_v16 = vsub.s32 2, %v277_v11  ;;  %v274_v17 = vld [vmem:[%s3463_s2] sm:$0xf]  ;;  %v282_v18 = vsub.s32 1, %v277_v11 }
  0xc8   :  { %1731 = vmatprep.subr.bf16.mxu0 %v2544_v19  ;;  %1895 = vmatprep.subr.bf16.mxu1 %v2547_v20  ;;  %v290_v19 = vsub.s32 3, %v277_v11 }
  0xc9   :  { %v279_v20 = vrot.slane %v274_v17, %v278_v15 }
  0xcb   :  { %1732 = vmatpush1.bf16.msra.mxu0 %v2542_v21  ;;  %1896 = vmatpush1.bf16.msra.mxu1 %v2545_v22  ;;  %v287_v21 = vrot.slane %v274_v17, %v286_v16  ;;  %v283_v22 = vrot.slane %v274_v17, %v282_v18 }
  0xcc   :  { %1733 = vmatprep.subr.bf16.mxu0 %v2550_v23  ;;  %1897 = vmatprep.subr.bf16.mxu1 %v2553_v24  ;;  %v291_v23 = vrot.slane %v274_v17, %v290_v19 }
  0xcf   :  { %1734 = vmatpush1.bf16.msra.mxu0 %v2548_v25  ;;  %1898 = vmatpush1.bf16.msra.mxu1 %v2551_v26 }
  0xd0   :  { %1735 = vmatprep.subr.bf16.mxu0 %v2556_v27  ;;  %1899 = vmatprep.subr.bf16.mxu1 %v2559_v28 }
  0xd3   :  { %1736 = vmatpush1.bf16.msra.mxu0 %v2554_v29  ;;  %1900 = vmatpush1.bf16.msra.mxu1 %v2557_v30 }
  0xd4   :  { %1737 = vmatprep.subr.bf16.mxu0 %v2562_v31  ;;  %1901 = vmatprep.subr.bf16.mxu1 %v2565_v32 }
  0xd7   :  { %1738 = vmatpush1.bf16.msra.mxu0 %v2560_v33  ;;  %1902 = vmatpush1.bf16.msra.mxu1 %v2563_v34 }
  0xd8   :  { %1739 = vmatprep.subr.bf16.mxu0 %v2568_v35  ;;  %1903 = vmatprep.subr.bf16.mxu1 %v2571_v36 }
  0xdb   :  { %1740 = vmatpush1.bf16.msra.mxu0 %v2566_v37  ;;  %1904 = vmatpush1.bf16.msra.mxu1 %v2569_v38 }
  0xdc   :  { %1741 = vmatprep.subr.bf16.mxu0 %v2574_v39  ;;  %1905 = vmatprep.subr.bf16.mxu1 %v2577_v40 }
  0xdf   :  { %1742 = vmatpush1.bf16.msra.mxu0 %v2572_v41  ;;  %1906 = vmatpush1.bf16.msra.mxu1 %v2575_v42 }
  0xe0   :  { %1743 = vmatprep.subr.bf16.mxu0 %v2580_v43  ;;  %1907 = vmatprep.subr.bf16.mxu1 %v2583_v44 }
  0xe3   :  { %1744 = vmatpush1.bf16.msra.mxu0 %v2578_v45  ;;  %1908 = vmatpush1.bf16.msra.mxu1 %v2581_v46 }
  0xe4   :  { %1745 = vmatprep.subr.bf16.mxu0 %v2586_v47  ;;  %1909 = vmatprep.subr.bf16.mxu1 %v2589_v48 }
  0xe7   :  { %1746 = vmatpush1.bf16.msra.mxu0 %v2584_v49  ;;  %1910 = vmatpush1.bf16.msra.mxu1 %v2587_v50 }
  0xe8   :  { %1747 = vmatprep.subr.bf16.mxu0 %v2592_v51  ;;  %1911 = vmatprep.subr.bf16.mxu1 %v2595_v52 }
  0xeb   :  { %1748 = vmatpush1.bf16.msra.mxu0 %v2590_v53  ;;  %1912 = vmatpush1.bf16.msra.mxu1 %v2593_v54 }
  0xec   :  { %1749 = vmatprep.subr.bf16.mxu0 %v2598_v55  ;;  %1913 = vmatprep.subr.bf16.mxu1 %v2601_v56 }
  0xef   :  { %1750 = vmatpush1.bf16.msra.mxu0 %v2596_v57  ;;  %1914 = vmatpush1.bf16.msra.mxu1 %v2599_v58 }
  0xf0   :  { %1751 = vmatprep.subr.bf16.mxu0 %v2604_v59  ;;  %1915 = vmatprep.subr.bf16.mxu1 %v2607_v60 }
  0xf3   :  { %1752 = vmatpush1.bf16.msra.mxu0 %v2602_v61  ;;  %1916 = vmatpush1.bf16.msra.mxu1 %v2605_v62 }
  0xf4   :  { %1753 = vmatprep.subr.bf16.mxu0 %v2610_v63  ;;  %1917 = vmatprep.subr.bf16.mxu1 %v2613_v0 }
  0xf7   :  { %1754 = vmatpush1.bf16.msra.mxu0 %v2608_v1  ;;  %1918 = vmatpush1.bf16.msra.mxu1 %v2611_v2 }
  0xf8   :  { %1755 = vmatprep.subr.bf16.mxu0 %v2616_v3  ;;  %1919 = vmatprep.subr.bf16.mxu1 %v2619_v4 }
  0xfb   :  { %1756 = vmatpush1.bf16.msra.mxu0 %v2614_v5  ;;  %1920 = vmatpush1.bf16.msra.mxu1 %v2617_v6 }
  0xfc   :  { %1757 = vmatprep.subr.bf16.mxu0 %v2622_v7  ;;  %1921 = vmatprep.subr.bf16.mxu1 %v2625_v8 }
  0xff   :  { %1758 = vmatpush1.bf16.msra.mxu0 %v2620_v9  ;;  %1922 = vmatpush1.bf16.msra.mxu1 %v2623_v10 }
 0x102   :  { %1760 = vmatmul.mubr.bf16.vlgmr.msra.gmra.mrb[0].mxu0 %v1950_v13  ;;  %1924 = vmatmul.mubr.bf16.vlgmr.msra.gmra.mrb[0].mxu1 %v1950_v13 }
 0x1d5   :  { %v1761_v24 = vpop.f32.mrb[0].mxu0  ;;  %v1925_v12 = vpop.f32.mrb[0].mxu1 }
 0x1d6   :  { %v2208_v25 = vadd.f32 %v1761_v24, %v279_v20  ;;  %v2210_v26 = vadd.f32 %v1925_v12, %v287_v21  ;;  %v1763_v27 = vpop.f32.mrb[1].mxu0  ;;  %v1927_v28 = vpop.f32.mrb[1].mxu1 }
 0x1d7   :  { %v2209_v29 = vadd.f32 %v1763_v27, %v283_v22  ;;  %v2211_v30 = vadd.f32 %v1927_v28, %v291_v23  ;;  %v1765_v31 = vpop.f32.mrb[2].mxu0  ;;  %v1929_v32 = vpop.f32.mrb[2].mxu1 }
 0x1d8   :  { %v1932_v33 = vmax.f32 %v2208_v25, 0.0  ;;  %v1934_v34 = vmax.f32 %v2210_v26, 0.0  ;;  %v1766_v35 = vpop.f32.mrb[3].mxu0  ;;  %v1930_v36 = vpop.f32.mrb[3].mxu1 }
 0x1d9   :  { %v1933_v37 = vmax.f32 %v2209_v29, 0.0  ;;  %v1935_v38 = vmax.f32 %v2211_v30, 0.0 }
 0x1da   :  { %1936 = vst [vmem:[%s3464_s3] sm:$0xff] %v1932_v33  ;;  %1938 = vst [vmem:[%s3464_s3 + $0x10] sm:$0xff] %v1934_v34 }
 0x1db   :  { %1937 = vst [vmem:[%s3464_s3 + $0x8] sm:$0xff] %v1933_v37  ;;  %1939 = vst [vmem:[%s3464_s3 + $0x18] sm:$0xff] %v1935_v38 }

// kernel: autoencoder_forward.11
= control target key start
LH: loop header
LB: loop body
LE: loop exit
PB: predicated region body
PF: predicated region fallthrough
CT: control target
= control target key end

     0   :  { %s861_s1 = inlined_call_operand.vmem [shape: bf16[256,128], index: 1, kind: input, shape index: {}]   ;;  %s862_s0 = inlined_call_operand.vmem [shape: bf16[128,256], index: 0, kind: input, shape index: {}]   ;;  %s863_s2 = inlined_call_operand.vmem [shape: f32[1,128], index: 2, kind: input, shape index: {}]   ;;  %s864_s3 = inlined_call_operand.vmem [shape: f32[128,128], index: 3, kind: output, shape index: {}]  }
   0x1   :  { %v572_v0 = vld [vmem:[%s861_s1 + $0x40] sm:$0xff]   ;;  %v574_v2 = vld [vmem:[%s861_s1 + $0x48] sm:$0xff]   ;;  %v576_v4 = vld [vmem:[%s861_s1 + $0x50] sm:$0xff]  }
   0x2   :  { %v573_v1 = vld [vmem:[%s861_s1] sm:$0xff]   ;;  %492 = vmatprep.subr.bf16.mxu0 %v572_v0  ;;  %556 = vmatprep.subr.bf16.mxu1 %v572_v0  ;;  %v575_v3 = vld [vmem:[%s861_s1 + $0x8] sm:$0xff]   ;;  %v577_v5 = vld [vmem:[%s861_s1 + $0x10] sm:$0xff]  }
   0x3   :  { %493 = vmatpush3.bf16.msra.mxu0 %v573_v1  ;;  %564 = vmatpush3.bf16.msra.mxu1 %v573_v1  ;;  %v578_v6 = vld [vmem:[%s861_s1 + $0x58] sm:$0xff]   ;;  %v580_v8 = vld [vmem:[%s861_s1 + $0x60] sm:$0xff]   ;;  %v582_v10 = vld [vmem:[%s861_s1 + $0x68] sm:$0xff]  }
   0x4   :  { %494 = vmatprep.subr.bf16.mxu0 %v574_v2  ;;  %557 = vmatprep.subr.bf16.mxu1 %v574_v2  ;;  %v579_v7 = vld [vmem:[%s861_s1 + $0x18] sm:$0xff]   ;;  %v581_v9 = vld [vmem:[%s861_s1 + $0x20] sm:$0xff]   ;;  %v583_v13 = vld [vmem:[%s861_s1 + $0x28] sm:$0xff]  }
   0x5   :  { %v590_v11 = vld [vmem:[%s862_s0 + $0x4] ss:$8 sps:$4 sm:$0xff]   ;;  %v584_v14 = vld [vmem:[%s861_s1 + $0x70] sm:$0xff]   ;;  %v586_v16 = vld [vmem:[%s861_s1 + $0x78] sm:$0xff]  }
   0x6   :  { %v593_v12 = vld [vmem:[%s862_s0 + $0x44] ss:$8 sps:$4 sm:$0xff]   ;;  %278 = vmatprep.mubr.bf16.mxu0 %v590_v11  ;;  %v585_v15 = vld [vmem:[%s861_s1 + $0x30] sm:$0xff]   ;;  %v587_v17 = vld [vmem:[%s861_s1 + $0x38] sm:$0xff]  }
   0x7   :  { %495 = vmatpush3.bf16.msra.mxu0 %v575_v3  ;;  %565 = vmatpush3.bf16.msra.mxu1 %v575_v3  ;;  %v588_v18 = vld [vmem:[%s862_s0] ss:$8 sps:$4 sm:$0xff]   ;;  %v594_v20 = vld [vmem:[%s862_s0 + $0x14] ss:$8 sps:$4 sm:$0xff]   ;;  %v598_v22 = vld [vmem:[%s862_s0 + $0x10] ss:$8 sps:$4 sm:$0xff]  }
   0x8   :  { %496 = vmatprep.subr.bf16.mxu0 %v576_v4  ;;  %558 = vmatprep.subr.bf16.mxu1 %v576_v4  ;;  %v591_v19 = vld [vmem:[%s862_s0 + $0x40] ss:$8 sps:$4 sm:$0xff]   ;;  %v596_v21 = vld [vmem:[%s862_s0 + $0x54] ss:$8 sps:$4 sm:$0xff]   ;;  %v599_v23 = vld [vmem:[%s862_s0 + $0x50] ss:$8 sps:$4 sm:$0xff]  }
   0x9   :  { %310 = vmatprep.mubr.bf16.mxu1 %v593_v12  ;;  %v600_v24 = vld [vmem:[%s862_s0 + $0x24] ss:$8 sps:$4 sm:$0xff]   ;;  %v604_v26 = vld [vmem:[%s862_s0 + $0x20] ss:$8 sps:$4 sm:$0xff]   ;;  %v606_v28 = vld [vmem:[%s862_s0 + $0x34] ss:$8 sps:$4 sm:$0xff]  }
   0xa   :  { %v602_v25 = vld [vmem:[%s862_s0 + $0x64] ss:$8 sps:$4 sm:$0xff]   ;;  %v605_v27 = vld [vmem:[%s862_s0 + $0x60] ss:$8 sps:$4 sm:$0xff]   ;;  %v608_v29 = vld [vmem:[%s862_s0 + $0x74] ss:$8 sps:$4 sm:$0xff]  }
   0xb   :  { %497 = vmatpush3.bf16.msra.mxu0 %v577_v5  ;;  %566 = vmatpush3.bf16.msra.mxu1 %v577_v5  ;;  %v610_v30 = vld [vmem:[%s862_s0 + $0x30] ss:$8 sps:$4 sm:$0xff]   ;;  %v795_v34 = vld [vmem:[%s863_s2] ss:$0 sm:$0xff] }
   0xc   :  { %498 = vmatprep.subr.bf16.mxu0 %v578_v6  ;;  %559 = vmatprep.subr.bf16.mxu1 %v578_v6  ;;  %v611_v31 = vld [vmem:[%s862_s0 + $0x70] ss:$8 sps:$4 sm:$0xff]  }
   0xf   :  { %499 = vmatpush3.bf16.msra.mxu0 %v579_v7  ;;  %567 = vmatpush3.bf16.msra.mxu1 %v579_v7 }
  0x10   :  { %500 = vmatprep.subr.bf16.mxu0 %v580_v8  ;;  %560 = vmatprep.subr.bf16.mxu1 %v580_v8 }
  0x13   :  { %501 = vmatpush3.bf16.msra.mxu0 %v581_v9  ;;  %568 = vmatpush3.bf16.msra.mxu1 %v581_v9 }
  0x14   :  { %502 = vmatprep.subr.bf16.mxu0 %v582_v10  ;;  %561 = vmatprep.subr.bf16.mxu1 %v582_v10 }
  0x17   :  { %503 = vmatpush3.bf16.msra.mxu0 %v583_v13  ;;  %569 = vmatpush3.bf16.msra.mxu1 %v583_v13 }
  0x18   :  { %504 = vmatprep.subr.bf16.mxu0 %v584_v14  ;;  %562 = vmatprep.subr.bf16.mxu1 %v584_v14 }
  0x1b   :  { %505 = vmatpush3.bf16.msra.mxu0 %v585_v15  ;;  %570 = vmatpush3.bf16.msra.mxu1 %v585_v15 }
  0x1c   :  { %506 = vmatprep.subr.bf16.mxu0 %v586_v16  ;;  %563 = vmatprep.subr.bf16.mxu1 %v586_v16 }
  0x1f   :  { %507 = vmatpush3.bf16.msra.mxu0 %v587_v17  ;;  %571 = vmatpush3.bf16.msra.mxu1 %v587_v17 }
  0x22   :  { %279 = vmatmul.mubr.bf16.vlgmr.msra.gmra.mrb[0].mxu0 %v588_v18  ;;  %311 = vmatmul.mubr.bf16.vlgmr.msra.gmra.mrb[0].mxu1 %v591_v19 }
  0x23   :  { %286 = vmatprep.mubr.bf16.mxu0 %v594_v20  ;;  %318 = vmatprep.mubr.bf16.mxu1 %v596_v21 }
  0x2a   :  { %287 = vmatmul.mubr.bf16.gmra.mrb[4].mxu0 %v598_v22  ;;  %319 = vmatmul.mubr.bf16.gmra.mrb[4].mxu1 %v599_v23 }
  0x2b   :  { %294 = vmatprep.mubr.bf16.mxu0 %v600_v24  ;;  %326 = vmatprep.mubr.bf16.mxu1 %v602_v25 }
  0x32   :  { %295 = vmatmul.mubr.bf16.gmra.mrb[8].mxu0 %v604_v26  ;;  %327 = vmatmul.mubr.bf16.gmra.mrb[8].mxu1 %v605_v27 }
  0x33   :  { %302 = vmatprep.mubr.bf16.mxu0 %v606_v28  ;;  %334 = vmatprep.mubr.bf16.mxu1 %v608_v29 }
  0x3a   :  { %303 = vmatmul.mubr.bf16.gmra.mrb[12].mxu0 %v610_v30  ;;  %335 = vmatmul.mubr.bf16.gmra.mrb[12].mxu1 %v611_v31 }
  0xf5   :  { %v508_v32 = vpop.f32.mrb[0].mxu0  ;;  %v532_v33 = vpop.f32.mrb[0].mxu1 }
  0xf6   :  { %v509_v35 = vpop.f32.mrb[1].mxu0  ;;  %v533_v36 = vpop.f32.mrb[1].mxu1 }
  0xf7   :  { %v510_v37 = vadd.f32 %v509_v35, %v508_v32  ;;  %v534_v38 = vadd.f32 %v533_v36, %v532_v33  ;;  %v511_v39 = vpop.f32.mrb[2].mxu0  ;;  %v535_v40 = vpop.f32.mrb[2].mxu1 }
  0xf8   :  { %v512_v41 = vpop.f32.mrb[3].mxu0  ;;  %v536_v42 = vpop.f32.mrb[3].mxu1 }
  0xf9   :  { %v281_v43 = vadd.f32 %v510_v37, %v795_v34  ;;  %v313_v44 = vadd.f32 %v534_v38, %v795_v34  ;;  %v513_v45 = vadd.f32 %v512_v41, %v511_v39  ;;  %v537_v46 = vadd.f32 %v536_v42, %v535_v40 }
  0xfb   :  { %v343_v47 = vsub.f32 0.0, %v281_v43  ;;  %v351_v48 = vsub.f32 0.0, %v313_v44  ;;  %v284_v49 = vadd.f32 %v513_v45, %v795_v34  ;;  %v316_v50 = vadd.f32 %v537_v46, %v795_v34 }
  0xfd   :  { %v359_v51 = vmul.f32 1.442695, %v343_v47  ;;  %v375_v52 = vmul.f32 1.442695, %v351_v48  ;;  %v344_v53 = vsub.f32 0.0, %v284_v49  ;;  %v352_v54 = vsub.f32 0.0, %v316_v50 }
  0xfe   :  { %v514_v55 = vpop.f32.mrb[4].mxu0  ;;  %v538_v56 = vpop.f32.mrb[4].mxu1 }
  0xff   :  { %612 = vpow2.f32 %v359_v51  ;;  %v361_v57 = vmul.f32 1.442695, %v344_v53  ;;  %v377_v58 = vmul.f32 1.442695, %v352_v54  ;;  %v515_v59 = vpop.f32.mrb[5].mxu0  ;;  %v539_v60 = vpop.f32.mrb[5].mxu1 }
 0x100   :  { %614 = vpow2.f32 %v375_v52  ;;  %v516_v61 = vadd.f32 %v515_v59, %v514_v55  ;;  %v540_v62 = vadd.f32 %v539_v60, %v538_v56  ;;  %v517_v63 = vpop.f32.mrb[6].mxu0  ;;  %v541_v0 = vpop.f32.mrb[6].mxu1 }
 0x101   :  { %616 = vpow2.f32 %v361_v57  ;;  %v518_v1 = vpop.f32.mrb[7].mxu0  ;;  %v542_v2 = vpop.f32.mrb[7].mxu1 }
 0x102   :  { %618 = vpow2.f32 %v377_v58  ;;  %v289_v3 = vadd.f32 %v516_v61, %v795_v34  ;;  %v321_v4 = vadd.f32 %v540_v62, %v795_v34  ;;  %v519_v5 = vadd.f32 %v518_v1, %v517_v63 }
 0x103   :  { %v543_v6 = vadd.f32 %v542_v2, %v541_v0 }
 0x104   :  { %v345_v7 = vsub.f32 0.0, %v289_v3  ;;  %v353_v8 = vsub.f32 0.0, %v321_v4  ;;  %v292_v9 = vadd.f32 %v519_v5, %v795_v34 }
 0x105   :  { %v324_v10 = vadd.f32 %v543_v6, %v795_v34  ;;  %v520_v11 = vpop.f32.mrb[8].mxu0  ;;  %v544_v12 = vpop.f32.mrb[8].mxu1 }
 0x106   :  { %v363_v13 = vmul.f32 1.442695, %v345_v7  ;;  %v379_v14 = vmul.f32 1.442695, %v353_v8  ;;  %v346_v15 = vsub.f32 0.0, %v292_v9  ;;  %v521_v16 = vpop.f32.mrb[9].mxu0 }
 0x107   :  { %v354_v17 = vsub.f32 0.0, %v324_v10  ;;  %v522_v18 = vadd.f32 %v521_v16, %v520_v11  ;;  %v545_v19 = vpop.f32.mrb[9].mxu1  ;;  %v523_v20 = vpop.f32.mrb[10].mxu0 }
 0x108   :  { %620 = vpow2.f32 %v363_v13  ;;  %v365_v21 = vmul.f32 1.442695, %v346_v15  ;;  %v546_v22 = vadd.f32 %v545_v19, %v544_v12  ;;  %v547_v23 = vpop.f32.mrb[10].mxu1  ;;  %v524_v24 = vpop.f32.mrb[11].mxu0 }
 0x109   :  { %v613_v25 = vpop.eup %612  ;;  %622 = vpow2.f32 %v379_v14  ;;  %v381_v26 = vmul.f32 1.442695, %v354_v17  ;;  %v297_v27 = vadd.f32 %v522_v18, %v795_v34  ;;  %v525_v28 = vadd.f32 %v524_v24, %v523_v20  ;;  %v548_v29 = vpop.f32.mrb[11].mxu1 }
 0x10a   :  { %v615_v30 = vpop.eup %614  ;;  %v391_v31 = vadd.f32 1.0, %v613_v25  ;;  %624 = vpow2.f32 %v365_v21  ;;  %v329_v32 = vadd.f32 %v546_v22, %v795_v34  ;;  %v549_v33 = vadd.f32 %v548_v29, %v547_v23 }
 0x10b   :  { %v617_v35 = vpop.eup %616  ;;  %v399_v36 = vadd.f32 1.0, %v615_v30  ;;  %626 = vpow2.f32 %v381_v26  ;;  %v347_v37 = vsub.f32 0.0, %v297_v27  ;;  %v300_v38 = vadd.f32 %v525_v28, %v795_v34 }
 0x10c   :  { %v619_v39 = vpop.eup %618  ;;  %628 = vrcp.f32 %v391_v31  ;;  %v392_v40 = vadd.f32 1.0, %v617_v35  ;;  %v355_v41 = vsub.f32 0.0, %v329_v32  ;;  %v332_v42 = vadd.f32 %v549_v33, %v795_v34 }
 0x10d   :  { %630 = vrcp.f32 %v399_v36  ;;  %v400_v43 = vadd.f32 1.0, %v619_v39  ;;  %v367_v44 = vmul.f32 1.442695, %v347_v37  ;;  %v348_v45 = vsub.f32 0.0, %v300_v38  ;;  %v526_v46 = vpop.f32.mrb[12].mxu0  ;;  %v550_v47 = vpop.f32.mrb[12].mxu1 }
 0x10e   :  { %632 = vrcp.f32 %v392_v40  ;;  %v383_v48 = vmul.f32 1.442695, %v355_v41  ;;  %v356_v49 = vsub.f32 0.0, %v332_v42  ;;  %v527_v50 = vpop.f32.mrb[13].mxu0  ;;  %v551_v51 = vpop.f32.mrb[13].mxu1 }
 0x10f   :  { %634 = vrcp.f32 %v400_v43  ;;  %v369_v52 = vmul.f32 1.442695, %v348_v45  ;;  %v528_v53 = vadd.f32 %v527_v50, %v526_v46  ;;  %v552_v54 = vadd.f32 %v551_v51, %v550_v47  ;;  %v529_v55 = vpop.f32.mrb[14].mxu0  ;;  %v553_v56 = vpop.f32.mrb[14].mxu1 }
 0x110   :  { %636 = vpow2.f32 %v367_v44  ;;  %v385_v57 = vmul.f32 1.442695, %v356_v49  ;;  %v530_v58 = vpop.f32.mrb[15].mxu0  ;;  %v554_v59 = vpop.f32.mrb[15].mxu1 }
 0x111   :  { %638 = vpow2.f32 %v383_v48  ;;  %v305_v60 = vadd.f32 %v528_v53, %v795_v34  ;;  %v337_v61 = vadd.f32 %v552_v54, %v795_v34  ;;  %v531_v62 = vadd.f32 %v530_v58, %v529_v55 }
 0x112   :  { %v621_v63 = vpop.eup %620  ;;  %640 = vpow2.f32 %v369_v52  ;;  %v555_v0 = vadd.f32 %v554_v59, %v553_v56 }
 0x113   :  { %v623_v1 = vpop.eup %622  ;;  %v393_v2 = vadd.f32 1.0, %v621_v63  ;;  %642 = vpow2.f32 %v385_v57  ;;  %v349_v3 = vsub.f32 0.0, %v305_v60  ;;  %v357_v4 = vsub.f32 0.0, %v337_v61 }
 0x114   :  { %v625_v5 = vpop.eup %624  ;;  %v401_v6 = vadd.f32 1.0, %v623_v1  ;;  %v308_v7 = vadd.f32 %v531_v62, %v795_v34  ;;  %v340_v8 = vadd.f32 %v555_v0, %v795_v34 }
 0x115   :  { %v627_v9 = vpop.eup %626  ;;  %644 = vrcp.f32 %v393_v2  ;;  %v394_v10 = vadd.f32 1.0, %v625_v5  ;;  %v371_v11 = vmul.f32 1.442695, %v349_v3  ;;  %v387_v12 = vmul.f32 1.442695, %v357_v4 }
 0x116   :  { %v629_v13 = vpop.eup %628  ;;  %646 = vrcp.f32 %v401_v6  ;;  %v402_v14 = vadd.f32 1.0, %v627_v9  ;;  %v350_v15 = vsub.f32 0.0, %v308_v7  ;;  %v358_v16 = vsub.f32 0.0, %v340_v8 }
 0x117   :  { %v631_v17 = vpop.eup %630  ;;  %439 = vst [vmem:[%s864_s3] sm:$0xff] %v629_v13  ;;  %648 = vrcp.f32 %v394_v10 }
 0x118   :  { %v633_v18 = vpop.eup %632  ;;  %447 = vst [vmem:[%s864_s3 + $0x40] sm:$0xff] %v631_v17  ;;  %650 = vrcp.f32 %v402_v14  ;;  %v373_v34 = vmul.f32 1.442695, %v350_v15  ;;  %v389_v19 = vmul.f32 1.442695, %v358_v16 }
 0x119   :  { %v635_v20 = vpop.eup %634  ;;  %440 = vst [vmem:[%s864_s3 + $0x8] sm:$0xff] %v633_v18  ;;  %652 = vpow2.f32 %v371_v11 }
 0x11a   :  { %v637_v21 = vpop.eup %636  ;;  %448 = vst [vmem:[%s864_s3 + $0x48] sm:$0xff] %v635_v20  ;;  %654 = vpow2.f32 %v387_v12 }
 0x11b   :  { %v639_v22 = vpop.eup %638  ;;  %v395_v23 = vadd.f32 1.0, %v637_v21  ;;  %656 = vpow2.f32 %v373_v34 }
 0x11c   :  { %v641_v24 = vpop.eup %640  ;;  %v403_v25 = vadd.f32 1.0, %v639_v22  ;;  %658 = vpow2.f32 %v389_v19 }
 0x11d   :  { %v643_v26 = vpop.eup %642  ;;  %660 = vrcp.f32 %v395_v23  ;;  %v396_v27 = vadd.f32 1.0, %v641_v24 }
 0x11e   :  { %662 = vrcp.f32 %v403_v25  ;;  %v404_v28 = vadd.f32 1.0, %v643_v26 }
 0x11f   :  { %v645_v29 = vpop.eup %644  ;;  %664 = vrcp.f32 %v396_v27 }
 0x120   :  { %v647_v30 = vpop.eup %646  ;;  %441 = vst [vmem:[%s864_s3 + $0x10] sm:$0xff] %v645_v29  ;;  %666 = vrcp.f32 %v404_v28 }
 0x121   :  { %v649_v31 = vpop.eup %648  ;;  %449 = vst [vmem:[%s864_s3 + $0x50] sm:$0xff] %v647_v30 }
 0x122   :  { %v651_v32 = vpop.eup %650  ;;  %442 = vst [vmem:[%s864_s3 + $0x18] sm:$0xff] %v649_v31 }
 0x123   :  { %v653_v33 = vpop.eup %652  ;;  %450 = vst [vmem:[%s864_s3 + $0x58] sm:$0xff] %v651_v32 }
 0x124   :  { %v655_v35 = vpop.eup %654  ;;  %v397_v36 = vadd.f32 1.0, %v653_v33 }
 0x125   :  { %v657_v37 = vpop.eup %656  ;;  %v405_v38 = vadd.f32 1.0, %v655_v35 }
 0x126   :  { %v659_v39 = vpop.eup %658  ;;  %668 = vrcp.f32 %v397_v36  ;;  %v398_v40 = vadd.f32 1.0, %v657_v37 }
 0x127   :  { %v661_v41 = vpop.eup %660  ;;  %670 = vrcp.f32 %v405_v38  ;;  %v406_v42 = vadd.f32 1.0, %v659_v39 }
 0x128   :  { %v663_v43 = vpop.eup %662  ;;  %443 = vst [vmem:[%s864_s3 + $0x20] sm:$0xff] %v661_v41  ;;  %672 = vrcp.f32 %v398_v40 }
 0x129   :  { %v665_v44 = vpop.eup %664  ;;  %451 = vst [vmem:[%s864_s3 + $0x60] sm:$0xff] %v663_v43  ;;  %674 = vrcp.f32 %v406_v42 }
 0x12a   :  { %v667_v45 = vpop.eup %666  ;;  %444 = vst [vmem:[%s864_s3 + $0x28] sm:$0xff] %v665_v44 }
 0x12b   :  { %452 = vst [vmem:[%s864_s3 + $0x68] sm:$0xff] %v667_v45 }
 0x130   :  { %v669_v46 = vpop.eup %668 }
 0x131   :  { %v671_v47 = vpop.eup %670  ;;  %445 = vst [vmem:[%s864_s3 + $0x30] sm:$0xff] %v669_v46 }
 0x132   :  { %v673_v48 = vpop.eup %672  ;;  %453 = vst [vmem:[%s864_s3 + $0x70] sm:$0xff] %v671_v47 }
 0x133   :  { %v675_v49 = vpop.eup %674  ;;  %446 = vst [vmem:[%s864_s3 + $0x38] sm:$0xff] %v673_v48 }
 0x134   :  { %454 = vst [vmem:[%s864_s3 + $0x78] sm:$0xff] %v675_v49 }

</bundles_post_ra>
